<compile_context>
chip_gen: v7x
topology: tpu7x:2x2x1
jax: 0.10.0
libtpu: 0.0.40
codegen_flags: <defaults>
</compile_context>

<pallas_src>
import jax
import jax.numpy as jnp
import numpy as np
from jax.experimental import pallas as pl
from jax.experimental.pallas import tpu as pltpu

# Architecture constants forced by the module's forward pass:
D_MODEL = 100                 # a row is viewed as 1x10x10
D_PAD = 128                   # zero-padded contraction dim for the MXU
N_SEGMENT = 64                # avg_fc operates on 64 features
D_K = 32                      # 2048 conv channels / 64 segments
N_CH = N_SEGMENT * D_K        # 2048
LEN = 2                       # enc_input[:, :1] and enc_input[:, 1:]
TILE_ROWS = 256               # rows (= batch * LEN) per grid step


def _round_up(n, m):
    return ((n + m - 1) // m) * m


def _mr_cnn_kernel(x_ref, w_ref, b_ref, w1_ref, w2_ref, kseg_ref, ksegT_ref,
                   pair_ref, oq_ref, ok_ref, ov_ref):
    """One batch tile: fused conv matmul + pooling + SE gate + soft-threshold."""
    x = x_ref[...]                                  # (T, 128) bf16
    # Fused wq|wk|wv "conv" (full-kernel Conv2d == matmul): one wide MXU push.
    c_all = jnp.dot(x, w_ref[...],
                    preferred_element_type=jnp.float32) + b_ref[...]   # (T, 6144) f32

    kseg = kseg_ref[...]                            # (2048, 64) one-hot: channel -> segment
    ksegT = ksegT_ref[...]                          # (64, 2048)
    pair = pair_ref[...]                            # (T, T) tile-local 2x2 block-diag of ones
    w1 = w1_ref[...]                                # (64, 4)
    w2 = w2_ref[...]                                # (4, 64)
    inv_pool = 1.0 / (LEN * D_K)

    def branch(c, o_ref):
        # AdaptiveAvgPool2d(1) over (len, d_k): d_k-sum via the one-hot matmul,
        # len-sum + broadcast back to both rows of the pair via the pair matrix.
        seg_sum = jnp.dot(c, kseg, preferred_element_type=jnp.float32)           # (T, 64)
        y = jnp.dot(pair, seg_sum, preferred_element_type=jnp.float32) * inv_pool
        # avg_fc: Linear(64->4, no bias) -> ReLU -> Linear(4->64, no bias) -> Sigmoid
        h = jnp.maximum(jnp.dot(y, w1, preferred_element_type=jnp.float32), 0.0)  # (T, 4)
        z = jax.nn.sigmoid(jnp.dot(h, w2, preferred_element_type=jnp.float32))    # (T, 64)
        thr = jnp.dot(z, ksegT, preferred_element_type=jnp.float32)               # (T, 2048)
        # soft-threshold: sign(c) * max(|c| - thr, 0) == c - clip(c, -thr, thr)
        o_ref[...] = c - jnp.clip(c, -thr, thr)

    branch(c_all[:, 0:N_CH], oq_ref)
    branch(c_all[:, N_CH:2 * N_CH], ok_ref)
    branch(c_all[:, 2 * N_CH:3 * N_CH], ov_ref)


def init_params(key, d_model=D_MODEL, d_k=D_K):
    """Deterministic synthetic parameters matching the module's __init__ shapes."""
    ks = jax.random.split(key, 8)
    std = np.sqrt(2.0 / (d_model + d_k))

    def conv_w(k):
        # Conv2d(1, 2048, 10) weight (2048, 1, 10, 10) flattened -> (2048, 100) -> (100, 2048)
        return (jax.random.normal(k, (N_CH, d_model)) * std).T.astype(jnp.float32)

    bound = 1.0 / np.sqrt(d_model)   # PyTorch default conv bias init range

    def conv_b(k):
        return jax.random.uniform(k, (1, N_CH), minval=-bound,
                                  maxval=bound).astype(jnp.float32)

    # avg_fc: Linear(64, 4, bias=False) then Linear(4, 64, bias=False); stored transposed.
    w1 = (jax.random.normal(ks[6], (N_SEGMENT // 16, N_SEGMENT))
          * (1.0 / np.sqrt(N_SEGMENT))).T.astype(jnp.float32)
    w2 = (jax.random.normal(ks[7], (N_SEGMENT, N_SEGMENT // 16))
          * (1.0 / np.sqrt(N_SEGMENT // 16))).T.astype(jnp.float32)
    return dict(wq=conv_w(ks[0]), wk=conv_w(ks[1]), wv=conv_w(ks[2]),
                bq=conv_b(ks[3]), bk=conv_b(ks[4]), bv=conv_b(ks[5]),
                w1=w1, w2=w2)


def mr_cnn_forward(enc_input, params):
    sz_b, length, d_model = enc_input.shape
    assert length == LEN and d_model == D_MODEL
    b2 = sz_b * LEN

    # Row tile: multiple of 8 sublanes and even (so LEN=2 pairs never straddle a tile).
    tile_rows = min(TILE_ROWS, _round_up(b2, 8))
    rows_pad = _round_up(b2, tile_rows)
    grid = (rows_pad // tile_rows,)

    # (B*L, 100) rows; zero-pad K 100->128 and rows b2->rows_pad; bf16 MXU operand.
    x = enc_input.reshape(b2, d_model).astype(jnp.float32)
    x = jnp.pad(x, ((0, rows_pad - b2), (0, D_PAD - d_model))).astype(jnp.bfloat16)

    # Fused conv weights / biases (VMEM-resident across all grid steps).
    w_all = jnp.concatenate([params["wq"], params["wk"], params["wv"]], axis=1)    # (100, 6144)
    w_all = jnp.pad(w_all, ((0, D_PAD - d_model), (0, 0))).astype(jnp.bfloat16)    # (128, 6144)
    b_all = jnp.concatenate([params["bq"], params["bk"], params["bv"]], axis=1)    # (1, 6144)

    # Constant selectors (small / tile-local; no O(B^2) matrices).
    col = jnp.arange(N_CH) // D_K
    kseg = (col[:, None] == jnp.arange(N_SEGMENT)[None, :]).astype(jnp.float32)    # (2048, 64)
    ksegT = kseg.T                                                                 # (64, 2048)
    r = jnp.arange(tile_rows)
    pair = (r[:, None] // LEN == r[None, :] // LEN).astype(jnp.float32)            # (T, T)

    def row_spec(cols):
        return pl.BlockSpec((tile_rows, cols), lambda i: (i, 0))

    def const_spec(shape):
        return pl.BlockSpec(shape, lambda i: (0, 0))

    outs = pl.pallas_call(
        _mr_cnn_kernel,
        grid=grid,
        out_shape=[jax.ShapeDtypeStruct((rows_pad, N_CH), jnp.float32)] * 3,
        in_specs=[
            row_spec(D_PAD),                           # x tile
            const_spec((D_PAD, 3 * N_CH)),             # fused conv weights (bf16)
            const_spec((1, 3 * N_CH)),                 # fused conv bias
            const_spec((N_SEGMENT, N_SEGMENT // 16)),  # avg_fc w1 (64, 4)
            const_spec((N_SEGMENT // 16, N_SEGMENT)),  # avg_fc w2 (4, 64)
            const_spec((N_CH, N_SEGMENT)),             # kseg
            const_spec((N_SEGMENT, N_CH)),             # ksegT
            const_spec((tile_rows, tile_rows)),        # pair matrix
        ],
        out_specs=[row_spec(N_CH)] * 3,
        compiler_params=pltpu.CompilerParams(
            dimension_semantics=("parallel",),
            vmem_limit_bytes=48 * 1024 * 1024,
        ),
    )(x, w_all, b_all, params["w1"], params["w2"], kseg, ksegT, pair)

    def final_reshape(c):
        # (B*L, 2048) -> (B, L, 64, 32) -> (B, 64, L, 32) -> (-1, 1, 32, 2)
        c4 = c[:b2].reshape(sz_b, LEN, N_SEGMENT, D_K).transpose(0, 2, 1, 3)
        return c4.reshape(-1, 1, 32, 2)

    return tuple(final_reshape(o) for o in outs)


def _reference_forward(enc_input, params):
    """Pure-JAX reference mirroring the PyTorch forward (for correctness check)."""
    sz_b = enc_input.shape[0]
    x = enc_input.reshape(sz_b * LEN, D_MODEL).astype(jnp.float32)
    xb = x.astype(jnp.bfloat16).astype(jnp.float32)   # mirror the kernel's bf16 MXU operands
    hi = jax.lax.Precision.HIGHEST

    def branch(w, b):
        wb = w.astype(jnp.bfloat16).astype(jnp.float32)
        c = jnp.dot(xb, wb, precision=hi) + b                                      # (B2, 2048)
        c4 = c.reshape(sz_b, LEN, N_SEGMENT, D_K).transpose(0, 2, 1, 3)            # (B, 64, 2, 32)
        y = c4.mean(axis=(2, 3))                                                   # (B, 64)
        z = jax.nn.sigmoid(
            jnp.dot(jnp.maximum(jnp.dot(y, params["w1"], precision=hi), 0.0),
                    params["w2"], precision=hi))
        thr = jnp.abs(z)[:, :, None, None]
        out = jnp.sign(c4) * jnp.maximum(jnp.abs(c4) - thr, 0.0)
        return out.reshape(-1, 1, 32, 2)

    return (branch(params["wq"], params["bq"]),
            branch(params["wk"], params["bk"]),
            branch(params["wv"], params["bv"]))


if __name__ == "__main__":
    key = jax.random.PRNGKey(0)
    pkey, xkey = jax.random.split(key)
    params = init_params(pkey)

    sz_b = 2
    enc_input = jax.random.normal(xkey, (sz_b, LEN, D_MODEL), dtype=jnp.float32)

    outs = jax.jit(mr_cnn_forward)(enc_input, params)
    outs = jax.block_until_ready(outs)

    refs = _reference_forward(enc_input, params)
    for o, ref in zip(outs, refs):
        assert o.shape == (sz_b * N_SEGMENT, 1, 32, 2), o.shape
        # Tolerance loosened vs pure-f32 because MXU operands are bf16 (per review).
        np.testing.assert_allclose(np.asarray(o), np.asarray(ref), atol=1e-2, rtol=1e-2)

    print("KERNEL_OK")
</pallas_src>

<mosaic_0001>
module attributes {stable_mosaic.version = 11 : i64} {
  func.func @_mr_cnn_kernel(%arg0: i32, %arg1: memref<8x128xbf16, #tpu.memory_space<vmem>>, %arg2: memref<128x6144xbf16, #tpu.memory_space<vmem>>, %arg3: memref<1x6144xf32, #tpu.memory_space<vmem>>, %arg4: memref<64x4xf32, #tpu.memory_space<vmem>>, %arg5: memref<4x64xf32, #tpu.memory_space<vmem>>, %arg6: memref<2048x64xf32, #tpu.memory_space<vmem>>, %arg7: memref<64x2048xf32, #tpu.memory_space<vmem>>, %arg8: memref<8x8xf32, #tpu.memory_space<vmem>>, %arg9: memref<8x2048xf32, #tpu.memory_space<vmem>>, %arg10: memref<8x2048xf32, #tpu.memory_space<vmem>>, %arg11: memref<8x2048xf32, #tpu.memory_space<vmem>>) attributes {dimension_semantics = [#tpu.dimension_semantics<parallel>], iteration_bounds = array<i64: 1>, scalar_prefetch = 0 : i64, scratch_operands = 0 : i64, tpu.core_type = #tpu.core_type<tc>, window_params = [{transform_indices = @transform_0, window_bounds = array<i64: 8, 128>}, {pipeline_mode = #tpu.pipeline_mode<synchronous>, transform_indices = @transform_1, window_bounds = array<i64: 128, 6144>}, {pipeline_mode = #tpu.pipeline_mode<synchronous>, transform_indices = @transform_2, window_bounds = array<i64: 1, 6144>}, {pipeline_mode = #tpu.pipeline_mode<synchronous>, transform_indices = @transform_3, window_bounds = array<i64: 64, 4>}, {pipeline_mode = #tpu.pipeline_mode<synchronous>, transform_indices = @transform_4, window_bounds = array<i64: 4, 64>}, {pipeline_mode = #tpu.pipeline_mode<synchronous>, transform_indices = @transform_5, window_bounds = array<i64: 2048, 64>}, {pipeline_mode = #tpu.pipeline_mode<synchronous>, transform_indices = @transform_6, window_bounds = array<i64: 64, 2048>}, {pipeline_mode = #tpu.pipeline_mode<synchronous>, transform_indices = @transform_7, window_bounds = array<i64: 8, 8>}, {transform_indices = @transform_8, window_bounds = array<i64: 8, 2048>}, {transform_indices = @transform_9, window_bounds = array<i64: 8, 2048>}, {transform_indices = @transform_10, window_bounds = array<i64: 8, 2048>}]} {
    %c0 = arith.constant 0 : index
    %c0_0 = arith.constant 0 : index
    %0 = vector.load %arg1[%c0, %c0_0] : memref<8x128xbf16, #tpu.memory_space<vmem>>, vector<8x128xbf16>
    %c0_1 = arith.constant 0 : index
    %c0_2 = arith.constant 0 : index
    %1 = vector.load %arg2[%c0_1, %c0_2] : memref<128x6144xbf16, #tpu.memory_space<vmem>>, vector<128x6144xbf16>
    %cst = arith.constant dense<0.000000e+00> : vector<8x6144xf32>
    %2 = tpu.matmul %0, %1, %cst {dimension_numbers = #tpu.dot_dimension_numbers<[1], [0], [0], [1], [0, 0, 1, 1], [], []>} : vector<8x128xbf16>, vector<128x6144xbf16>, vector<8x6144xf32> -> vector<8x6144xf32>
    %c0_3 = arith.constant 0 : index
    %c0_4 = arith.constant 0 : index
    %3 = vector.load %arg3[%c0_3, %c0_4] : memref<1x6144xf32, #tpu.memory_space<vmem>>, vector<1x6144xf32>
    %4 = vector.broadcast %3 : vector<1x6144xf32> to vector<8x6144xf32>
    %5 = arith.addf %2, %4 : vector<8x6144xf32>
    %c0_5 = arith.constant 0 : index
    %c0_6 = arith.constant 0 : index
    %6 = vector.load %arg6[%c0_5, %c0_6] : memref<2048x64xf32, #tpu.memory_space<vmem>>, vector<2048x64xf32>
    %c0_7 = arith.constant 0 : index
    %c0_8 = arith.constant 0 : index
    %7 = vector.load %arg7[%c0_7, %c0_8] : memref<64x2048xf32, #tpu.memory_space<vmem>>, vector<64x2048xf32>
    %c0_9 = arith.constant 0 : index
    %c0_10 = arith.constant 0 : index
    %8 = vector.load %arg8[%c0_9, %c0_10] : memref<8x8xf32, #tpu.memory_space<vmem>>, vector<8x8xf32>
    %c0_11 = arith.constant 0 : index
    %c0_12 = arith.constant 0 : index
    %9 = vector.load %arg4[%c0_11, %c0_12] : memref<64x4xf32, #tpu.memory_space<vmem>>, vector<64x4xf32>
    %c0_13 = arith.constant 0 : index
    %c0_14 = arith.constant 0 : index
    %10 = vector.load %arg5[%c0_13, %c0_14] : memref<4x64xf32, #tpu.memory_space<vmem>>, vector<4x64xf32>
    %11 = vector.extract_strided_slice %5 {offsets = [0, 0], sizes = [8, 2048], strides = [1, 1]} : vector<8x6144xf32> to vector<8x2048xf32>
    %cst_15 = arith.constant dense<0.000000e+00> : vector<8x64xf32>
    %12 = tpu.matmul %11, %6, %cst_15 {dimension_numbers = #tpu.dot_dimension_numbers<[1], [0], [0], [1], [0, 0, 1, 1], [], []>} : vector<8x2048xf32>, vector<2048x64xf32>, vector<8x64xf32> -> vector<8x64xf32>
    %cst_16 = arith.constant dense<0.000000e+00> : vector<8x64xf32>
    %13 = tpu.matmul %8, %12, %cst_16 {dimension_numbers = #tpu.dot_dimension_numbers<[1], [0], [0], [1], [0, 0, 1, 1], [], []>} : vector<8x8xf32>, vector<8x64xf32>, vector<8x64xf32> -> vector<8x64xf32>
    %cst_17 = arith.constant 1.562500e-02 : f32
    %14 = vector.broadcast %cst_17 : f32 to vector<8x64xf32>
    %15 = arith.mulf %13, %14 : vector<8x64xf32>
    %cst_18 = arith.constant dense<0.000000e+00> : vector<8x4xf32>
    %16 = tpu.matmul %15, %9, %cst_18 {dimension_numbers = #tpu.dot_dimension_numbers<[1], [0], [0], [1], [0, 0, 1, 1], [], []>} : vector<8x64xf32>, vector<64x4xf32>, vector<8x4xf32> -> vector<8x4xf32>
    %cst_19 = arith.constant 0.000000e+00 : f32
    %17 = vector.broadcast %cst_19 : f32 to vector<8x4xf32>
    %18 = arith.maximumf %16, %17 : vector<8x4xf32>
    %cst_20 = arith.constant dense<0.000000e+00> : vector<8x64xf32>
    %19 = tpu.matmul %18, %10, %cst_20 {dimension_numbers = #tpu.dot_dimension_numbers<[1], [0], [0], [1], [0, 0, 1, 1], [], []>} : vector<8x4xf32>, vector<4x64xf32>, vector<8x64xf32> -> vector<8x64xf32>
    %20 = arith.negf %19 : vector<8x64xf32>
    %21 = math.exp %20 : vector<8x64xf32>
    %cst_21 = arith.constant 1.000000e+00 : f32
    %22 = vector.broadcast %cst_21 : f32 to vector<8x64xf32>
    %23 = arith.addf %22, %21 : vector<8x64xf32>
    %24 = arith.divf %22, %23 : vector<8x64xf32>
    %cst_22 = arith.constant dense<0.000000e+00> : vector<8x2048xf32>
    %25 = tpu.matmul %24, %7, %cst_22 {dimension_numbers = #tpu.dot_dimension_numbers<[1], [0], [0], [1], [0, 0, 1, 1], [], []>} : vector<8x64xf32>, vector<64x2048xf32>, vector<8x2048xf32> -> vector<8x2048xf32>
    %cst_23 = arith.constant 0.000000e+00 : f32
    %26 = vector.broadcast %cst_23 : f32 to vector<8x2048xf32>
    %27 = arith.subf %26, %25 : vector<8x2048xf32>
    %28 = arith.maximumf %27, %11 : vector<8x2048xf32>
    %29 = arith.minimumf %25, %28 : vector<8x2048xf32>
    %30 = arith.subf %11, %29 : vector<8x2048xf32>
    %c0_24 = arith.constant 0 : index
    %c0_25 = arith.constant 0 : index
    %31 = vector.load %arg9[%c0_24, %c0_25] : memref<8x2048xf32, #tpu.memory_space<vmem>>, vector<8x2048xf32>
    tpu.vector_store %arg9[%c0_24, %c0_25], %30 {strides = array<i32>} : memref<8x2048xf32, #tpu.memory_space<vmem>>, vector<8x2048xf32>,
    %32 = vector.extract_strided_slice %5 {offsets = [0, 2048], sizes = [8, 2048], strides = [1, 1]} : vector<8x6144xf32> to vector<8x2048xf32>
    %cst_26 = arith.constant dense<0.000000e+00> : vector<8x64xf32>
    %33 = tpu.matmul %32, %6, %cst_26 {dimension_numbers = #tpu.dot_dimension_numbers<[1], [0], [0], [1], [0, 0, 1, 1], [], []>} : vector<8x2048xf32>, vector<2048x64xf32>, vector<8x64xf32> -> vector<8x64xf32>
    %cst_27 = arith.constant dense<0.000000e+00> : vector<8x64xf32>
    %34 = tpu.matmul %8, %33, %cst_27 {dimension_numbers = #tpu.dot_dimension_numbers<[1], [0], [0], [1], [0, 0, 1, 1], [], []>} : vector<8x8xf32>, vector<8x64xf32>, vector<8x64xf32> -> vector<8x64xf32>
    %cst_28 = arith.constant 1.562500e-02 : f32
    %35 = vector.broadcast %cst_28 : f32 to vector<8x64xf32>
    %36 = arith.mulf %34, %35 : vector<8x64xf32>
    %cst_29 = arith.constant dense<0.000000e+00> : vector<8x4xf32>
    %37 = tpu.matmul %36, %9, %cst_29 {dimension_numbers = #tpu.dot_dimension_numbers<[1], [0], [0], [1], [0, 0, 1, 1], [], []>} : vector<8x64xf32>, vector<64x4xf32>, vector<8x4xf32> -> vector<8x4xf32>
    %cst_30 = arith.constant 0.000000e+00 : f32
    %38 = vector.broadcast %cst_30 : f32 to vector<8x4xf32>
    %39 = arith.maximumf %37, %38 : vector<8x4xf32>
    %cst_31 = arith.constant dense<0.000000e+00> : vector<8x64xf32>
    %40 = tpu.matmul %39, %10, %cst_31 {dimension_numbers = #tpu.dot_dimension_numbers<[1], [0], [0], [1], [0, 0, 1, 1], [], []>} : vector<8x4xf32>, vector<4x64xf32>, vector<8x64xf32> -> vector<8x64xf32>
    %41 = arith.negf %40 : vector<8x64xf32>
    %42 = math.exp %41 : vector<8x64xf32>
    %cst_32 = arith.constant 1.000000e+00 : f32
    %43 = vector.broadcast %cst_32 : f32 to vector<8x64xf32>
    %44 = arith.addf %43, %42 : vector<8x64xf32>
    %45 = arith.divf %43, %44 : vector<8x64xf32>
    %cst_33 = arith.constant dense<0.000000e+00> : vector<8x2048xf32>
    %46 = tpu.matmul %45, %7, %cst_33 {dimension_numbers = #tpu.dot_dimension_numbers<[1], [0], [0], [1], [0, 0, 1, 1], [], []>} : vector<8x64xf32>, vector<64x2048xf32>, vector<8x2048xf32> -> vector<8x2048xf32>
    %cst_34 = arith.constant 0.000000e+00 : f32
    %47 = vector.broadcast %cst_34 : f32 to vector<8x2048xf32>
    %48 = arith.subf %47, %46 : vector<8x2048xf32>
    %49 = arith.maximumf %48, %32 : vector<8x2048xf32>
    %50 = arith.minimumf %46, %49 : vector<8x2048xf32>
    %51 = arith.subf %32, %50 : vector<8x2048xf32>
    %c0_35 = arith.constant 0 : index
    %c0_36 = arith.constant 0 : index
    %52 = vector.load %arg10[%c0_35, %c0_36] : memref<8x2048xf32, #tpu.memory_space<vmem>>, vector<8x2048xf32>
    tpu.vector_store %arg10[%c0_35, %c0_36], %51 {strides = array<i32>} : memref<8x2048xf32, #tpu.memory_space<vmem>>, vector<8x2048xf32>,
    %53 = vector.extract_strided_slice %5 {offsets = [0, 4096], sizes = [8, 2048], strides = [1, 1]} : vector<8x6144xf32> to vector<8x2048xf32>
    %cst_37 = arith.constant dense<0.000000e+00> : vector<8x64xf32>
    %54 = tpu.matmul %53, %6, %cst_37 {dimension_numbers = #tpu.dot_dimension_numbers<[1], [0], [0], [1], [0, 0, 1, 1], [], []>} : vector<8x2048xf32>, vector<2048x64xf32>, vector<8x64xf32> -> vector<8x64xf32>
    %cst_38 = arith.constant dense<0.000000e+00> : vector<8x64xf32>
    %55 = tpu.matmul %8, %54, %cst_38 {dimension_numbers = #tpu.dot_dimension_numbers<[1], [0], [0], [1], [0, 0, 1, 1], [], []>} : vector<8x8xf32>, vector<8x64xf32>, vector<8x64xf32> -> vector<8x64xf32>
    %cst_39 = arith.constant 1.562500e-02 : f32
    %56 = vector.broadcast %cst_39 : f32 to vector<8x64xf32>
    %57 = arith.mulf %55, %56 : vector<8x64xf32>
    %cst_40 = arith.constant dense<0.000000e+00> : vector<8x4xf32>
    %58 = tpu.matmul %57, %9, %cst_40 {dimension_numbers = #tpu.dot_dimension_numbers<[1], [0], [0], [1], [0, 0, 1, 1], [], []>} : vector<8x64xf32>, vector<64x4xf32>, vector<8x4xf32> -> vector<8x4xf32>
    %cst_41 = arith.constant 0.000000e+00 : f32
    %59 = vector.broadcast %cst_41 : f32 to vector<8x4xf32>
    %60 = arith.maximumf %58, %59 : vector<8x4xf32>
    %cst_42 = arith.constant dense<0.000000e+00> : vector<8x64xf32>
    %61 = tpu.matmul %60, %10, %cst_42 {dimension_numbers = #tpu.dot_dimension_numbers<[1], [0], [0], [1], [0, 0, 1, 1], [], []>} : vector<8x4xf32>, vector<4x64xf32>, vector<8x64xf32> -> vector<8x64xf32>
    %62 = arith.negf %61 : vector<8x64xf32>
    %63 = math.exp %62 : vector<8x64xf32>
    %cst_43 = arith.constant 1.000000e+00 : f32
    %64 = vector.broadcast %cst_43 : f32 to vector<8x64xf32>
    %65 = arith.addf %64, %63 : vector<8x64xf32>
    %66 = arith.divf %64, %65 : vector<8x64xf32>
    %cst_44 = arith.constant dense<0.000000e+00> : vector<8x2048xf32>
    %67 = tpu.matmul %66, %7, %cst_44 {dimension_numbers = #tpu.dot_dimension_numbers<[1], [0], [0], [1], [0, 0, 1, 1], [], []>} : vector<8x64xf32>, vector<64x2048xf32>, vector<8x2048xf32> -> vector<8x2048xf32>
    %cst_45 = arith.constant 0.000000e+00 : f32
    %68 = vector.broadcast %cst_45 : f32 to vector<8x2048xf32>
    %69 = arith.subf %68, %67 : vector<8x2048xf32>
    %70 = arith.maximumf %69, %53 : vector<8x2048xf32>
    %71 = arith.minimumf %67, %70 : vector<8x2048xf32>
    %72 = arith.subf %53, %71 : vector<8x2048xf32>
    %c0_46 = arith.constant 0 : index
    %c0_47 = arith.constant 0 : index
    %73 = vector.load %arg11[%c0_46, %c0_47] : memref<8x2048xf32, #tpu.memory_space<vmem>>, vector<8x2048xf32>
    tpu.vector_store %arg11[%c0_46, %c0_47], %72 {strides = array<i32>} : memref<8x2048xf32, #tpu.memory_space<vmem>>, vector<8x2048xf32>,
    return
  }
  func.func @transform_0(%arg0: i32) -> (i32, i32) {
    %c0_i32 = arith.constant 0 : i32
    %c0_i32_0 = arith.constant 0 : i32
    return %arg0, %c0_i32 : i32, i32
  }
  func.func @transform_1(%arg0: i32) -> (i32, i32) {
    %c0_i32 = arith.constant 0 : i32
    %c0_i32_0 = arith.constant 0 : i32
    %c0_i32_1 = arith.constant 0 : i32
    return %c0_i32, %c0_i32_0 : i32, i32
  }
  func.func @transform_2(%arg0: i32) -> (i32, i32) {
    %c0_i32 = arith.constant 0 : i32
    %c0_i32_0 = arith.constant 0 : i32
    %c0_i32_1 = arith.constant 0 : i32
    return %c0_i32, %c0_i32_0 : i32, i32
  }
  func.func @transform_3(%arg0: i32) -> (i32, i32) {
    %c0_i32 = arith.constant 0 : i32
    %c0_i32_0 = arith.constant 0 : i32
    %c0_i32_1 = arith.constant 0 : i32
    return %c0_i32, %c0_i32_0 : i32, i32
  }
  func.func @transform_4(%arg0: i32) -> (i32, i32) {
    %c0_i32 = arith.constant 0 : i32
    %c0_i32_0 = arith.constant 0 : i32
    %c0_i32_1 = arith.constant 0 : i32
    return %c0_i32, %c0_i32_0 : i32, i32
  }
  func.func @transform_5(%arg0: i32) -> (i32, i32) {
    %c0_i32 = arith.constant 0 : i32
    %c0_i32_0 = arith.constant 0 : i32
    %c0_i32_1 = arith.constant 0 : i32
    return %c0_i32, %c0_i32_0 : i32, i32
  }
  func.func @transform_6(%arg0: i32) -> (i32, i32) {
    %c0_i32 = arith.constant 0 : i32
    %c0_i32_0 = arith.constant 0 : i32
    %c0_i32_1 = arith.constant 0 : i32
    return %c0_i32, %c0_i32_0 : i32, i32
  }
  func.func @transform_7(%arg0: i32) -> (i32, i32) {
    %c0_i32 = arith.constant 0 : i32
    %c0_i32_0 = arith.constant 0 : i32
    %c0_i32_1 = arith.constant 0 : i32
    return %c0_i32, %c0_i32_0 : i32, i32
  }
  func.func @transform_8(%arg0: i32) -> (i32, i32) {
    %c0_i32 = arith.constant 0 : i32
    %c0_i32_0 = arith.constant 0 : i32
    return %arg0, %c0_i32 : i32, i32
  }
  func.func @transform_9(%arg0: i32) -> (i32, i32) {
    %c0_i32 = arith.constant 0 : i32
    %c0_i32_0 = arith.constant 0 : i32
    return %arg0, %c0_i32 : i32, i32
  }
  func.func @transform_10(%arg0: i32) -> (i32, i32) {
    %c0_i32 = arith.constant 0 : i32
    %c0_i32_0 = arith.constant 0 : i32
    return %arg0, %c0_i32 : i32, i32
  }
}

</mosaic_0001>

<bundles_post_ra>
// kernel: mr_cnn_forward.1
= control target key start
LH: loop header
LB: loop body
LE: loop exit
PB: predicated region body
PF: predicated region fallthrough
CT: control target
= control target key end

     0   :  { %v10894_v3 = vmov 0   ;;  %vm10896_vm0 = vmmov 0   ;;  %vm4528_vm1 = vcmask 64512   ;;  %vm4603_vm2 = vcmask 523264   ;;  %s15138_s1 = inlined_call_operand.vmem [shape: bf16[128,6144], index: 1, kind: input, shape index: {}]   ;;  %s15139_s0 = inlined_call_operand.vmem [shape: bf16[8,128], index: 0, kind: input, shape index: {}]   ;;  %s15140_s5 = inlined_call_operand.vmem [shape: f32[2048,64], index: 5, kind: input, shape index: {}]   ;;  %s15141_s2 = inlined_call_operand.vmem [shape: f32[1,6144], index: 2, kind: input, shape index: {}]   ;;  %s15142_s3 = inlined_call_operand.vmem [shape: f32[64,4], index: 3, kind: input, shape index: {}]   ;;  %s15143_s7 = inlined_call_operand.vmem [shape: f32[8,8], index: 7, kind: input, shape index: {}]   ;;  %s15144_s4 = inlined_call_operand.vmem [shape: f32[4,64], index: 4, kind: input, shape index: {}]   ;;  %s15145_s6 = inlined_call_operand.vmem [shape: f32[64,2048], index: 6, kind: input, shape index: {}]   ;;  %s15146_s8 = inlined_call_operand.vmem [shape: f32[8,2048], index: 8, kind: output, shape index: {0}]   ;;  %s15147_s9 = inlined_call_operand.vmem [shape: f32[8,2048], index: 9, kind: output, shape index: {1}]   ;;  %s15148_s10 = inlined_call_operand.vmem [shape: f32[8,2048], index: 10, kind: output, shape index: {2}]  }
   0x1   :  { %v34_v0 = vld [vmem:[%s15138_s1] sm:$0xff]  ;;  %v35_v2 = vld [vmem:[%s15138_s1 + $0x8] sm:$0xff]  ;;  %2622 = vmatprep.mubr.bf16.mxu0 %v10894_v3  ;;  %2663 = vmatprep.mubr.bf16.mxu1 %v10894_v3  ;;  %v36_v63 = vld [vmem:[%s15138_s1 + $0x10] sm:$0xff]  ;;  %vm4682_vm3 = vcmask 1043456   ;;  %vm4678_vm4 = vcmask 31744  }
   0x2   :  { %v58_v1 = vld [vmem:[%s15138_s1 + $0xc0] sm:$0xff]  ;;  %v59_v5 = vld [vmem:[%s15138_s1 + $0xc8] sm:$0xff] }
   0x3   :  { %v8296_v4 = vcombine.high %v34_v0, %v58_v1  ;;  %v8295_v6 = vcombine.low %v34_v0, %v58_v1  ;;  %v82_v7 = vld [vmem:[%s15138_s1 + $0x180] sm:$0xff]  ;;  %v8298_v9 = vcombine.high %v35_v2, %v59_v5  ;;  %v8297_v10 = vcombine.low %v35_v2, %v59_v5  ;;  %v83_v12 = vld [vmem:[%s15138_s1 + $0x188] sm:$0xff]  ;;  %v60_v0 = vld [vmem:[%s15138_s1 + $0xd0] sm:$0xff] }
   0x4   :  { %v106_v8 = vld [vmem:[%s15138_s1 + $0x240] sm:$0xff]  ;;  %v107_v13 = vld [vmem:[%s15138_s1 + $0x248] sm:$0xff]  ;;  %v37_v1 = vld [vmem:[%s15138_s1 + $0x18] sm:$0xff] }
   0x5   :  { %v8344_v11 = vcombine.high %v82_v7, %v106_v8  ;;  %v130_v14 = vld [vmem:[%s15138_s1 + $0x300] sm:$0xff]  ;;  %2590 = vmatprep.subr.bf16.mxu0 %v8296_v4  ;;  %v8346_v15 = vcombine.high %v83_v12, %v107_v13  ;;  %v131_v17 = vld [vmem:[%s15138_s1 + $0x308] sm:$0xff]  ;;  %2631 = vmatprep.subr.bf16.mxu1 %v8298_v9  ;;  %v8343_v19 = vcombine.low %v82_v7, %v106_v8  ;;  %v61_v2 = vld [vmem:[%s15138_s1 + $0xd8] sm:$0xff] }
   0x6   :  { %v154_v16 = vld [vmem:[%s15138_s1 + $0x3c0] sm:$0xff]  ;;  %v155_v18 = vld [vmem:[%s15138_s1 + $0x3c8] sm:$0xff]  ;;  %2591 = vmatpush1.bf16.msra.mxu0 %v8295_v6  ;;  %2632 = vmatpush1.bf16.msra.mxu1 %v8297_v10  ;;  %v8345_v20 = vcombine.low %v83_v12, %v107_v13  ;;  %v8300_v6 = vcombine.high %v36_v63, %v60_v0  ;;  %v8302_v7 = vcombine.high %v37_v1, %v61_v2  ;;  %v84_v8 = vld [vmem:[%s15138_s1 + $0x190] sm:$0xff] }
   0x7   :  { %2592 = vmatprep.subr.bf16.mxu0 %v8344_v11  ;;  %v8392_v21 = vcombine.high %v130_v14, %v154_v16  ;;  %2633 = vmatprep.subr.bf16.mxu1 %v8346_v15  ;;  %v8394_v22 = vcombine.high %v131_v17, %v155_v18  ;;  %v178_v23 = vld [vmem:[%s15138_s1 + $0x480] sm:$0xff]  ;;  %v179_v25 = vld [vmem:[%s15138_s1 + $0x488] sm:$0xff]  ;;  %v8391_v27 = vcombine.low %v130_v14, %v154_v16  ;;  %v108_v9 = vld [vmem:[%s15138_s1 + $0x250] sm:$0xff] }
   0x8   :  { %v202_v24 = vld [vmem:[%s15138_s1 + $0x540] sm:$0xff]  ;;  %v203_v26 = vld [vmem:[%s15138_s1 + $0x548] sm:$0xff]  ;;  %v8393_v28 = vcombine.low %v131_v17, %v155_v18  ;;  %v85_v10 = vld [vmem:[%s15138_s1 + $0x198] sm:$0xff]  ;;  %v8299_v13 = vcombine.low %v36_v63, %v60_v0  ;;  %v8301_v14 = vcombine.low %v37_v1, %v61_v2  ;;  %v8348_v15 = vcombine.high %v84_v8, %v108_v9 }
   0x9   :  { %v8440_v29 = vcombine.high %v178_v23, %v202_v24  ;;  %v8442_v30 = vcombine.high %v179_v25, %v203_v26  ;;  %v226_v31 = vld [vmem:[%s15138_s1 + $0x600] sm:$0xff]  ;;  %v227_v33 = vld [vmem:[%s15138_s1 + $0x608] sm:$0xff]  ;;  %v8439_v35 = vcombine.low %v178_v23, %v202_v24  ;;  %v8441_v36 = vcombine.low %v179_v25, %v203_v26  ;;  %v109_v11 = vld [vmem:[%s15138_s1 + $0x258] sm:$0xff] }
   0xa   :  { %2593 = vmatpush1.bf16.msra.mxu0 %v8343_v19  ;;  %2634 = vmatpush1.bf16.msra.mxu1 %v8345_v20  ;;  %v250_v32 = vld [vmem:[%s15138_s1 + $0x6c0] sm:$0xff]  ;;  %v251_v34 = vld [vmem:[%s15138_s1 + $0x6c8] sm:$0xff]  ;;  %v8350_v16 = vcombine.high %v85_v10, %v109_v11  ;;  %v132_v17 = vld [vmem:[%s15138_s1 + $0x310] sm:$0xff] }
   0xb   :  { %2594 = vmatprep.subr.bf16.mxu0 %v8392_v21  ;;  %2635 = vmatprep.subr.bf16.mxu1 %v8394_v22  ;;  %v8488_v37 = vcombine.high %v226_v31, %v250_v32  ;;  %v8490_v38 = vcombine.high %v227_v33, %v251_v34  ;;  %v274_v39 = vld [vmem:[%s15138_s1 + $0x780] sm:$0xff]  ;;  %v275_v41 = vld [vmem:[%s15138_s1 + $0x788] sm:$0xff]  ;;  %v8487_v43 = vcombine.low %v226_v31, %v250_v32  ;;  %v156_v18 = vld [vmem:[%s15138_s1 + $0x3d0] sm:$0xff] }
   0xc   :  { %v298_v40 = vld [vmem:[%s15138_s1 + $0x840] sm:$0xff]  ;;  %v299_v42 = vld [vmem:[%s15138_s1 + $0x848] sm:$0xff]  ;;  %v8489_v44 = vcombine.low %v227_v33, %v251_v34  ;;  %v133_v19 = vld [vmem:[%s15138_s1 + $0x318] sm:$0xff]  ;;  %v8347_v21 = vcombine.low %v84_v8, %v108_v9  ;;  %v8349_v22 = vcombine.low %v85_v10, %v109_v11  ;;  %v8396_v23 = vcombine.high %v132_v17, %v156_v18 }
   0xd   :  { %v8536_v45 = vcombine.high %v274_v39, %v298_v40  ;;  %v8538_v46 = vcombine.high %v275_v41, %v299_v42  ;;  %v322_v47 = vld [vmem:[%s15138_s1 + $0x900] sm:$0xff]  ;;  %v323_v49 = vld [vmem:[%s15138_s1 + $0x908] sm:$0xff]  ;;  %v8535_v51 = vcombine.low %v274_v39, %v298_v40  ;;  %v8537_v52 = vcombine.low %v275_v41, %v299_v42  ;;  %v157_v20 = vld [vmem:[%s15138_s1 + $0x3d8] sm:$0xff] }
   0xe   :  { %2595 = vmatpush1.bf16.msra.mxu0 %v8391_v27  ;;  %2636 = vmatpush1.bf16.msra.mxu1 %v8393_v28  ;;  %v346_v48 = vld [vmem:[%s15138_s1 + $0x9c0] sm:$0xff]  ;;  %v347_v50 = vld [vmem:[%s15138_s1 + $0x9c8] sm:$0xff]  ;;  %v8398_v24 = vcombine.high %v133_v19, %v157_v20  ;;  %v180_v25 = vld [vmem:[%s15138_s1 + $0x490] sm:$0xff] }
   0xf   :  { %2596 = vmatprep.subr.bf16.mxu0 %v8440_v29  ;;  %2637 = vmatprep.subr.bf16.mxu1 %v8442_v30  ;;  %v8584_v53 = vcombine.high %v322_v47, %v346_v48  ;;  %v8586_v54 = vcombine.high %v323_v49, %v347_v50  ;;  %v370_v55 = vld [vmem:[%s15138_s1 + $0xa80] sm:$0xff]  ;;  %v371_v57 = vld [vmem:[%s15138_s1 + $0xa88] sm:$0xff]  ;;  %v8583_v59 = vcombine.low %v322_v47, %v346_v48  ;;  %v204_v26 = vld [vmem:[%s15138_s1 + $0x550] sm:$0xff] }
  0x10   :  { %v394_v56 = vld [vmem:[%s15138_s1 + $0xb40] sm:$0xff]  ;;  %v395_v58 = vld [vmem:[%s15138_s1 + $0xb48] sm:$0xff]  ;;  %v8585_v60 = vcombine.low %v323_v49, %v347_v50  ;;  %v181_v27 = vld [vmem:[%s15138_s1 + $0x498] sm:$0xff]  ;;  %v8395_v29 = vcombine.low %v132_v17, %v156_v18  ;;  %v8397_v30 = vcombine.low %v133_v19, %v157_v20  ;;  %v8444_v31 = vcombine.high %v180_v25, %v204_v26 }
  0x11   :  { %v8632_v61 = vcombine.high %v370_v55, %v394_v56  ;;  %v8634_v62 = vcombine.high %v371_v57, %v395_v58  ;;  %v8631_v4 = vcombine.low %v370_v55, %v394_v56  ;;  %v8633_v5 = vcombine.low %v371_v57, %v395_v58  ;;  %v11078_v12 = vld [vmem:[%s15139_s0] sm:$0xf]  ;;  %v205_v28 = vld [vmem:[%s15138_s1 + $0x558] sm:$0xff]  ;;  %v228_v33 = vld [vmem:[%s15138_s1 + $0x610] sm:$0xff] }
  0x12   :  { %2597 = vmatpush1.bf16.msra.mxu0 %v8439_v35  ;;  %2638 = vmatpush1.bf16.msra.mxu1 %v8441_v36  ;;  %v8446_v32 = vcombine.high %v181_v27, %v205_v28  ;;  %v252_v34 = vld [vmem:[%s15138_s1 + $0x6d0] sm:$0xff]  ;;  %v229_v35 = vld [vmem:[%s15138_s1 + $0x618] sm:$0xff]  ;;  %v38_v1 = vld [vmem:[%s15138_s1 + $0x20] sm:$0xff] }
  0x13   :  { %2598 = vmatprep.subr.bf16.mxu0 %v8488_v37  ;;  %2639 = vmatprep.subr.bf16.mxu1 %v8490_v38  ;;  %v253_v36 = vld [vmem:[%s15138_s1 + $0x6d8] sm:$0xff]  ;;  %v8443_v37 = vcombine.low %v180_v25, %v204_v26  ;;  %v8445_v38 = vcombine.low %v181_v27, %v205_v28  ;;  %v8492_v39 = vcombine.high %v228_v33, %v252_v34  ;;  %v276_v41 = vld [vmem:[%s15138_s1 + $0x790] sm:$0xff]  ;;  %v62_v2 = vld [vmem:[%s15138_s1 + $0xe0] sm:$0xff] }
  0x14   :  { %v8494_v40 = vcombine.high %v229_v35, %v253_v36  ;;  %v300_v42 = vld [vmem:[%s15138_s1 + $0x850] sm:$0xff]  ;;  %v8304_v8 = vcombine.high %v38_v1, %v62_v2  ;;  %v86_v10 = vld [vmem:[%s15138_s1 + $0x1a0] sm:$0xff] }
  0x15   :  { %v8540_v47 = vcombine.high %v276_v41, %v300_v42  ;;  %v324_v49 = vld [vmem:[%s15138_s1 + $0x910] sm:$0xff]  ;;  %v110_v11 = vld [vmem:[%s15138_s1 + $0x260] sm:$0xff] }
  0x16   :  { %2599 = vmatpush1.bf16.msra.mxu0 %v8487_v43  ;;  %2640 = vmatpush1.bf16.msra.mxu1 %v8489_v44  ;;  %v277_v43 = vld [vmem:[%s15138_s1 + $0x798] sm:$0xff]  ;;  %v348_v50 = vld [vmem:[%s15138_s1 + $0x9d0] sm:$0xff]  ;;  %v8352_v17 = vcombine.high %v86_v10, %v110_v11  ;;  %v134_v19 = vld [vmem:[%s15138_s1 + $0x320] sm:$0xff] }
  0x17   :  { %2600 = vmatprep.subr.bf16.mxu0 %v8536_v45  ;;  %2641 = vmatprep.subr.bf16.mxu1 %v8538_v46  ;;  %v301_v44 = vld [vmem:[%s15138_s1 + $0x858] sm:$0xff]  ;;  %v8491_v45 = vcombine.low %v228_v33, %v252_v34  ;;  %v8493_v46 = vcombine.low %v229_v35, %v253_v36  ;;  %v8588_v55 = vcombine.high %v324_v49, %v348_v50  ;;  %v372_v57 = vld [vmem:[%s15138_s1 + $0xa90] sm:$0xff]  ;;  %v158_v20 = vld [vmem:[%s15138_s1 + $0x3e0] sm:$0xff] }
  0x18   :  { %v8542_v48 = vcombine.high %v277_v43, %v301_v44  ;;  %v396_v58 = vld [vmem:[%s15138_s1 + $0xb50] sm:$0xff]  ;;  %v8400_v25 = vcombine.high %v134_v19, %v158_v20  ;;  %v182_v27 = vld [vmem:[%s15138_s1 + $0x4a0] sm:$0xff] }
  0x19   :  { %v8636_v63 = vcombine.high %v372_v57, %v396_v58  ;;  %v206_v28 = vld [vmem:[%s15138_s1 + $0x560] sm:$0xff] }
  0x1a   :  { %2601 = vmatpush1.bf16.msra.mxu0 %v8535_v51  ;;  %2642 = vmatpush1.bf16.msra.mxu1 %v8537_v52  ;;  %v325_v51 = vld [vmem:[%s15138_s1 + $0x918] sm:$0xff]  ;;  %v8448_v33 = vcombine.high %v182_v27, %v206_v28  ;;  %v230_v35 = vld [vmem:[%s15138_s1 + $0x620] sm:$0xff] }
  0x1b   :  { %2602 = vmatprep.subr.bf16.mxu0 %v8584_v53  ;;  %2643 = vmatprep.subr.bf16.mxu1 %v8586_v54  ;;  %v349_v52 = vld [vmem:[%s15138_s1 + $0x9d8] sm:$0xff]  ;;  %v8539_v53 = vcombine.low %v276_v41, %v300_v42  ;;  %v8541_v54 = vcombine.low %v277_v43, %v301_v44  ;;  %v254_v36 = vld [vmem:[%s15138_s1 + $0x6e0] sm:$0xff] }
  0x1c   :  { %v8590_v56 = vcombine.high %v325_v51, %v349_v52  ;;  %v8496_v41 = vcombine.high %v230_v35, %v254_v36  ;;  %v278_v43 = vld [vmem:[%s15138_s1 + $0x7a0] sm:$0xff] }
  0x1d   :  { %v302_v44 = vld [vmem:[%s15138_s1 + $0x860] sm:$0xff] }
  0x1e   :  { %2603 = vmatpush1.bf16.msra.mxu0 %v8583_v59  ;;  %2644 = vmatpush1.bf16.msra.mxu1 %v8585_v60  ;;  %v373_v59 = vld [vmem:[%s15138_s1 + $0xa98] sm:$0xff] }
  0x1f   :  { %2604 = vmatprep.subr.bf16.mxu0 %v8632_v61  ;;  %2645 = vmatprep.subr.bf16.mxu1 %v8634_v62  ;;  %v397_v60 = vld [vmem:[%s15138_s1 + $0xb58] sm:$0xff]  ;;  %v8587_v61 = vcombine.low %v324_v49, %v348_v50  ;;  %v8589_v62 = vcombine.low %v325_v51, %v349_v52  ;;  %v8544_v49 = vcombine.high %v278_v43, %v302_v44  ;;  %v326_v51 = vld [vmem:[%s15138_s1 + $0x920] sm:$0xff] }
  0x20   :  { %v8638_v0 = vcombine.high %v373_v59, %v397_v60  ;;  %v350_v52 = vld [vmem:[%s15138_s1 + $0x9e0] sm:$0xff] }
  0x22   :  { %2605 = vmatpush1.bf16.msra.mxu0 %v8631_v4  ;;  %2646 = vmatpush1.bf16.msra.mxu1 %v8633_v5  ;;  %v39_v4 = vld [vmem:[%s15138_s1 + $0x28] sm:$0xff] }
  0x23   :  { %2672 = vmatprep.subr.bf16.mxu0 %v8300_v6  ;;  %2713 = vmatprep.subr.bf16.mxu1 %v8302_v7  ;;  %v63_v5 = vld [vmem:[%s15138_s1 + $0xe8] sm:$0xff]  ;;  %v8635_v6 = vcombine.low %v372_v57, %v396_v58  ;;  %v8637_v7 = vcombine.low %v373_v59, %v397_v60  ;;  %v8592_v57 = vcombine.high %v326_v51, %v350_v52  ;;  %v374_v59 = vld [vmem:[%s15138_s1 + $0xaa0] sm:$0xff] }
  0x24   :  { %v8306_v9 = vcombine.high %v39_v4, %v63_v5  ;;  %v398_v60 = vld [vmem:[%s15138_s1 + $0xb60] sm:$0xff] }
  0x25   :  { %2623 = vmatmul.mubr.bf16.vlgmr.msra.gmra.mrb[0].mxu0 %v11078_v12  ;;  %2664 = vmatmul.mubr.bf16.vlgmr.msra.gmra.mrb[0].mxu1 %v11078_v12 }
  0x26   :  { %2673 = vmatpush1.bf16.msra.mxu0 %v8299_v13  ;;  %2714 = vmatpush1.bf16.msra.mxu1 %v8301_v14  ;;  %v87_v13 = vld [vmem:[%s15138_s1 + $0x1a8] sm:$0xff] }
  0x27   :  { %2674 = vmatprep.subr.bf16.mxu0 %v8348_v15  ;;  %2715 = vmatprep.subr.bf16.mxu1 %v8350_v16  ;;  %v111_v14 = vld [vmem:[%s15138_s1 + $0x268] sm:$0xff]  ;;  %v8303_v15 = vcombine.low %v38_v1, %v62_v2  ;;  %v8305_v16 = vcombine.low %v39_v4, %v63_v5  ;;  %v8640_v1 = vcombine.high %v374_v59, %v398_v60  ;;  %v40_v4 = vld [vmem:[%s15138_s1 + $0x30] sm:$0xff] }
  0x28   :  { %2704 = vmatprep.mubr.bf16.mxu0 %v10894_v3  ;;  %2745 = vmatprep.mubr.bf16.mxu1 %v10894_v3  ;;  %v8354_v18 = vcombine.high %v87_v13, %v111_v14  ;;  %v64_v5 = vld [vmem:[%s15138_s1 + $0xf0] sm:$0xff] }
  0x2a   :  { %2675 = vmatpush1.bf16.msra.mxu0 %v8347_v21  ;;  %2716 = vmatpush1.bf16.msra.mxu1 %v8349_v22  ;;  %v135_v21 = vld [vmem:[%s15138_s1 + $0x328] sm:$0xff] }
  0x2b   :  { %2676 = vmatprep.subr.bf16.mxu0 %v8396_v23  ;;  %2717 = vmatprep.subr.bf16.mxu1 %v8398_v24  ;;  %v159_v22 = vld [vmem:[%s15138_s1 + $0x3e8] sm:$0xff]  ;;  %v8351_v23 = vcombine.low %v86_v10, %v110_v11  ;;  %v8353_v24 = vcombine.low %v87_v13, %v111_v14  ;;  %v8308_v10 = vcombine.high %v40_v4, %v64_v5  ;;  %v88_v13 = vld [vmem:[%s15138_s1 + $0x1b0] sm:$0xff] }
  0x2c   :  { %v8402_v26 = vcombine.high %v135_v21, %v159_v22  ;;  %v112_v14 = vld [vmem:[%s15138_s1 + $0x270] sm:$0xff] }
  0x2e   :  { %2677 = vmatpush1.bf16.msra.mxu0 %v8395_v29  ;;  %2718 = vmatpush1.bf16.msra.mxu1 %v8397_v30  ;;  %v183_v29 = vld [vmem:[%s15138_s1 + $0x4a8] sm:$0xff] }
  0x2f   :  { %2678 = vmatprep.subr.bf16.mxu0 %v8444_v31  ;;  %2719 = vmatprep.subr.bf16.mxu1 %v8446_v32  ;;  %v207_v30 = vld [vmem:[%s15138_s1 + $0x568] sm:$0xff]  ;;  %v8399_v31 = vcombine.low %v134_v19, %v158_v20  ;;  %v8401_v32 = vcombine.low %v135_v21, %v159_v22  ;;  %v8356_v19 = vcombine.high %v88_v13, %v112_v14  ;;  %v136_v21 = vld [vmem:[%s15138_s1 + $0x330] sm:$0xff] }
  0x30   :  { %v8450_v34 = vcombine.high %v183_v29, %v207_v30  ;;  %v160_v22 = vld [vmem:[%s15138_s1 + $0x3f0] sm:$0xff] }
  0x32   :  { %2679 = vmatpush1.bf16.msra.mxu0 %v8443_v37  ;;  %2720 = vmatpush1.bf16.msra.mxu1 %v8445_v38  ;;  %v231_v37 = vld [vmem:[%s15138_s1 + $0x628] sm:$0xff] }
  0x33   :  { %2680 = vmatprep.subr.bf16.mxu0 %v8492_v39  ;;  %2721 = vmatprep.subr.bf16.mxu1 %v8494_v40  ;;  %v255_v38 = vld [vmem:[%s15138_s1 + $0x6e8] sm:$0xff]  ;;  %v8447_v39 = vcombine.low %v182_v27, %v206_v28  ;;  %v8449_v40 = vcombine.low %v183_v29, %v207_v30  ;;  %v8404_v27 = vcombine.high %v136_v21, %v160_v22  ;;  %v184_v29 = vld [vmem:[%s15138_s1 + $0x4b0] sm:$0xff] }
  0x34   :  { %v8498_v42 = vcombine.high %v231_v37, %v255_v38  ;;  %v208_v30 = vld [vmem:[%s15138_s1 + $0x570] sm:$0xff] }
  0x36   :  { %2681 = vmatpush1.bf16.msra.mxu0 %v8491_v45  ;;  %2722 = vmatpush1.bf16.msra.mxu1 %v8493_v46  ;;  %v279_v45 = vld [vmem:[%s15138_s1 + $0x7a8] sm:$0xff] }
  0x37   :  { %2682 = vmatprep.subr.bf16.mxu0 %v8540_v47  ;;  %2723 = vmatprep.subr.bf16.mxu1 %v8542_v48  ;;  %v303_v46 = vld [vmem:[%s15138_s1 + $0x868] sm:$0xff]  ;;  %v8495_v47 = vcombine.low %v230_v35, %v254_v36  ;;  %v8497_v48 = vcombine.low %v231_v37, %v255_v38  ;;  %v8452_v35 = vcombine.high %v184_v29, %v208_v30  ;;  %v232_v37 = vld [vmem:[%s15138_s1 + $0x630] sm:$0xff] }
  0x38   :  { %v8546_v50 = vcombine.high %v279_v45, %v303_v46  ;;  %v256_v38 = vld [vmem:[%s15138_s1 + $0x6f0] sm:$0xff] }
  0x3a   :  { %2683 = vmatpush1.bf16.msra.mxu0 %v8539_v53  ;;  %2724 = vmatpush1.bf16.msra.mxu1 %v8541_v54  ;;  %v327_v53 = vld [vmem:[%s15138_s1 + $0x928] sm:$0xff] }
  0x3b   :  { %2684 = vmatprep.subr.bf16.mxu0 %v8588_v55  ;;  %2725 = vmatprep.subr.bf16.mxu1 %v8590_v56  ;;  %v351_v54 = vld [vmem:[%s15138_s1 + $0x9e8] sm:$0xff]  ;;  %v8543_v55 = vcombine.low %v278_v43, %v302_v44  ;;  %v8545_v56 = vcombine.low %v279_v45, %v303_v46  ;;  %v8500_v43 = vcombine.high %v232_v37, %v256_v38  ;;  %v280_v45 = vld [vmem:[%s15138_s1 + $0x7b0] sm:$0xff] }
  0x3c   :  { %v8594_v58 = vcombine.high %v327_v53, %v351_v54  ;;  %v304_v46 = vld [vmem:[%s15138_s1 + $0x870] sm:$0xff] }
  0x3e   :  { %2685 = vmatpush1.bf16.msra.mxu0 %v8587_v61  ;;  %2726 = vmatpush1.bf16.msra.mxu1 %v8589_v62  ;;  %v375_v61 = vld [vmem:[%s15138_s1 + $0xaa8] sm:$0xff] }
  0x3f   :  { %2686 = vmatprep.subr.bf16.mxu0 %v8636_v63  ;;  %2727 = vmatprep.subr.bf16.mxu1 %v8638_v0  ;;  %v399_v62 = vld [vmem:[%s15138_s1 + $0xb68] sm:$0xff]  ;;  %v8591_v63 = vcombine.low %v326_v51, %v350_v52  ;;  %v8593_v0 = vcombine.low %v327_v53, %v351_v54  ;;  %v8548_v51 = vcombine.high %v280_v45, %v304_v46  ;;  %v328_v53 = vld [vmem:[%s15138_s1 + $0x930] sm:$0xff] }
  0x40   :  { %v8642_v2 = vcombine.high %v375_v61, %v399_v62  ;;  %v352_v54 = vld [vmem:[%s15138_s1 + $0x9f0] sm:$0xff] }
  0x42   :  { %2687 = vmatpush1.bf16.msra.mxu0 %v8635_v6  ;;  %2728 = vmatpush1.bf16.msra.mxu1 %v8637_v7  ;;  %v41_v6 = vld [vmem:[%s15138_s1 + $0x38] sm:$0xff] }
  0x43   :  { %2754 = vmatprep.subr.bf16.mxu0 %v8304_v8  ;;  %2795 = vmatprep.subr.bf16.mxu1 %v8306_v9  ;;  %v65_v7 = vld [vmem:[%s15138_s1 + $0xf8] sm:$0xff]  ;;  %v8639_v8 = vcombine.low %v374_v59, %v398_v60  ;;  %v8641_v9 = vcombine.low %v375_v61, %v399_v62  ;;  %v8596_v59 = vcombine.high %v328_v53, %v352_v54  ;;  %v376_v61 = vld [vmem:[%s15138_s1 + $0xab0] sm:$0xff] }
  0x44   :  { %v8310_v11 = vcombine.high %v41_v6, %v65_v7  ;;  %v400_v62 = vld [vmem:[%s15138_s1 + $0xb70] sm:$0xff] }
  0x45   :  { %2705 = vmatmul.mubr.bf16.vlgmr.msra.gmra.mrb[4].mxu0 %v11078_v12  ;;  %2746 = vmatmul.mubr.bf16.vlgmr.msra.gmra.mrb[4].mxu1 %v11078_v12 }
  0x46   :  { %2755 = vmatpush1.bf16.msra.mxu0 %v8303_v15  ;;  %2796 = vmatpush1.bf16.msra.mxu1 %v8305_v16  ;;  %v89_v15 = vld [vmem:[%s15138_s1 + $0x1b8] sm:$0xff] }
  0x47   :  { %2756 = vmatprep.subr.bf16.mxu0 %v8352_v17  ;;  %2797 = vmatprep.subr.bf16.mxu1 %v8354_v18  ;;  %v113_v16 = vld [vmem:[%s15138_s1 + $0x278] sm:$0xff]  ;;  %v8307_v17 = vcombine.low %v40_v4, %v64_v5  ;;  %v8309_v18 = vcombine.low %v41_v6, %v65_v7  ;;  %v8644_v4 = vcombine.high %v376_v61, %v400_v62  ;;  %v42_v6 = vld [vmem:[%s15138_s1 + $0x40] sm:$0xff] }
  0x48   :  { %2786 = vmatprep.mubr.bf16.mxu0 %v10894_v3  ;;  %2827 = vmatprep.mubr.bf16.mxu1 %v10894_v3  ;;  %v8358_v20 = vcombine.high %v89_v15, %v113_v16  ;;  %v66_v7 = vld [vmem:[%s15138_s1 + $0x100] sm:$0xff] }
  0x4a   :  { %2757 = vmatpush1.bf16.msra.mxu0 %v8351_v23  ;;  %2798 = vmatpush1.bf16.msra.mxu1 %v8353_v24  ;;  %v137_v23 = vld [vmem:[%s15138_s1 + $0x338] sm:$0xff] }
  0x4b   :  { %2758 = vmatprep.subr.bf16.mxu0 %v8400_v25  ;;  %2799 = vmatprep.subr.bf16.mxu1 %v8402_v26  ;;  %v161_v24 = vld [vmem:[%s15138_s1 + $0x3f8] sm:$0xff]  ;;  %v8355_v25 = vcombine.low %v88_v13, %v112_v14  ;;  %v8357_v26 = vcombine.low %v89_v15, %v113_v16  ;;  %v8312_v13 = vcombine.high %v42_v6, %v66_v7  ;;  %v90_v15 = vld [vmem:[%s15138_s1 + $0x1c0] sm:$0xff] }
  0x4c   :  { %v8406_v28 = vcombine.high %v137_v23, %v161_v24  ;;  %v114_v16 = vld [vmem:[%s15138_s1 + $0x280] sm:$0xff] }
  0x4e   :  { %2759 = vmatpush1.bf16.msra.mxu0 %v8399_v31  ;;  %2800 = vmatpush1.bf16.msra.mxu1 %v8401_v32  ;;  %v185_v31 = vld [vmem:[%s15138_s1 + $0x4b8] sm:$0xff] }
  0x4f   :  { %2760 = vmatprep.subr.bf16.mxu0 %v8448_v33  ;;  %2801 = vmatprep.subr.bf16.mxu1 %v8450_v34  ;;  %v209_v32 = vld [vmem:[%s15138_s1 + $0x578] sm:$0xff]  ;;  %v8403_v33 = vcombine.low %v136_v21, %v160_v22  ;;  %v8405_v34 = vcombine.low %v137_v23, %v161_v24  ;;  %v8360_v21 = vcombine.high %v90_v15, %v114_v16  ;;  %v138_v23 = vld [vmem:[%s15138_s1 + $0x340] sm:$0xff] }
  0x50   :  { %v8454_v36 = vcombine.high %v185_v31, %v209_v32  ;;  %v162_v24 = vld [vmem:[%s15138_s1 + $0x400] sm:$0xff] }
  0x52   :  { %2761 = vmatpush1.bf16.msra.mxu0 %v8447_v39  ;;  %2802 = vmatpush1.bf16.msra.mxu1 %v8449_v40  ;;  %v233_v39 = vld [vmem:[%s15138_s1 + $0x638] sm:$0xff] }
  0x53   :  { %2762 = vmatprep.subr.bf16.mxu0 %v8496_v41  ;;  %2803 = vmatprep.subr.bf16.mxu1 %v8498_v42  ;;  %v257_v40 = vld [vmem:[%s15138_s1 + $0x6f8] sm:$0xff]  ;;  %v8451_v41 = vcombine.low %v184_v29, %v208_v30  ;;  %v8453_v42 = vcombine.low %v185_v31, %v209_v32  ;;  %v8408_v29 = vcombine.high %v138_v23, %v162_v24  ;;  %v186_v31 = vld [vmem:[%s15138_s1 + $0x4c0] sm:$0xff] }
  0x54   :  { %v8502_v44 = vcombine.high %v233_v39, %v257_v40  ;;  %v210_v32 = vld [vmem:[%s15138_s1 + $0x580] sm:$0xff] }
  0x56   :  { %2763 = vmatpush1.bf16.msra.mxu0 %v8495_v47  ;;  %2804 = vmatpush1.bf16.msra.mxu1 %v8497_v48  ;;  %v281_v47 = vld [vmem:[%s15138_s1 + $0x7b8] sm:$0xff] }
  0x57   :  { %2764 = vmatprep.subr.bf16.mxu0 %v8544_v49  ;;  %2805 = vmatprep.subr.bf16.mxu1 %v8546_v50  ;;  %v305_v48 = vld [vmem:[%s15138_s1 + $0x878] sm:$0xff]  ;;  %v8499_v49 = vcombine.low %v232_v37, %v256_v38  ;;  %v8501_v50 = vcombine.low %v233_v39, %v257_v40  ;;  %v8456_v37 = vcombine.high %v186_v31, %v210_v32  ;;  %v234_v39 = vld [vmem:[%s15138_s1 + $0x640] sm:$0xff] }
  0x58   :  { %v8550_v52 = vcombine.high %v281_v47, %v305_v48  ;;  %v258_v40 = vld [vmem:[%s15138_s1 + $0x700] sm:$0xff] }
  0x5a   :  { %2765 = vmatpush1.bf16.msra.mxu0 %v8543_v55  ;;  %2806 = vmatpush1.bf16.msra.mxu1 %v8545_v56  ;;  %v329_v55 = vld [vmem:[%s15138_s1 + $0x938] sm:$0xff] }
  0x5b   :  { %2766 = vmatprep.subr.bf16.mxu0 %v8592_v57  ;;  %2807 = vmatprep.subr.bf16.mxu1 %v8594_v58  ;;  %v353_v56 = vld [vmem:[%s15138_s1 + $0x9f8] sm:$0xff]  ;;  %v8547_v57 = vcombine.low %v280_v45, %v304_v46  ;;  %v8549_v58 = vcombine.low %v281_v47, %v305_v48  ;;  %v8504_v45 = vcombine.high %v234_v39, %v258_v40  ;;  %v282_v47 = vld [vmem:[%s15138_s1 + $0x7c0] sm:$0xff] }
  0x5c   :  { %v8598_v60 = vcombine.high %v329_v55, %v353_v56  ;;  %v306_v48 = vld [vmem:[%s15138_s1 + $0x880] sm:$0xff] }
  0x5e   :  { %2767 = vmatpush1.bf16.msra.mxu0 %v8591_v63  ;;  %2808 = vmatpush1.bf16.msra.mxu1 %v8593_v0  ;;  %v377_v63 = vld [vmem:[%s15138_s1 + $0xab8] sm:$0xff] }
  0x5f   :  { %2768 = vmatprep.subr.bf16.mxu0 %v8640_v1  ;;  %2809 = vmatprep.subr.bf16.mxu1 %v8642_v2  ;;  %v401_v0 = vld [vmem:[%s15138_s1 + $0xb78] sm:$0xff]  ;;  %v8595_v1 = vcombine.low %v328_v53, %v352_v54  ;;  %v8597_v2 = vcombine.low %v329_v55, %v353_v56  ;;  %v8552_v53 = vcombine.high %v282_v47, %v306_v48  ;;  %v330_v55 = vld [vmem:[%s15138_s1 + $0x940] sm:$0xff] }
  0x60   :  { %v8646_v5 = vcombine.high %v377_v63, %v401_v0  ;;  %v354_v56 = vld [vmem:[%s15138_s1 + $0xa00] sm:$0xff] }
  0x62   :  { %2769 = vmatpush1.bf16.msra.mxu0 %v8639_v8  ;;  %2810 = vmatpush1.bf16.msra.mxu1 %v8641_v9  ;;  %v43_v8 = vld [vmem:[%s15138_s1 + $0x48] sm:$0xff] }
  0x63   :  { %2836 = vmatprep.subr.bf16.mxu0 %v8308_v10  ;;  %2877 = vmatprep.subr.bf16.mxu1 %v8310_v11  ;;  %v67_v9 = vld [vmem:[%s15138_s1 + $0x108] sm:$0xff]  ;;  %v8643_v10 = vcombine.low %v376_v61, %v400_v62  ;;  %v8645_v11 = vcombine.low %v377_v63, %v401_v0  ;;  %v8600_v61 = vcombine.high %v330_v55, %v354_v56  ;;  %v378_v63 = vld [vmem:[%s15138_s1 + $0xac0] sm:$0xff] }
  0x64   :  { %v8314_v14 = vcombine.high %v43_v8, %v67_v9  ;;  %v402_v0 = vld [vmem:[%s15138_s1 + $0xb80] sm:$0xff] }
  0x65   :  { %2787 = vmatmul.mubr.bf16.vlgmr.msra.gmra.mrb[8].mxu0 %v11078_v12  ;;  %2828 = vmatmul.mubr.bf16.vlgmr.msra.gmra.mrb[8].mxu1 %v11078_v12 }
  0x66   :  { %2837 = vmatpush1.bf16.msra.mxu0 %v8307_v17  ;;  %2878 = vmatpush1.bf16.msra.mxu1 %v8309_v18  ;;  %v91_v17 = vld [vmem:[%s15138_s1 + $0x1c8] sm:$0xff] }
  0x67   :  { %2838 = vmatprep.subr.bf16.mxu0 %v8356_v19  ;;  %2879 = vmatprep.subr.bf16.mxu1 %v8358_v20  ;;  %v115_v18 = vld [vmem:[%s15138_s1 + $0x288] sm:$0xff]  ;;  %v8311_v19 = vcombine.low %v42_v6, %v66_v7  ;;  %v8313_v20 = vcombine.low %v43_v8, %v67_v9  ;;  %v8648_v6 = vcombine.high %v378_v63, %v402_v0  ;;  %v44_v8 = vld [vmem:[%s15138_s1 + $0x50] sm:$0xff] }
  0x68   :  { %2868 = vmatprep.mubr.bf16.mxu0 %v10894_v3  ;;  %2909 = vmatprep.mubr.bf16.mxu1 %v10894_v3  ;;  %v8362_v22 = vcombine.high %v91_v17, %v115_v18  ;;  %v68_v9 = vld [vmem:[%s15138_s1 + $0x110] sm:$0xff] }
  0x6a   :  { %2839 = vmatpush1.bf16.msra.mxu0 %v8355_v25  ;;  %2880 = vmatpush1.bf16.msra.mxu1 %v8357_v26  ;;  %v139_v25 = vld [vmem:[%s15138_s1 + $0x348] sm:$0xff] }
  0x6b   :  { %2840 = vmatprep.subr.bf16.mxu0 %v8404_v27  ;;  %2881 = vmatprep.subr.bf16.mxu1 %v8406_v28  ;;  %v163_v26 = vld [vmem:[%s15138_s1 + $0x408] sm:$0xff]  ;;  %v8359_v27 = vcombine.low %v90_v15, %v114_v16  ;;  %v8361_v28 = vcombine.low %v91_v17, %v115_v18  ;;  %v8316_v15 = vcombine.high %v44_v8, %v68_v9  ;;  %v92_v17 = vld [vmem:[%s15138_s1 + $0x1d0] sm:$0xff] }
  0x6c   :  { %v8410_v30 = vcombine.high %v139_v25, %v163_v26  ;;  %v116_v18 = vld [vmem:[%s15138_s1 + $0x290] sm:$0xff] }
  0x6e   :  { %2841 = vmatpush1.bf16.msra.mxu0 %v8403_v33  ;;  %2882 = vmatpush1.bf16.msra.mxu1 %v8405_v34  ;;  %v187_v33 = vld [vmem:[%s15138_s1 + $0x4c8] sm:$0xff] }
  0x6f   :  { %2842 = vmatprep.subr.bf16.mxu0 %v8452_v35  ;;  %2883 = vmatprep.subr.bf16.mxu1 %v8454_v36  ;;  %v211_v34 = vld [vmem:[%s15138_s1 + $0x588] sm:$0xff]  ;;  %v8407_v35 = vcombine.low %v138_v23, %v162_v24  ;;  %v8409_v36 = vcombine.low %v139_v25, %v163_v26  ;;  %v8364_v23 = vcombine.high %v92_v17, %v116_v18  ;;  %v140_v25 = vld [vmem:[%s15138_s1 + $0x350] sm:$0xff] }
  0x70   :  { %v8458_v38 = vcombine.high %v187_v33, %v211_v34  ;;  %v164_v26 = vld [vmem:[%s15138_s1 + $0x410] sm:$0xff] }
  0x72   :  { %2843 = vmatpush1.bf16.msra.mxu0 %v8451_v41  ;;  %2884 = vmatpush1.bf16.msra.mxu1 %v8453_v42  ;;  %v235_v41 = vld [vmem:[%s15138_s1 + $0x648] sm:$0xff] }
  0x73   :  { %2844 = vmatprep.subr.bf16.mxu0 %v8500_v43  ;;  %2885 = vmatprep.subr.bf16.mxu1 %v8502_v44  ;;  %v259_v42 = vld [vmem:[%s15138_s1 + $0x708] sm:$0xff]  ;;  %v8455_v43 = vcombine.low %v186_v31, %v210_v32  ;;  %v8457_v44 = vcombine.low %v187_v33, %v211_v34  ;;  %v8412_v31 = vcombine.high %v140_v25, %v164_v26  ;;  %v188_v33 = vld [vmem:[%s15138_s1 + $0x4d0] sm:$0xff] }
  0x74   :  { %v8506_v46 = vcombine.high %v235_v41, %v259_v42  ;;  %v212_v34 = vld [vmem:[%s15138_s1 + $0x590] sm:$0xff] }
  0x76   :  { %2845 = vmatpush1.bf16.msra.mxu0 %v8499_v49  ;;  %2886 = vmatpush1.bf16.msra.mxu1 %v8501_v50  ;;  %v283_v49 = vld [vmem:[%s15138_s1 + $0x7c8] sm:$0xff] }
  0x77   :  { %2846 = vmatprep.subr.bf16.mxu0 %v8548_v51  ;;  %2887 = vmatprep.subr.bf16.mxu1 %v8550_v52  ;;  %v307_v50 = vld [vmem:[%s15138_s1 + $0x888] sm:$0xff]  ;;  %v8503_v51 = vcombine.low %v234_v39, %v258_v40  ;;  %v8505_v52 = vcombine.low %v235_v41, %v259_v42  ;;  %v8460_v39 = vcombine.high %v188_v33, %v212_v34  ;;  %v236_v41 = vld [vmem:[%s15138_s1 + $0x650] sm:$0xff] }
  0x78   :  { %v8554_v54 = vcombine.high %v283_v49, %v307_v50  ;;  %v260_v42 = vld [vmem:[%s15138_s1 + $0x710] sm:$0xff] }
  0x7a   :  { %2847 = vmatpush1.bf16.msra.mxu0 %v8547_v57  ;;  %2888 = vmatpush1.bf16.msra.mxu1 %v8549_v58  ;;  %v331_v57 = vld [vmem:[%s15138_s1 + $0x948] sm:$0xff] }
  0x7b   :  { %2848 = vmatprep.subr.bf16.mxu0 %v8596_v59  ;;  %2889 = vmatprep.subr.bf16.mxu1 %v8598_v60  ;;  %v355_v58 = vld [vmem:[%s15138_s1 + $0xa08] sm:$0xff]  ;;  %v8551_v59 = vcombine.low %v282_v47, %v306_v48  ;;  %v8553_v60 = vcombine.low %v283_v49, %v307_v50  ;;  %v8508_v47 = vcombine.high %v236_v41, %v260_v42  ;;  %v284_v49 = vld [vmem:[%s15138_s1 + $0x7d0] sm:$0xff] }
  0x7c   :  { %v8602_v62 = vcombine.high %v331_v57, %v355_v58  ;;  %v308_v50 = vld [vmem:[%s15138_s1 + $0x890] sm:$0xff] }
  0x7e   :  { %2849 = vmatpush1.bf16.msra.mxu0 %v8595_v1  ;;  %2890 = vmatpush1.bf16.msra.mxu1 %v8597_v2  ;;  %v379_v1 = vld [vmem:[%s15138_s1 + $0xac8] sm:$0xff] }
  0x7f   :  { %2850 = vmatprep.subr.bf16.mxu0 %v8644_v4  ;;  %2891 = vmatprep.subr.bf16.mxu1 %v8646_v5  ;;  %v403_v2 = vld [vmem:[%s15138_s1 + $0xb88] sm:$0xff]  ;;  %v8599_v4 = vcombine.low %v330_v55, %v354_v56  ;;  %v8601_v5 = vcombine.low %v331_v57, %v355_v58  ;;  %v8556_v55 = vcombine.high %v284_v49, %v308_v50  ;;  %v332_v57 = vld [vmem:[%s15138_s1 + $0x950] sm:$0xff] }
  0x80   :  { %v8650_v7 = vcombine.high %v379_v1, %v403_v2  ;;  %v356_v58 = vld [vmem:[%s15138_s1 + $0xa10] sm:$0xff] }
  0x82   :  { %2851 = vmatpush1.bf16.msra.mxu0 %v8643_v10  ;;  %2892 = vmatpush1.bf16.msra.mxu1 %v8645_v11  ;;  %v45_v10 = vld [vmem:[%s15138_s1 + $0x58] sm:$0xff] }
  0x83   :  { %2918 = vmatprep.subr.bf16.mxu0 %v8312_v13  ;;  %2959 = vmatprep.subr.bf16.mxu1 %v8314_v14  ;;  %v69_v11 = vld [vmem:[%s15138_s1 + $0x118] sm:$0xff]  ;;  %v8647_v13 = vcombine.low %v378_v63, %v402_v0  ;;  %v8649_v14 = vcombine.low %v379_v1, %v403_v2  ;;  %v8604_v63 = vcombine.high %v332_v57, %v356_v58  ;;  %v380_v1 = vld [vmem:[%s15138_s1 + $0xad0] sm:$0xff] }
  0x84   :  { %v8318_v16 = vcombine.high %v45_v10, %v69_v11  ;;  %v404_v2 = vld [vmem:[%s15138_s1 + $0xb90] sm:$0xff] }
  0x85   :  { %2869 = vmatmul.mubr.bf16.vlgmr.msra.gmra.mrb[12].mxu0 %v11078_v12  ;;  %2910 = vmatmul.mubr.bf16.vlgmr.msra.gmra.mrb[12].mxu1 %v11078_v12 }
  0x86   :  { %2919 = vmatpush1.bf16.msra.mxu0 %v8311_v19  ;;  %2960 = vmatpush1.bf16.msra.mxu1 %v8313_v20  ;;  %v93_v19 = vld [vmem:[%s15138_s1 + $0x1d8] sm:$0xff] }
  0x87   :  { %2920 = vmatprep.subr.bf16.mxu0 %v8360_v21  ;;  %2961 = vmatprep.subr.bf16.mxu1 %v8362_v22  ;;  %v117_v20 = vld [vmem:[%s15138_s1 + $0x298] sm:$0xff]  ;;  %v8315_v21 = vcombine.low %v44_v8, %v68_v9  ;;  %v8317_v22 = vcombine.low %v45_v10, %v69_v11  ;;  %v8652_v8 = vcombine.high %v380_v1, %v404_v2  ;;  %v46_v10 = vld [vmem:[%s15138_s1 + $0x60] sm:$0xff] }
  0x88   :  { %2950 = vmatprep.mubr.bf16.mxu0 %v10894_v3  ;;  %2991 = vmatprep.mubr.bf16.mxu1 %v10894_v3  ;;  %v8366_v24 = vcombine.high %v93_v19, %v117_v20  ;;  %v70_v11 = vld [vmem:[%s15138_s1 + $0x120] sm:$0xff] }
  0x8a   :  { %2921 = vmatpush1.bf16.msra.mxu0 %v8359_v27  ;;  %2962 = vmatpush1.bf16.msra.mxu1 %v8361_v28  ;;  %v141_v27 = vld [vmem:[%s15138_s1 + $0x358] sm:$0xff] }
  0x8b   :  { %2922 = vmatprep.subr.bf16.mxu0 %v8408_v29  ;;  %2963 = vmatprep.subr.bf16.mxu1 %v8410_v30  ;;  %v165_v28 = vld [vmem:[%s15138_s1 + $0x418] sm:$0xff]  ;;  %v8363_v29 = vcombine.low %v92_v17, %v116_v18  ;;  %v8365_v30 = vcombine.low %v93_v19, %v117_v20  ;;  %v8320_v17 = vcombine.high %v46_v10, %v70_v11  ;;  %v94_v19 = vld [vmem:[%s15138_s1 + $0x1e0] sm:$0xff] }
  0x8c   :  { %v8414_v32 = vcombine.high %v141_v27, %v165_v28  ;;  %v118_v20 = vld [vmem:[%s15138_s1 + $0x2a0] sm:$0xff] }
  0x8e   :  { %2923 = vmatpush1.bf16.msra.mxu0 %v8407_v35  ;;  %2964 = vmatpush1.bf16.msra.mxu1 %v8409_v36  ;;  %v189_v35 = vld [vmem:[%s15138_s1 + $0x4d8] sm:$0xff] }
  0x8f   :  { %2924 = vmatprep.subr.bf16.mxu0 %v8456_v37  ;;  %2965 = vmatprep.subr.bf16.mxu1 %v8458_v38  ;;  %v213_v36 = vld [vmem:[%s15138_s1 + $0x598] sm:$0xff]  ;;  %v8411_v37 = vcombine.low %v140_v25, %v164_v26  ;;  %v8413_v38 = vcombine.low %v141_v27, %v165_v28  ;;  %v8368_v25 = vcombine.high %v94_v19, %v118_v20  ;;  %v142_v27 = vld [vmem:[%s15138_s1 + $0x360] sm:$0xff] }
  0x90   :  { %v8462_v40 = vcombine.high %v189_v35, %v213_v36  ;;  %v166_v28 = vld [vmem:[%s15138_s1 + $0x420] sm:$0xff] }
  0x92   :  { %2925 = vmatpush1.bf16.msra.mxu0 %v8455_v43  ;;  %2966 = vmatpush1.bf16.msra.mxu1 %v8457_v44  ;;  %v237_v43 = vld [vmem:[%s15138_s1 + $0x658] sm:$0xff] }
  0x93   :  { %2926 = vmatprep.subr.bf16.mxu0 %v8504_v45  ;;  %2967 = vmatprep.subr.bf16.mxu1 %v8506_v46  ;;  %v261_v44 = vld [vmem:[%s15138_s1 + $0x718] sm:$0xff]  ;;  %v8459_v45 = vcombine.low %v188_v33, %v212_v34  ;;  %v8461_v46 = vcombine.low %v189_v35, %v213_v36  ;;  %v8416_v33 = vcombine.high %v142_v27, %v166_v28  ;;  %v190_v35 = vld [vmem:[%s15138_s1 + $0x4e0] sm:$0xff] }
  0x94   :  { %v8510_v48 = vcombine.high %v237_v43, %v261_v44  ;;  %v214_v36 = vld [vmem:[%s15138_s1 + $0x5a0] sm:$0xff] }
  0x96   :  { %2927 = vmatpush1.bf16.msra.mxu0 %v8503_v51  ;;  %2968 = vmatpush1.bf16.msra.mxu1 %v8505_v52  ;;  %v285_v51 = vld [vmem:[%s15138_s1 + $0x7d8] sm:$0xff] }
  0x97   :  { %2928 = vmatprep.subr.bf16.mxu0 %v8552_v53  ;;  %2969 = vmatprep.subr.bf16.mxu1 %v8554_v54  ;;  %v309_v52 = vld [vmem:[%s15138_s1 + $0x898] sm:$0xff]  ;;  %v8507_v53 = vcombine.low %v236_v41, %v260_v42  ;;  %v8509_v54 = vcombine.low %v237_v43, %v261_v44  ;;  %v8464_v41 = vcombine.high %v190_v35, %v214_v36  ;;  %v238_v43 = vld [vmem:[%s15138_s1 + $0x660] sm:$0xff] }
  0x98   :  { %v8558_v56 = vcombine.high %v285_v51, %v309_v52  ;;  %v262_v44 = vld [vmem:[%s15138_s1 + $0x720] sm:$0xff] }
  0x9a   :  { %2929 = vmatpush1.bf16.msra.mxu0 %v8551_v59  ;;  %2970 = vmatpush1.bf16.msra.mxu1 %v8553_v60  ;;  %v333_v59 = vld [vmem:[%s15138_s1 + $0x958] sm:$0xff] }
  0x9b   :  { %2930 = vmatprep.subr.bf16.mxu0 %v8600_v61  ;;  %2971 = vmatprep.subr.bf16.mxu1 %v8602_v62  ;;  %v357_v60 = vld [vmem:[%s15138_s1 + $0xa18] sm:$0xff]  ;;  %v8555_v61 = vcombine.low %v284_v49, %v308_v50  ;;  %v8557_v62 = vcombine.low %v285_v51, %v309_v52  ;;  %v8512_v49 = vcombine.high %v238_v43, %v262_v44  ;;  %v286_v51 = vld [vmem:[%s15138_s1 + $0x7e0] sm:$0xff] }
  0x9c   :  { %v8606_v0 = vcombine.high %v333_v59, %v357_v60  ;;  %v310_v52 = vld [vmem:[%s15138_s1 + $0x8a0] sm:$0xff] }
  0x9e   :  { %2931 = vmatpush1.bf16.msra.mxu0 %v8599_v4  ;;  %2972 = vmatpush1.bf16.msra.mxu1 %v8601_v5  ;;  %v381_v4 = vld [vmem:[%s15138_s1 + $0xad8] sm:$0xff] }
  0x9f   :  { %2932 = vmatprep.subr.bf16.mxu0 %v8648_v6  ;;  %2973 = vmatprep.subr.bf16.mxu1 %v8650_v7  ;;  %v405_v5 = vld [vmem:[%s15138_s1 + $0xb98] sm:$0xff]  ;;  %v8603_v6 = vcombine.low %v332_v57, %v356_v58  ;;  %v8605_v7 = vcombine.low %v333_v59, %v357_v60  ;;  %v8560_v57 = vcombine.high %v286_v51, %v310_v52  ;;  %v334_v59 = vld [vmem:[%s15138_s1 + $0x960] sm:$0xff] }
  0xa0   :  { %v8654_v9 = vcombine.high %v381_v4, %v405_v5  ;;  %v358_v60 = vld [vmem:[%s15138_s1 + $0xa20] sm:$0xff] }
  0xa2   :  { %2933 = vmatpush1.bf16.msra.mxu0 %v8647_v13  ;;  %2974 = vmatpush1.bf16.msra.mxu1 %v8649_v14  ;;  %v47_v13 = vld [vmem:[%s15138_s1 + $0x68] sm:$0xff] }
  0xa3   :  { %3000 = vmatprep.subr.bf16.mxu0 %v8316_v15  ;;  %3041 = vmatprep.subr.bf16.mxu1 %v8318_v16  ;;  %v71_v14 = vld [vmem:[%s15138_s1 + $0x128] sm:$0xff]  ;;  %v8651_v15 = vcombine.low %v380_v1, %v404_v2  ;;  %v8653_v16 = vcombine.low %v381_v4, %v405_v5  ;;  %v8608_v1 = vcombine.high %v334_v59, %v358_v60  ;;  %v382_v4 = vld [vmem:[%s15138_s1 + $0xae0] sm:$0xff] }
  0xa4   :  { %v8322_v18 = vcombine.high %v47_v13, %v71_v14  ;;  %v406_v5 = vld [vmem:[%s15138_s1 + $0xba0] sm:$0xff] }
  0xa5   :  { %2951 = vmatmul.mubr.bf16.vlgmr.msra.gmra.mrb[16].mxu0 %v11078_v12  ;;  %2992 = vmatmul.mubr.bf16.vlgmr.msra.gmra.mrb[16].mxu1 %v11078_v12 }
  0xa6   :  { %3001 = vmatpush1.bf16.msra.mxu0 %v8315_v21  ;;  %3042 = vmatpush1.bf16.msra.mxu1 %v8317_v22  ;;  %v95_v21 = vld [vmem:[%s15138_s1 + $0x1e8] sm:$0xff] }
  0xa7   :  { %3002 = vmatprep.subr.bf16.mxu0 %v8364_v23  ;;  %3043 = vmatprep.subr.bf16.mxu1 %v8366_v24  ;;  %v119_v22 = vld [vmem:[%s15138_s1 + $0x2a8] sm:$0xff]  ;;  %v8319_v23 = vcombine.low %v46_v10, %v70_v11  ;;  %v8321_v24 = vcombine.low %v47_v13, %v71_v14  ;;  %v8656_v10 = vcombine.high %v382_v4, %v406_v5  ;;  %v48_v13 = vld [vmem:[%s15138_s1 + $0x70] sm:$0xff] }
  0xa8   :  { %3032 = vmatprep.mubr.bf16.mxu0 %v10894_v3  ;;  %3073 = vmatprep.mubr.bf16.mxu1 %v10894_v3  ;;  %v8370_v26 = vcombine.high %v95_v21, %v119_v22  ;;  %v72_v14 = vld [vmem:[%s15138_s1 + $0x130] sm:$0xff] }
  0xaa   :  { %3003 = vmatpush1.bf16.msra.mxu0 %v8363_v29  ;;  %3044 = vmatpush1.bf16.msra.mxu1 %v8365_v30  ;;  %v143_v29 = vld [vmem:[%s15138_s1 + $0x368] sm:$0xff] }
  0xab   :  { %3004 = vmatprep.subr.bf16.mxu0 %v8412_v31  ;;  %3045 = vmatprep.subr.bf16.mxu1 %v8414_v32  ;;  %v167_v30 = vld [vmem:[%s15138_s1 + $0x428] sm:$0xff]  ;;  %v11596_v31 = vld [vmem:[%s15139_s0] sm:$0xf]  ;;  %v8367_v32 = vcombine.low %v94_v19, %v118_v20  ;;  %v8324_v19 = vcombine.high %v48_v13, %v72_v14 }
  0xac   :  { %v8418_v34 = vcombine.high %v143_v29, %v167_v30 }
  0xae   :  { %3005 = vmatpush1.bf16.msra.mxu0 %v8411_v37  ;;  %3046 = vmatpush1.bf16.msra.mxu1 %v8413_v38  ;;  %v191_v37 = vld [vmem:[%s15138_s1 + $0x4e8] sm:$0xff] }
  0xaf   :  { %3006 = vmatprep.subr.bf16.mxu0 %v8460_v39  ;;  %3047 = vmatprep.subr.bf16.mxu1 %v8462_v40  ;;  %v215_v38 = vld [vmem:[%s15138_s1 + $0x5a8] sm:$0xff]  ;;  %v8415_v39 = vcombine.low %v142_v27, %v166_v28  ;;  %v8417_v40 = vcombine.low %v143_v29, %v167_v30  ;;  %v144_v29 = vld [vmem:[%s15138_s1 + $0x370] sm:$0xff] }
  0xb0   :  { %v8466_v42 = vcombine.high %v191_v37, %v215_v38  ;;  %v168_v30 = vld [vmem:[%s15138_s1 + $0x430] sm:$0xff] }
  0xb2   :  { %3007 = vmatpush1.bf16.msra.mxu0 %v8459_v45  ;;  %3048 = vmatpush1.bf16.msra.mxu1 %v8461_v46  ;;  %v239_v45 = vld [vmem:[%s15138_s1 + $0x668] sm:$0xff] }
  0xb3   :  { %3008 = vmatprep.subr.bf16.mxu0 %v8508_v47  ;;  %3049 = vmatprep.subr.bf16.mxu1 %v8510_v48  ;;  %v263_v46 = vld [vmem:[%s15138_s1 + $0x728] sm:$0xff]  ;;  %v8463_v47 = vcombine.low %v190_v35, %v214_v36  ;;  %v8465_v48 = vcombine.low %v191_v37, %v215_v38  ;;  %v8420_v35 = vcombine.high %v144_v29, %v168_v30  ;;  %v192_v37 = vld [vmem:[%s15138_s1 + $0x4f0] sm:$0xff] }
  0xb4   :  { %v8514_v50 = vcombine.high %v239_v45, %v263_v46  ;;  %v216_v38 = vld [vmem:[%s15138_s1 + $0x5b0] sm:$0xff] }
  0xb6   :  { %3009 = vmatpush1.bf16.msra.mxu0 %v8507_v53  ;;  %3050 = vmatpush1.bf16.msra.mxu1 %v8509_v54  ;;  %v287_v53 = vld [vmem:[%s15138_s1 + $0x7e8] sm:$0xff] }
  0xb7   :  { %3010 = vmatprep.subr.bf16.mxu0 %v8556_v55  ;;  %3051 = vmatprep.subr.bf16.mxu1 %v8558_v56  ;;  %v311_v54 = vld [vmem:[%s15138_s1 + $0x8a8] sm:$0xff]  ;;  %v8511_v55 = vcombine.low %v238_v43, %v262_v44  ;;  %v8513_v56 = vcombine.low %v239_v45, %v263_v46  ;;  %v8468_v43 = vcombine.high %v192_v37, %v216_v38  ;;  %v240_v45 = vld [vmem:[%s15138_s1 + $0x670] sm:$0xff] }
  0xb8   :  { %v8562_v58 = vcombine.high %v287_v53, %v311_v54  ;;  %v264_v46 = vld [vmem:[%s15138_s1 + $0x730] sm:$0xff] }
  0xba   :  { %3011 = vmatpush1.bf16.msra.mxu0 %v8555_v61  ;;  %3052 = vmatpush1.bf16.msra.mxu1 %v8557_v62  ;;  %v335_v61 = vld [vmem:[%s15138_s1 + $0x968] sm:$0xff] }
  0xbb   :  { %3012 = vmatprep.subr.bf16.mxu0 %v8604_v63  ;;  %3053 = vmatprep.subr.bf16.mxu1 %v8606_v0  ;;  %v359_v62 = vld [vmem:[%s15138_s1 + $0xa28] sm:$0xff]  ;;  %v8559_v63 = vcombine.low %v286_v51, %v310_v52  ;;  %v8561_v0 = vcombine.low %v287_v53, %v311_v54  ;;  %v8516_v51 = vcombine.high %v240_v45, %v264_v46  ;;  %v288_v53 = vld [vmem:[%s15138_s1 + $0x7f0] sm:$0xff] }
  0xbc   :  { %v8610_v2 = vcombine.high %v335_v61, %v359_v62  ;;  %v312_v54 = vld [vmem:[%s15138_s1 + $0x8b0] sm:$0xff] }
  0xbe   :  { %3013 = vmatpush1.bf16.msra.mxu0 %v8603_v6  ;;  %3054 = vmatpush1.bf16.msra.mxu1 %v8605_v7  ;;  %v383_v6 = vld [vmem:[%s15138_s1 + $0xae8] sm:$0xff] }
  0xbf   :  { %3014 = vmatprep.subr.bf16.mxu0 %v8652_v8  ;;  %3055 = vmatprep.subr.bf16.mxu1 %v8654_v9  ;;  %v407_v7 = vld [vmem:[%s15138_s1 + $0xba8] sm:$0xff]  ;;  %v8607_v8 = vcombine.low %v334_v59, %v358_v60  ;;  %v8609_v9 = vcombine.low %v335_v61, %v359_v62  ;;  %v8564_v59 = vcombine.high %v288_v53, %v312_v54  ;;  %v336_v61 = vld [vmem:[%s15138_s1 + $0x970] sm:$0xff] }
  0xc0   :  { %v8658_v11 = vcombine.high %v383_v6, %v407_v7  ;;  %v360_v62 = vld [vmem:[%s15138_s1 + $0xa30] sm:$0xff] }
  0xc2   :  { %3015 = vmatpush1.bf16.msra.mxu0 %v8651_v15  ;;  %3056 = vmatpush1.bf16.msra.mxu1 %v8653_v16  ;;  %v49_v15 = vld [vmem:[%s15138_s1 + $0x78] sm:$0xff] }
  0xc3   :  { %3082 = vmatprep.subr.bf16.mxu0 %v8320_v17  ;;  %3123 = vmatprep.subr.bf16.mxu1 %v8322_v18  ;;  %v73_v16 = vld [vmem:[%s15138_s1 + $0x138] sm:$0xff]  ;;  %v8655_v17 = vcombine.low %v382_v4, %v406_v5  ;;  %v8657_v18 = vcombine.low %v383_v6, %v407_v7  ;;  %v8612_v4 = vcombine.high %v336_v61, %v360_v62  ;;  %v384_v7 = vld [vmem:[%s15138_s1 + $0xaf0] sm:$0xff] }
  0xc4   :  { %v8326_v20 = vcombine.high %v49_v15, %v73_v16 }
  0xc5   :  { %3033 = vmatmul.mubr.bf16.vlgmr.msra.gmra.mrb[20].mxu0 %v11078_v12  ;;  %3074 = vmatmul.mubr.bf16.vlgmr.msra.gmra.mrb[20].mxu1 %v11596_v31  ;;  %v8369_v12 = vcombine.low %v95_v21, %v119_v22  ;;  %v96_v21 = vld [vmem:[%s15138_s1 + $0x1f0] sm:$0xff] }
  0xc6   :  { %3083 = vmatpush1.bf16.msra.mxu0 %v8319_v23  ;;  %3124 = vmatpush1.bf16.msra.mxu1 %v8321_v24  ;;  %v120_v22 = vld [vmem:[%s15138_s1 + $0x2b0] sm:$0xff]  ;;  %v97_v23 = vld [vmem:[%s15138_s1 + $0x1f8] sm:$0xff] }
  0xc7   :  { %3084 = vmatprep.subr.bf16.mxu0 %v8368_v25  ;;  %3125 = vmatprep.subr.bf16.mxu1 %v8370_v26  ;;  %v121_v24 = vld [vmem:[%s15138_s1 + $0x2b8] sm:$0xff]  ;;  %v8323_v25 = vcombine.low %v48_v13, %v72_v14  ;;  %v8325_v26 = vcombine.low %v49_v15, %v73_v16  ;;  %v8372_v27 = vcombine.high %v96_v21, %v120_v22 }
  0xc8   :  { %3114 = vmatprep.mubr.bf16.mxu0 %v10894_v3  ;;  %3155 = vmatprep.mubr.bf16.mxu1 %v10894_v3  ;;  %v8374_v28 = vcombine.high %v97_v23, %v121_v24  ;;  %v409_v13 = vld [vmem:[%s15138_s1 + $0xbb8] sm:$0xff]  ;;  %v8611_v16 = vcombine.low %v336_v61, %v360_v62 }
  0xca   :  { %3085 = vmatpush1.bf16.msra.mxu0 %v8367_v32  ;;  %3126 = vmatpush1.bf16.msra.mxu1 %v8369_v12  ;;  %v145_v32 = vld [vmem:[%s15138_s1 + $0x378] sm:$0xff] }
  0xcb   :  { %3086 = vmatprep.subr.bf16.mxu0 %v8416_v33  ;;  %3127 = vmatprep.subr.bf16.mxu1 %v8418_v34  ;;  %v169_v12 = vld [vmem:[%s15138_s1 + $0x438] sm:$0xff]  ;;  %v8371_v33 = vcombine.low %v96_v21, %v120_v22  ;;  %v8373_v34 = vcombine.low %v97_v23, %v121_v24  ;;  %v50_v23 = vld [vmem:[%s15138_s1 + $0x80] sm:$0xff] }
  0xcc   :  { %v8422_v36 = vcombine.high %v145_v32, %v169_v12  ;;  %v74_v24 = vld [vmem:[%s15138_s1 + $0x140] sm:$0xff] }
  0xce   :  { %3087 = vmatpush1.bf16.msra.mxu0 %v8415_v39  ;;  %3128 = vmatpush1.bf16.msra.mxu1 %v8417_v40  ;;  %v193_v39 = vld [vmem:[%s15138_s1 + $0x4f8] sm:$0xff] }
  0xcf   :  { %3088 = vmatprep.subr.bf16.mxu0 %v8464_v41  ;;  %3129 = vmatprep.subr.bf16.mxu1 %v8466_v42  ;;  %v217_v40 = vld [vmem:[%s15138_s1 + $0x5b8] sm:$0xff]  ;;  %v8419_v41 = vcombine.low %v144_v29, %v168_v30  ;;  %v8421_v42 = vcombine.low %v145_v32, %v169_v12  ;;  %v8328_v29 = vcombine.high %v50_v23, %v74_v24  ;;  %v98_v32 = vld [vmem:[%s15138_s1 + $0x200] sm:$0xff] }
  0xd0   :  { %v8470_v44 = vcombine.high %v193_v39, %v217_v40  ;;  %v122_v12 = vld [vmem:[%s15138_s1 + $0x2c0] sm:$0xff] }
  0xd2   :  { %3089 = vmatpush1.bf16.msra.mxu0 %v8463_v47  ;;  %3130 = vmatpush1.bf16.msra.mxu1 %v8465_v48  ;;  %v241_v47 = vld [vmem:[%s15138_s1 + $0x678] sm:$0xff] }
  0xd3   :  { %3090 = vmatprep.subr.bf16.mxu0 %v8512_v49  ;;  %3131 = vmatprep.subr.bf16.mxu1 %v8514_v50  ;;  %v265_v48 = vld [vmem:[%s15138_s1 + $0x738] sm:$0xff]  ;;  %v8467_v49 = vcombine.low %v192_v37, %v216_v38  ;;  %v8469_v50 = vcombine.low %v193_v39, %v217_v40  ;;  %v8376_v37 = vcombine.high %v98_v32, %v122_v12  ;;  %v146_v39 = vld [vmem:[%s15138_s1 + $0x380] sm:$0xff] }
  0xd4   :  { %v8518_v52 = vcombine.high %v241_v47, %v265_v48  ;;  %v170_v40 = vld [vmem:[%s15138_s1 + $0x440] sm:$0xff] }
  0xd6   :  { %3091 = vmatpush1.bf16.msra.mxu0 %v8511_v55  ;;  %3132 = vmatpush1.bf16.msra.mxu1 %v8513_v56  ;;  %v289_v55 = vld [vmem:[%s15138_s1 + $0x7f8] sm:$0xff] }
  0xd7   :  { %3092 = vmatprep.subr.bf16.mxu0 %v8560_v57  ;;  %3133 = vmatprep.subr.bf16.mxu1 %v8562_v58  ;;  %v313_v56 = vld [vmem:[%s15138_s1 + $0x8b8] sm:$0xff]  ;;  %v8515_v57 = vcombine.low %v240_v45, %v264_v46  ;;  %v8517_v58 = vcombine.low %v241_v47, %v265_v48  ;;  %v8424_v45 = vcombine.high %v146_v39, %v170_v40  ;;  %v194_v47 = vld [vmem:[%s15138_s1 + $0x500] sm:$0xff] }
  0xd8   :  { %v8566_v60 = vcombine.high %v289_v55, %v313_v56  ;;  %v218_v48 = vld [vmem:[%s15138_s1 + $0x5c0] sm:$0xff] }
  0xda   :  { %3093 = vmatpush1.bf16.msra.mxu0 %v8559_v63  ;;  %3134 = vmatpush1.bf16.msra.mxu1 %v8561_v0  ;;  %v337_v63 = vld [vmem:[%s15138_s1 + $0x978] sm:$0xff] }
  0xdb   :  { %3094 = vmatprep.subr.bf16.mxu0 %v8608_v1  ;;  %3135 = vmatprep.subr.bf16.mxu1 %v8610_v2  ;;  %v361_v0 = vld [vmem:[%s15138_s1 + $0xa38] sm:$0xff]  ;;  %v8563_v1 = vcombine.low %v288_v53, %v312_v54  ;;  %v8565_v2 = vcombine.low %v289_v55, %v313_v56  ;;  %v8472_v53 = vcombine.high %v194_v47, %v218_v48  ;;  %v242_v55 = vld [vmem:[%s15138_s1 + $0x680] sm:$0xff] }
  0xdc   :  { %v8614_v6 = vcombine.high %v337_v63, %v361_v0  ;;  %v266_v56 = vld [vmem:[%s15138_s1 + $0x740] sm:$0xff] }
  0xdd   :  { %v8520_v61 = vcombine.high %v242_v55, %v266_v56 }
  0xde   :  { %3095 = vmatpush1.bf16.msra.mxu0 %v8607_v8  ;;  %3136 = vmatpush1.bf16.msra.mxu1 %v8609_v9  ;;  %v408_v8 = vld [vmem:[%s15138_s1 + $0xbb0] sm:$0xff] }
  0xdf   :  { %3096 = vmatprep.subr.bf16.mxu0 %v8656_v10  ;;  %3137 = vmatprep.subr.bf16.mxu1 %v8658_v11  ;;  %v385_v11 = vld [vmem:[%s15138_s1 + $0xaf8] sm:$0xff] }
  0xe0   :  { %v8662_v22 = vcombine.high %v385_v11, %v409_v13 }
  0xe2   :  { %3097 = vmatpush1.bf16.msra.mxu0 %v8655_v17  ;;  %3138 = vmatpush1.bf16.msra.mxu1 %v8657_v18 }
  0xe3   :  { %3164 = vmatprep.subr.bf16.mxu0 %v8324_v19  ;;  %3205 = vmatprep.subr.bf16.mxu1 %v8326_v20  ;;  %v8613_v19 = vcombine.low %v337_v63, %v361_v0  ;;  %v8660_v20 = vcombine.high %v384_v7, %v408_v8  ;;  %v290_v63 = vld [vmem:[%s15138_s1 + $0x800] sm:$0xff] }
  0xe4   :  { %v314_v0 = vld [vmem:[%s15138_s1 + $0x8c0] sm:$0xff] }
  0xe5   :  { %3115 = vmatmul.mubr.bf16.vlgmr.msra.gmra.mrb[24].mxu0 %v11596_v31  ;;  %3156 = vmatmul.mubr.bf16.vlgmr.msra.gmra.mrb[24].mxu1 %v11596_v31 }
  0xe6   :  { %3165 = vmatpush1.bf16.msra.mxu0 %v8323_v25  ;;  %3206 = vmatpush1.bf16.msra.mxu1 %v8325_v26  ;;  %v51_v25 = vld [vmem:[%s15138_s1 + $0x88] sm:$0xff] }
  0xe7   :  { %3166 = vmatprep.subr.bf16.mxu0 %v8372_v27  ;;  %3207 = vmatprep.subr.bf16.mxu1 %v8374_v28  ;;  %v75_v26 = vld [vmem:[%s15138_s1 + $0x148] sm:$0xff]  ;;  %v8659_v27 = vcombine.low %v384_v7, %v408_v8  ;;  %v8661_v28 = vcombine.low %v385_v11, %v409_v13  ;;  %v8568_v7 = vcombine.high %v290_v63, %v314_v0  ;;  %v338_v11 = vld [vmem:[%s15138_s1 + $0x980] sm:$0xff] }
  0xe8   :  { %3196 = vmatprep.mubr.bf16.mxu0 %v10894_v3  ;;  %3237 = vmatprep.mubr.bf16.mxu1 %v10894_v3  ;;  %v8330_v30 = vcombine.high %v51_v25, %v75_v26  ;;  %v362_v13 = vld [vmem:[%s15138_s1 + $0xa40] sm:$0xff] }
  0xea   :  { %3167 = vmatpush1.bf16.msra.mxu0 %v8371_v33  ;;  %3208 = vmatpush1.bf16.msra.mxu1 %v8373_v34  ;;  %v99_v33 = vld [vmem:[%s15138_s1 + $0x208] sm:$0xff] }
  0xeb   :  { %3168 = vmatprep.subr.bf16.mxu0 %v8420_v35  ;;  %3209 = vmatprep.subr.bf16.mxu1 %v8422_v36  ;;  %v123_v34 = vld [vmem:[%s15138_s1 + $0x2c8] sm:$0xff]  ;;  %v8327_v35 = vcombine.low %v50_v23, %v74_v24  ;;  %v8329_v36 = vcombine.low %v51_v25, %v75_v26  ;;  %v410_v23 = vld [vmem:[%s15138_s1 + $0xbc0] sm:$0xff] }
  0xec   :  { %v8378_v38 = vcombine.high %v99_v33, %v123_v34  ;;  %v387_v26 = vld [vmem:[%s15138_s1 + $0xb08] sm:$0xff] }
  0xee   :  { %3169 = vmatpush1.bf16.msra.mxu0 %v8419_v41  ;;  %3210 = vmatpush1.bf16.msra.mxu1 %v8421_v42  ;;  %v147_v41 = vld [vmem:[%s15138_s1 + $0x388] sm:$0xff] }
  0xef   :  { %3170 = vmatprep.subr.bf16.mxu0 %v8468_v43  ;;  %3211 = vmatprep.subr.bf16.mxu1 %v8470_v44  ;;  %v171_v42 = vld [vmem:[%s15138_s1 + $0x448] sm:$0xff]  ;;  %v8375_v43 = vcombine.low %v98_v32, %v122_v12  ;;  %v8377_v44 = vcombine.low %v99_v33, %v123_v34 }
  0xf0   :  { %v8426_v46 = vcombine.high %v147_v41, %v171_v42 }
  0xf2   :  { %3171 = vmatpush1.bf16.msra.mxu0 %v8467_v49  ;;  %3212 = vmatpush1.bf16.msra.mxu1 %v8469_v50  ;;  %v195_v49 = vld [vmem:[%s15138_s1 + $0x508] sm:$0xff] }
  0xf3   :  { %3172 = vmatprep.subr.bf16.mxu0 %v8516_v51  ;;  %3213 = vmatprep.subr.bf16.mxu1 %v8518_v52  ;;  %v219_v50 = vld [vmem:[%s15138_s1 + $0x5c8] sm:$0xff]  ;;  %v8423_v51 = vcombine.low %v146_v39, %v170_v40  ;;  %v8425_v52 = vcombine.low %v147_v41, %v171_v42  ;;  %v53_v39 = vld [vmem:[%s15138_s1 + $0x98] sm:$0xff] }
  0xf4   :  { %v8474_v54 = vcombine.high %v195_v49, %v219_v50  ;;  %v77_v40 = vld [vmem:[%s15138_s1 + $0x158] sm:$0xff] }
  0xf6   :  { %3173 = vmatpush1.bf16.msra.mxu0 %v8515_v57  ;;  %3214 = vmatpush1.bf16.msra.mxu1 %v8517_v58  ;;  %v243_v57 = vld [vmem:[%s15138_s1 + $0x688] sm:$0xff] }
  0xf7   :  { %3174 = vmatprep.subr.bf16.mxu0 %v8564_v59  ;;  %3215 = vmatprep.subr.bf16.mxu1 %v8566_v60  ;;  %v267_v58 = vld [vmem:[%s15138_s1 + $0x748] sm:$0xff]  ;;  %v8471_v59 = vcombine.low %v194_v47, %v218_v48  ;;  %v8473_v60 = vcombine.low %v195_v49, %v219_v50  ;;  %v101_v47 = vld [vmem:[%s15138_s1 + $0x218] sm:$0xff]  ;;  %v8333_v50 = vcombine.low %v53_v39, %v77_v40 }
  0xf8   :  { %v11749_v5 = vpop.f32.mrb[0].mxu0  ;;  %v11757_v9 = vpop.f32.mrb[0].mxu1  ;;  %v8522_v62 = vcombine.high %v243_v57, %v267_v58  ;;  %v125_v48 = vld [vmem:[%s15138_s1 + $0x2d8] sm:$0xff] }
  0xf9   :  { %v11759_v10 = vpop.f32.mrb[1].mxu0  ;;  %v11767_v14 = vpop.f32.mrb[1].mxu1 }
  0xfa   :  { %v2628_v15 = vpop.f32.mrb[2].mxu0  ;;  %3175 = vmatpush1.bf16.msra.mxu0 %v8563_v1  ;;  %v2669_v17 = vpop.f32.mrb[2].mxu1  ;;  %3216 = vmatpush1.bf16.msra.mxu1 %v8565_v2  ;;  %v291_v1 = vld [vmem:[%s15138_s1 + $0x808] sm:$0xff] }
  0xfb   :  { %v2629_v18 = vpop.f32.mrb[3].mxu0  ;;  %3176 = vmatprep.subr.bf16.mxu0 %v8612_v4  ;;  %v2670_v21 = vpop.f32.mrb[3].mxu1  ;;  %3217 = vmatprep.subr.bf16.mxu1 %v8614_v6  ;;  %v315_v2 = vld [vmem:[%s15138_s1 + $0x8c8] sm:$0xff]  ;;  %v8519_v4 = vcombine.low %v242_v55, %v266_v56  ;;  %v8521_v6 = vcombine.low %v243_v57, %v267_v58  ;;  %v8567_v17 = vcombine.low %v290_v63, %v314_v0  ;;  %v149_v55 = vld [vmem:[%s15138_s1 + $0x398] sm:$0xff] }
  0xfc   :  { %v8570_v8 = vcombine.high %v291_v1, %v315_v2  ;;  %v339_v15 = vld [vmem:[%s15138_s1 + $0x988] sm:$0xff]  ;;  %v8569_v18 = vcombine.low %v291_v1, %v315_v2  ;;  %v173_v56 = vld [vmem:[%s15138_s1 + $0x458] sm:$0xff]  ;;  %v8381_v58 = vcombine.low %v101_v47, %v125_v48 }
  0xfd   :  { %v197_v63 = vld [vmem:[%s15138_s1 + $0x518] sm:$0xff]  ;;  %v8429_v2 = vcombine.low %v149_v55, %v173_v56 }
  0xfe   :  { %3177 = vmatpush1.bf16.msra.mxu0 %v8611_v16  ;;  %3218 = vmatpush1.bf16.msra.mxu1 %v8613_v19  ;;  %v363_v16 = vld [vmem:[%s15138_s1 + $0xa48] sm:$0xff]  ;;  %v8616_v19 = vcombine.high %v338_v11, %v362_v13  ;;  %v221_v0 = vld [vmem:[%s15138_s1 + $0x5d8] sm:$0xff] }
  0xff   :  { %3178 = vmatprep.subr.bf16.mxu0 %v8660_v20  ;;  %3219 = vmatprep.subr.bf16.mxu1 %v8662_v22  ;;  %v8618_v21 = vcombine.high %v339_v15, %v363_v16  ;;  %v386_v22 = vld [vmem:[%s15138_s1 + $0xb00] sm:$0xff]  ;;  %v8617_v33 = vcombine.low %v339_v15, %v363_v16  ;;  %v8477_v16 = vcombine.low %v197_v63, %v221_v0 }
 0x100   :  { %v8664_v34 = vcombine.high %v386_v22, %v410_v23  ;;  %v8663_v41 = vcombine.low %v386_v22, %v410_v23  ;;  %v293_v22 = vld [vmem:[%s15138_s1 + $0x818] sm:$0xff] }
 0x101   :  { %v317_v23 = vld [vmem:[%s15138_s1 + $0x8d8] sm:$0xff] }
 0x102   :  { %3179 = vmatpush1.bf16.msra.mxu0 %v8659_v27  ;;  %3220 = vmatpush1.bf16.msra.mxu1 %v8661_v28  ;;  %v411_v27 = vld [vmem:[%s15138_s1 + $0xbc8] sm:$0xff] }
 0x103   :  { %3246 = vmatprep.subr.bf16.mxu0 %v8328_v29  ;;  %3287 = vmatprep.subr.bf16.mxu1 %v8330_v30  ;;  %v8615_v30 = vcombine.low %v338_v11, %v362_v13  ;;  %v8665_v42 = vcombine.low %v387_v26, %v411_v27  ;;  %v245_v11 = vld [vmem:[%s15138_s1 + $0x698] sm:$0xff] }
 0x104   :  { %v269_v13 = vld [vmem:[%s15138_s1 + $0x758] sm:$0xff] }
 0x105   :  { %3197 = vmatmul.mubr.bf16.vlgmr.msra.gmra.mrb[28].mxu0 %v11596_v31  ;;  %3238 = vmatmul.mubr.bf16.vlgmr.msra.gmra.mrb[28].mxu1 %v11596_v31 }
 0x106   :  { %3247 = vmatpush1.bf16.msra.mxu0 %v8327_v35  ;;  %3288 = vmatpush1.bf16.msra.mxu1 %v8329_v36  ;;  %v8666_v36 = vcombine.high %v387_v26, %v411_v27  ;;  %v8525_v27 = vcombine.low %v245_v11, %v269_v13 }
 0x107   :  { %3248 = vmatprep.subr.bf16.mxu0 %v8376_v37  ;;  %3289 = vmatprep.subr.bf16.mxu1 %v8378_v38  ;;  %v52_v37 = vld [vmem:[%s15138_s1 + $0x90] sm:$0xff] }
 0x108   :  { %3278 = vmatprep.mubr.bf16.mxu0 %v10894_v3  ;;  %3319 = vmatprep.mubr.bf16.mxu1 %v10894_v3  ;;  %v76_v38 = vld [vmem:[%s15138_s1 + $0x150] sm:$0xff] }
 0x109   :  { %v8331_v49 = vcombine.low %v52_v37, %v76_v38 }
 0x10a   :  { %3249 = vmatpush1.bf16.msra.mxu0 %v8375_v43  ;;  %3290 = vmatpush1.bf16.msra.mxu1 %v8377_v44  ;;  %v8332_v43 = vcombine.high %v52_v37, %v76_v38  ;;  %v8334_v44 = vcombine.high %v53_v39, %v77_v40  ;;  %v388_v40 = vld [vmem:[%s15138_s1 + $0xb10] sm:$0xff] }
 0x10b   :  { %3250 = vmatprep.subr.bf16.mxu0 %v8424_v45  ;;  %3291 = vmatprep.subr.bf16.mxu1 %v8426_v46  ;;  %v100_v45 = vld [vmem:[%s15138_s1 + $0x210] sm:$0xff] }
 0x10c   :  { %v124_v46 = vld [vmem:[%s15138_s1 + $0x2d0] sm:$0xff] }
 0x10d   :  { %v8379_v57 = vcombine.low %v100_v45, %v124_v46 }
 0x10e   :  { %3251 = vmatpush1.bf16.msra.mxu0 %v8423_v51  ;;  %3292 = vmatpush1.bf16.msra.mxu1 %v8425_v52  ;;  %v8380_v51 = vcombine.high %v100_v45, %v124_v46  ;;  %v8382_v52 = vcombine.high %v101_v47, %v125_v48  ;;  %v413_v45 = vld [vmem:[%s15138_s1 + $0xbd8] sm:$0xff] }
 0x10f   :  { %3252 = vmatprep.subr.bf16.mxu0 %v8472_v53  ;;  %3293 = vmatprep.subr.bf16.mxu1 %v8474_v54  ;;  %v148_v53 = vld [vmem:[%s15138_s1 + $0x390] sm:$0xff] }
 0x110   :  { %v172_v54 = vld [vmem:[%s15138_s1 + $0x450] sm:$0xff] }
 0x111   :  { %v8427_v1 = vcombine.low %v148_v53, %v172_v54 }
 0x112   :  { %3253 = vmatpush1.bf16.msra.mxu0 %v8471_v59  ;;  %3294 = vmatpush1.bf16.msra.mxu1 %v8473_v60  ;;  %v8428_v59 = vcombine.high %v148_v53, %v172_v54  ;;  %v8430_v60 = vcombine.high %v149_v55, %v173_v56  ;;  %v54_v55 = vld [vmem:[%s15138_s1 + $0xa0] sm:$0xff] }
 0x113   :  { %3254 = vmatprep.subr.bf16.mxu0 %v8520_v61  ;;  %3295 = vmatprep.subr.bf16.mxu1 %v8522_v62  ;;  %v196_v61 = vld [vmem:[%s15138_s1 + $0x510] sm:$0xff]  ;;  %v78_v56 = vld [vmem:[%s15138_s1 + $0x160] sm:$0xff] }
 0x114   :  { %v220_v62 = vld [vmem:[%s15138_s1 + $0x5d0] sm:$0xff] }
 0x115   :  { %v8475_v15 = vcombine.low %v196_v61, %v220_v62 }
 0x116   :  { %3255 = vmatpush1.bf16.msra.mxu0 %v8519_v4  ;;  %3296 = vmatpush1.bf16.msra.mxu1 %v8521_v6  ;;  %v8476_v4 = vcombine.high %v196_v61, %v220_v62  ;;  %v8478_v6 = vcombine.high %v197_v63, %v221_v0  ;;  %v8336_v61 = vcombine.high %v54_v55, %v78_v56  ;;  %v102_v63 = vld [vmem:[%s15138_s1 + $0x220] sm:$0xff] }
 0x117   :  { %3256 = vmatprep.subr.bf16.mxu0 %v8568_v7  ;;  %3297 = vmatprep.subr.bf16.mxu1 %v8570_v8  ;;  %v244_v7 = vld [vmem:[%s15138_s1 + $0x690] sm:$0xff]  ;;  %v126_v0 = vld [vmem:[%s15138_s1 + $0x2e0] sm:$0xff] }
 0x118   :  { %v11857_v20 = vpop.f32.mrb[4].mxu0  ;;  %v11865_v24 = vpop.f32.mrb[4].mxu1  ;;  %v268_v8 = vld [vmem:[%s15138_s1 + $0x750] sm:$0xff] }
 0x119   :  { %v11867_v25 = vpop.f32.mrb[5].mxu0  ;;  %v11875_v28 = vpop.f32.mrb[5].mxu1  ;;  %v8523_v26 = vcombine.low %v244_v7, %v268_v8 }
 0x11a   :  { %v2710_v29 = vpop.f32.mrb[6].mxu0  ;;  %3257 = vmatpush1.bf16.msra.mxu0 %v8567_v17  ;;  %v2751_v32 = vpop.f32.mrb[6].mxu1  ;;  %3298 = vmatpush1.bf16.msra.mxu1 %v8569_v18  ;;  %v8524_v17 = vcombine.high %v244_v7, %v268_v8  ;;  %v8526_v18 = vcombine.high %v245_v11, %v269_v13  ;;  %v8384_v7 = vcombine.high %v102_v63, %v126_v0  ;;  %v150_v11 = vld [vmem:[%s15138_s1 + $0x3a0] sm:$0xff] }
 0x11b   :  { %v2711_v12 = vpop.f32.mrb[7].mxu0  ;;  %3258 = vmatprep.subr.bf16.mxu0 %v8616_v19  ;;  %v2752_v35 = vpop.f32.mrb[7].mxu1  ;;  %3299 = vmatprep.subr.bf16.mxu1 %v8618_v21  ;;  %v292_v19 = vld [vmem:[%s15138_s1 + $0x810] sm:$0xff]  ;;  %v174_v13 = vld [vmem:[%s15138_s1 + $0x460] sm:$0xff] }
 0x11c   :  { %v316_v21 = vld [vmem:[%s15138_s1 + $0x8d0] sm:$0xff] }
 0x11d   :  { %v8572_v29 = vcombine.high %v292_v19, %v316_v21  ;;  %v340_v32 = vld [vmem:[%s15138_s1 + $0x990] sm:$0xff]  ;;  %v8571_v35 = vcombine.low %v292_v19, %v316_v21  ;;  %v8432_v19 = vcombine.high %v150_v11, %v174_v13 }
 0x11e   :  { %3259 = vmatpush1.bf16.msra.mxu0 %v8615_v30  ;;  %3300 = vmatpush1.bf16.msra.mxu1 %v8617_v33  ;;  %v8574_v30 = vcombine.high %v293_v22, %v317_v23  ;;  %v364_v12 = vld [vmem:[%s15138_s1 + $0xa50] sm:$0xff]  ;;  %v341_v33 = vld [vmem:[%s15138_s1 + $0x998] sm:$0xff] }
 0x11f   :  { %3260 = vmatprep.subr.bf16.mxu0 %v8664_v34  ;;  %3301 = vmatprep.subr.bf16.mxu1 %v8666_v36  ;;  %v365_v34 = vld [vmem:[%s15138_s1 + $0xa58] sm:$0xff]  ;;  %v8573_v36 = vcombine.low %v293_v22, %v317_v23  ;;  %v8620_v37 = vcombine.high %v340_v32, %v364_v12  ;;  %v8619_v48 = vcombine.low %v340_v32, %v364_v12  ;;  %v198_v22 = vld [vmem:[%s15138_s1 + $0x520] sm:$0xff] }
 0x120   :  { %v8622_v39 = vcombine.high %v341_v33, %v365_v34  ;;  %v222_v23 = vld [vmem:[%s15138_s1 + $0x5e0] sm:$0xff] }
 0x121   :  { %v246_v12 = vld [vmem:[%s15138_s1 + $0x6a0] sm:$0xff] }
 0x122   :  { %3261 = vmatpush1.bf16.msra.mxu0 %v8663_v41  ;;  %3302 = vmatpush1.bf16.msra.mxu1 %v8665_v42  ;;  %v412_v41 = vld [vmem:[%s15138_s1 + $0xbd0] sm:$0xff] }
 0x123   :  { %3328 = vmatprep.subr.bf16.mxu0 %v8332_v43  ;;  %3369 = vmatprep.subr.bf16.mxu1 %v8334_v44  ;;  %v389_v44 = vld [vmem:[%s15138_s1 + $0xb18] sm:$0xff] }
 0x124   :  { %v8670_v54 = vcombine.high %v389_v44, %v413_v45 }
 0x125   :  { %3279 = vmatmul.mubr.bf16.vlgmr.msra.gmra.mrb[32].mxu0 %v11596_v31  ;;  %3320 = vmatmul.mubr.bf16.vlgmr.msra.gmra.mrb[32].mxu1 %v11596_v31 }
 0x126   :  { %3329 = vmatpush1.bf16.msra.mxu0 %v8331_v49  ;;  %3370 = vmatpush1.bf16.msra.mxu1 %v8333_v50 }
 0x127   :  { %3330 = vmatprep.subr.bf16.mxu0 %v8380_v51  ;;  %3371 = vmatprep.subr.bf16.mxu1 %v8382_v52  ;;  %v8621_v51 = vcombine.low %v341_v33, %v365_v34  ;;  %v8668_v52 = vcombine.high %v388_v40, %v412_v41  ;;  %v270_v33 = vld [vmem:[%s15138_s1 + $0x760] sm:$0xff]  ;;  %v247_v34 = vld [vmem:[%s15138_s1 + $0x6a8] sm:$0xff] }
 0x128   :  { %3360 = vmatprep.mubr.bf16.mxu0 %v10894_v3  ;;  %3401 = vmatprep.mubr.bf16.mxu1 %v10894_v3 }
 0x12a   :  { %3331 = vmatpush1.bf16.msra.mxu0 %v8379_v57  ;;  %3372 = vmatpush1.bf16.msra.mxu1 %v8381_v58  ;;  %v55_v57 = vld [vmem:[%s15138_s1 + $0xa8] sm:$0xff] }
 0x12b   :  { %3332 = vmatprep.subr.bf16.mxu0 %v8428_v59  ;;  %3373 = vmatprep.subr.bf16.mxu1 %v8430_v60  ;;  %v79_v58 = vld [vmem:[%s15138_s1 + $0x168] sm:$0xff]  ;;  %v8667_v59 = vcombine.low %v388_v40, %v412_v41  ;;  %v8669_v60 = vcombine.low %v389_v44, %v413_v45  ;;  %v294_v41 = vld [vmem:[%s15138_s1 + $0x820] sm:$0xff] }
 0x12c   :  { %v8338_v62 = vcombine.high %v55_v57, %v79_v58  ;;  %v318_v44 = vld [vmem:[%s15138_s1 + $0x8e0] sm:$0xff]  ;;  %v295_v45 = vld [vmem:[%s15138_s1 + $0x828] sm:$0xff] }
 0x12e   :  { %3333 = vmatpush1.bf16.msra.mxu0 %v8427_v1  ;;  %3374 = vmatpush1.bf16.msra.mxu1 %v8429_v2  ;;  %v103_v1 = vld [vmem:[%s15138_s1 + $0x228] sm:$0xff] }
 0x12f   :  { %3334 = vmatprep.subr.bf16.mxu0 %v8476_v4  ;;  %3375 = vmatprep.subr.bf16.mxu1 %v8478_v6  ;;  %v127_v2 = vld [vmem:[%s15138_s1 + $0x2e8] sm:$0xff]  ;;  %v8335_v4 = vcombine.low %v54_v55, %v78_v56  ;;  %v8337_v6 = vcombine.low %v55_v57, %v79_v58  ;;  %v8575_v56 = vcombine.low %v294_v41, %v318_v44 }
 0x130   :  { %v8386_v8 = vcombine.high %v103_v1, %v127_v2  ;;  %v367_v55 = vld [vmem:[%s15138_s1 + $0xa68] sm:$0xff] }
 0x132   :  { %3335 = vmatpush1.bf16.msra.mxu0 %v8475_v15  ;;  %3376 = vmatpush1.bf16.msra.mxu1 %v8477_v16  ;;  %v151_v15 = vld [vmem:[%s15138_s1 + $0x3a8] sm:$0xff] }
 0x133   :  { %3336 = vmatprep.subr.bf16.mxu0 %v8524_v17  ;;  %3377 = vmatprep.subr.bf16.mxu1 %v8526_v18  ;;  %v175_v16 = vld [vmem:[%s15138_s1 + $0x468] sm:$0xff]  ;;  %v8383_v17 = vcombine.low %v102_v63, %v126_v0  ;;  %v8385_v18 = vcombine.low %v103_v1, %v127_v2 }
 0x134   :  { %v8434_v21 = vcombine.high %v151_v15, %v175_v16  ;;  %v391_v1 = vld [vmem:[%s15138_s1 + $0xb28] sm:$0xff] }
 0x135   :  { %v415_v2 = vld [vmem:[%s15138_s1 + $0xbe8] sm:$0xff] }
 0x136   :  { %3337 = vmatpush1.bf16.msra.mxu0 %v8523_v26  ;;  %3378 = vmatpush1.bf16.msra.mxu1 %v8525_v27  ;;  %v223_v26 = vld [vmem:[%s15138_s1 + $0x5e8] sm:$0xff]  ;;  %v8431_v27 = vcombine.low %v150_v11, %v174_v13 }
 0x137   :  { %3338 = vmatprep.subr.bf16.mxu0 %v8572_v29  ;;  %3379 = vmatprep.subr.bf16.mxu1 %v8574_v30  ;;  %v8433_v29 = vcombine.low %v151_v15, %v175_v16  ;;  %v8480_v30 = vcombine.high %v198_v22, %v222_v23 }
 0x138   :  { %v11965_v38 = vpop.f32.mrb[8].mxu0  ;;  %v11973_v42 = vpop.f32.mrb[8].mxu1 }
 0x139   :  { %v11975_v43 = vpop.f32.mrb[9].mxu0  ;;  %v11983_v46 = vpop.f32.mrb[9].mxu1 }
 0x13a   :  { %v2792_v47 = vpop.f32.mrb[10].mxu0  ;;  %3339 = vmatpush1.bf16.msra.mxu0 %v8571_v35  ;;  %v2833_v49 = vpop.f32.mrb[10].mxu1  ;;  %3380 = vmatpush1.bf16.msra.mxu1 %v8573_v36  ;;  %v271_v35 = vld [vmem:[%s15138_s1 + $0x768] sm:$0xff]  ;;  %v8479_v36 = vcombine.low %v198_v22, %v222_v23  ;;  %v81_v22 = vld [vmem:[%s15138_s1 + $0x178] sm:$0xff] }
 0x13b   :  { %v2793_v50 = vpop.f32.mrb[11].mxu0  ;;  %3340 = vmatprep.subr.bf16.mxu0 %v8620_v37  ;;  %v2834_v53 = vpop.f32.mrb[11].mxu1  ;;  %3381 = vmatprep.subr.bf16.mxu1 %v8622_v39  ;;  %v8528_v39 = vcombine.high %v246_v12, %v270_v33  ;;  %v8530_v40 = vcombine.high %v247_v34, %v271_v35  ;;  %v319_v47 = vld [vmem:[%s15138_s1 + $0x8e8] sm:$0xff]  ;;  %v8529_v49 = vcombine.low %v247_v34, %v271_v35 }
 0x13c   :  { %v8576_v50 = vcombine.high %v294_v41, %v318_v44  ;;  %v366_v53 = vld [vmem:[%s15138_s1 + $0xa60] sm:$0xff]  ;;  %v8577_v57 = vcombine.low %v295_v45, %v319_v47  ;;  %v153_v41 = vld [vmem:[%s15138_s1 + $0x3b8] sm:$0xff] }
 0x13d   :  { %v177_v44 = vld [vmem:[%s15138_s1 + $0x478] sm:$0xff] }
 0x13e   :  { %3341 = vmatpush1.bf16.msra.mxu0 %v8619_v48  ;;  %3382 = vmatpush1.bf16.msra.mxu1 %v8621_v51  ;;  %v8527_v48 = vcombine.low %v246_v12, %v270_v33  ;;  %v8578_v51 = vcombine.high %v295_v45, %v319_v47  ;;  %v129_v12 = vld [vmem:[%s15138_s1 + $0x2f8] sm:$0xff] }
 0x13f   :  { %3342 = vmatprep.subr.bf16.mxu0 %v8668_v52  ;;  %3383 = vmatprep.subr.bf16.mxu1 %v8670_v54  ;;  %v342_v52 = vld [vmem:[%s15138_s1 + $0x9a0] sm:$0xff]  ;;  %v343_v54 = vld [vmem:[%s15138_s1 + $0x9a8] sm:$0xff] }
 0x140   :  { %v8624_v58 = vcombine.high %v342_v52, %v366_v53  ;;  %v8625_v13 = vcombine.low %v343_v54, %v367_v55 }
 0x142   :  { %3343 = vmatpush1.bf16.msra.mxu0 %v8667_v59  ;;  %3384 = vmatpush1.bf16.msra.mxu1 %v8669_v60  ;;  %v8626_v60 = vcombine.high %v343_v54, %v367_v55  ;;  %v8437_v55 = vcombine.low %v153_v41, %v177_v44 }
 0x143   :  { %3410 = vmatprep.subr.bf16.mxu0 %v8336_v61  ;;  %3451 = vmatprep.subr.bf16.mxu1 %v8338_v62  ;;  %v390_v61 = vld [vmem:[%s15138_s1 + $0xb20] sm:$0xff] }
 0x144   :  { %v414_v62 = vld [vmem:[%s15138_s1 + $0xbe0] sm:$0xff] }
 0x145   :  { %3361 = vmatmul.mubr.bf16.vlgmr.msra.gmra.mrb[36].mxu0 %v11596_v31  ;;  %3402 = vmatmul.mubr.bf16.vlgmr.msra.gmra.mrb[36].mxu1 %v11596_v31  ;;  %v199_v31 = vld [vmem:[%s15138_s1 + $0x528] sm:$0xff]  ;;  %v8672_v15 = vcombine.high %v390_v61, %v414_v62  ;;  %v8671_v23 = vcombine.low %v390_v61, %v414_v62  ;;  %v273_v61 = vld [vmem:[%s15138_s1 + $0x778] sm:$0xff] }
 0x146   :  { %3411 = vmatpush1.bf16.msra.mxu0 %v8335_v4  ;;  %3452 = vmatpush1.bf16.msra.mxu1 %v8337_v6  ;;  %v8482_v32 = vcombine.high %v199_v31, %v223_v26  ;;  %v8481_v37 = vcombine.low %v199_v31, %v223_v26  ;;  %v8673_v31 = vcombine.low %v391_v1, %v415_v2 }
 0x147   :  { %3412 = vmatprep.subr.bf16.mxu0 %v8384_v7  ;;  %3453 = vmatprep.subr.bf16.mxu1 %v8386_v8  ;;  %v8623_v7 = vcombine.low %v342_v52, %v366_v53  ;;  %v201_v52 = vld [vmem:[%s15138_s1 + $0x538] sm:$0xff] }
 0x148   :  { %3442 = vmatprep.mubr.bf16.mxu0 %v10894_v3  ;;  %3483 = vmatprep.mubr.bf16.mxu1 %v10894_v3  ;;  %v225_v53 = vld [vmem:[%s15138_s1 + $0x5f8] sm:$0xff] }
 0x14a   :  { %3413 = vmatpush1.bf16.msra.mxu0 %v8383_v17  ;;  %3454 = vmatpush1.bf16.msra.mxu1 %v8385_v18  ;;  %v8674_v17 = vcombine.high %v391_v1, %v415_v2  ;;  %v56_v18 = vld [vmem:[%s15138_s1 + $0xb0] sm:$0xff]  ;;  %v8485_v1 = vcombine.low %v201_v52, %v225_v53 }
 0x14b   :  { %3414 = vmatprep.subr.bf16.mxu0 %v8432_v19  ;;  %3455 = vmatprep.subr.bf16.mxu1 %v8434_v21  ;;  %v80_v19 = vld [vmem:[%s15138_s1 + $0x170] sm:$0xff]  ;;  %v57_v21 = vld [vmem:[%s15138_s1 + $0xb8] sm:$0xff] }
 0x14c   :  { %v8340_v26 = vcombine.high %v56_v18, %v80_v19  ;;  %v8339_v33 = vcombine.low %v56_v18, %v80_v19  ;;  %v8341_v34 = vcombine.low %v57_v21, %v81_v22  ;;  %v344_v19 = vld [vmem:[%s15138_s1 + $0x9b0] sm:$0xff] }
 0x14e   :  { %3415 = vmatpush1.bf16.msra.mxu0 %v8431_v27  ;;  %3456 = vmatpush1.bf16.msra.mxu1 %v8433_v29  ;;  %v8342_v27 = vcombine.high %v57_v21, %v81_v22  ;;  %v104_v29 = vld [vmem:[%s15138_s1 + $0x230] sm:$0xff]  ;;  %v430_v22 = vlaneseq }
 0x14f   :  { %3416 = vmatprep.subr.bf16.mxu0 %v8480_v30  ;;  %3457 = vmatprep.subr.bf16.mxu1 %v8482_v32  ;;  %v128_v30 = vld [vmem:[%s15138_s1 + $0x2f0] sm:$0xff]  ;;  %v105_v32 = vld [vmem:[%s15138_s1 + $0x238] sm:$0xff] }
 0x150   :  { %v8388_v35 = vcombine.high %v104_v29, %v128_v30  ;;  %v8387_v45 = vcombine.low %v104_v29, %v128_v30  ;;  %v8389_v47 = vcombine.low %v105_v32, %v129_v12  ;;  %v368_v21 = vld [vmem:[%s15138_s1 + $0xa70] sm:$0xff] }
 0x151   :  { %v8628_v29 = vcombine.high %v344_v19, %v368_v21 }
 0x152   :  { %3417 = vmatpush1.bf16.msra.mxu0 %v8479_v36  ;;  %3458 = vmatpush1.bf16.msra.mxu1 %v8481_v37  ;;  %v8390_v36 = vcombine.high %v105_v32, %v129_v12  ;;  %v152_v37 = vld [vmem:[%s15138_s1 + $0x3b0] sm:$0xff] }
 0x153   :  { %3418 = vmatprep.subr.bf16.mxu0 %v8528_v39  ;;  %3459 = vmatprep.subr.bf16.mxu1 %v8530_v40  ;;  %v176_v39 = vld [vmem:[%s15138_s1 + $0x470] sm:$0xff]  ;;  %v12126_v40 = vld [vmem:[%s15139_s0] sm:$0xf] }
 0x154   :  { %v8435_v54 = vcombine.low %v152_v37, %v176_v39  ;;  %v392_v12 = vld [vmem:[%s15138_s1 + $0xb30] sm:$0xff] }
 0x156   :  { %3419 = vmatpush1.bf16.msra.mxu0 %v8527_v48  ;;  %3460 = vmatpush1.bf16.msra.mxu1 %v8529_v49  ;;  %v8436_v48 = vcombine.high %v152_v37, %v176_v39  ;;  %v8438_v49 = vcombine.high %v153_v41, %v177_v44  ;;  %v393_v37 = vld [vmem:[%s15138_s1 + $0xb38] sm:$0xff] }
 0x157   :  { %3420 = vmatprep.subr.bf16.mxu0 %v8576_v50  ;;  %3461 = vmatprep.subr.bf16.mxu1 %v8578_v51  ;;  %v200_v50 = vld [vmem:[%s15138_s1 + $0x530] sm:$0xff]  ;;  %v417_v39 = vld [vmem:[%s15138_s1 + $0xbf8] sm:$0xff] }
 0x158   :  { %v12073_v59 = vpop.f32.mrb[12].mxu0  ;;  %v12081_v63 = vpop.f32.mrb[12].mxu1  ;;  %v224_v51 = vld [vmem:[%s15138_s1 + $0x5f0] sm:$0xff] }
 0x159   :  { %v12083_v0 = vpop.f32.mrb[13].mxu0  ;;  %v12091_v4 = vpop.f32.mrb[13].mxu1  ;;  %v8483_v62 = vcombine.low %v200_v50, %v224_v51 }
 0x15a   :  { %v2874_v6 = vpop.f32.mrb[14].mxu0  ;;  %3421 = vmatpush1.bf16.msra.mxu0 %v8575_v56  ;;  %v2915_v8 = vpop.f32.mrb[14].mxu1  ;;  %3462 = vmatpush1.bf16.msra.mxu1 %v8577_v57  ;;  %v8484_v56 = vcombine.high %v200_v50, %v224_v51  ;;  %v8486_v57 = vcombine.high %v201_v52, %v225_v53  ;;  %v8678_v52 = vcombine.high %v393_v37, %v417_v39  ;;  %v3590_v53 = vld [vmem:[%s15140_s5 + $0x80] sm:$0xff] }
 0x15b   :  { %v2875_v11 = vpop.f32.mrb[15].mxu0  ;;  %3422 = vmatprep.subr.bf16.mxu0 %v8624_v58  ;;  %v2916_v16 = vpop.f32.mrb[15].mxu1  ;;  %3463 = vmatprep.subr.bf16.mxu1 %v8626_v60  ;;  %v248_v58 = vld [vmem:[%s15138_s1 + $0x6b0] sm:$0xff] }
 0x15c   :  { %v272_v60 = vld [vmem:[%s15138_s1 + $0x770] sm:$0xff]  ;;  %v297_v11 = vld [vmem:[%s15138_s1 + $0x838] sm:$0xff] }
 0x15d   :  { %v8532_v2 = vcombine.high %v248_v58, %v272_v60  ;;  %v320_v8 = vld [vmem:[%s15138_s1 + $0x8f0] sm:$0xff] }
 0x15e   :  { %3423 = vmatpush1.bf16.msra.mxu0 %v8623_v7  ;;  %3464 = vmatpush1.bf16.msra.mxu1 %v8625_v13  ;;  %v296_v7 = vld [vmem:[%s15138_s1 + $0x830] sm:$0xff]  ;;  %v321_v13 = vld [vmem:[%s15138_s1 + $0x8f8] sm:$0xff] }
 0x15f   :  { %3424 = vmatprep.subr.bf16.mxu0 %v8672_v15  ;;  %3465 = vmatprep.subr.bf16.mxu1 %v8674_v17  ;;  %v8531_v15 = vcombine.low %v248_v58, %v272_v60  ;;  %v8580_v17 = vcombine.high %v296_v7, %v320_v8  ;;  %v8582_v18 = vcombine.high %v297_v11, %v321_v13  ;;  %v12226_v58 = vld [vmem:[%s15141_s2] sm:$0xff] }
 0x162   :  { %3425 = vmatpush1.bf16.msra.mxu0 %v8671_v23  ;;  %3466 = vmatpush1.bf16.msra.mxu1 %v8673_v31  ;;  %v345_v23 = vld [vmem:[%s15138_s1 + $0x9b8] sm:$0xff] }
 0x163   :  { %3492 = vmatprep.subr.bf16.mxu0 %v8340_v26  ;;  %3533 = vmatprep.subr.bf16.mxu1 %v8342_v27  ;;  %v369_v31 = vld [vmem:[%s15138_s1 + $0xa78] sm:$0xff]  ;;  %v8579_v26 = vcombine.low %v296_v7, %v320_v8  ;;  %v8581_v27 = vcombine.low %v297_v11, %v321_v13  ;;  %v3606_v7 = vld [vmem:[%s15140_s5 + $0x100] sm:$0xff]  ;;  %v3607_v8 = vld [vmem:[%s15140_s5 + $0x108] sm:$0xff] }
 0x164   :  { %v8630_v32 = vcombine.high %v345_v23, %v369_v31  ;;  %v3592_v13 = vld [vmem:[%s15140_s5 + $0x90] sm:$0xff] }
 0x165   :  { %3443 = vmatmul.mubr.bf16.vlgmr.msra.gmra.mrb[40].mxu0 %v12126_v40  ;;  %3484 = vmatmul.mubr.bf16.vlgmr.msra.gmra.mrb[40].mxu1 %v12126_v40 }
 0x166   :  { %3493 = vmatpush1.bf16.msra.mxu0 %v8339_v33  ;;  %3534 = vmatpush1.bf16.msra.mxu1 %v8341_v34  ;;  %v416_v33 = vld [vmem:[%s15138_s1 + $0xbf0] sm:$0xff]  ;;  %v12194_v34 = vshrl.u32 %v430_v22, 7 }
 0x167   :  { %3494 = vmatprep.subr.bf16.mxu0 %v8388_v35  ;;  %3535 = vmatprep.subr.bf16.mxu1 %v8390_v36  ;;  %v8676_v50 = vcombine.high %v392_v12, %v416_v33  ;;  %v3576_v22 = vld [vmem:[%s15140_s5 + $0x10] sm:$0xff] }
 0x168   :  { %3524 = vmatprep.mubr.bf16.mxu0 %v10894_v3  ;;  %3565 = vmatprep.mubr.bf16.mxu1 %v10894_v3  ;;  %v249_v3 = vld [vmem:[%s15138_s1 + $0x6b8] sm:$0xff]  ;;  %v12229_v60 = vsub.s32 3, %v12194_v34 }
 0x169   :  { %v8534_v6 = vcombine.high %v249_v3, %v273_v61  ;;  %v8533_v16 = vcombine.low %v249_v3, %v273_v61  ;;  %v8675_v3 = vcombine.low %v392_v12, %v416_v33  ;;  %v8677_v61 = vcombine.low %v393_v37, %v417_v39  ;;  %v3626_v37 = vld [vmem:[%s15140_s5 + $0x1a0] sm:$0xff]  ;;  %v3627_v39 = vld [vmem:[%s15140_s5 + $0x1a8] sm:$0xff] }
 0x16a   :  { %3495 = vmatpush1.bf16.msra.mxu0 %v8387_v45  ;;  %3536 = vmatpush1.bf16.msra.mxu1 %v8389_v47  ;;  %v8627_v45 = vcombine.low %v344_v19, %v368_v21  ;;  %v3625_v19 = vld [vmem:[%s15140_s5 + $0x198] sm:$0xff]  ;;  %v12266_v21 = vpack.c.bf16 %v3607_v8, %v3606_v7 }
 0x16b   :  { %3496 = vmatprep.subr.bf16.mxu0 %v8436_v48  ;;  %3537 = vmatprep.subr.bf16.mxu1 %v8438_v49  ;;  %v8629_v49 = vcombine.low %v345_v23, %v369_v31  ;;  %v3577_v23 = vld [vmem:[%s15140_s5 + $0x18] sm:$0xff]  ;;  %v3608_v31 = vld [vmem:[%s15140_s5 + $0x110] sm:$0xff] }
 0x16c   :  { %v3613_v8 = vld [vmem:[%s15140_s5 + $0x138] sm:$0xff] }
 0x16e   :  { %3497 = vmatpush1.bf16.msra.mxu0 %v8435_v54  ;;  %3538 = vmatpush1.bf16.msra.mxu1 %v8437_v55  ;;  %v3591_v54 = vld [vmem:[%s15140_s5 + $0x88] sm:$0xff]  ;;  %v12215_v55 = vsub.s32 1, %v12194_v34 }
 0x16f   :  { %3498 = vmatprep.subr.bf16.mxu0 %v8484_v56  ;;  %3539 = vmatprep.subr.bf16.mxu1 %v8486_v57  ;;  %v3622_v56 = vld [vmem:[%s15140_s5 + $0x180] sm:$0xff]  ;;  %v3623_v57 = vld [vmem:[%s15140_s5 + $0x188] sm:$0xff] }
 0x170   :  { %v437_v11 = vrot.slane %v12226_v58, %v12215_v55 }
 0x172   :  { %3499 = vmatpush1.bf16.msra.mxu0 %v8483_v62  ;;  %3540 = vmatpush1.bf16.msra.mxu1 %v8485_v1  ;;  %v12231_v62 = vpack.c.bf16 %v3591_v54, %v3590_v53  ;;  %v3574_v1 = vld [vmem:[%s15140_s5] sm:$0xff]  ;;  %v12290_v12 = vadd.f32 %v11759_v10, %v437_v11  ;;  %v12306_v10 = vpack.c.bf16 %v3577_v23, %v3576_v22  ;;  %v3628_v53 = vld [vmem:[%s15140_s5 + $0x1b0] sm:$0xff]  ;;  %v3629_v54 = vld [vmem:[%s15140_s5 + $0x1b8] sm:$0xff] }
 0x173   :  { %3500 = vmatprep.subr.bf16.mxu0 %v8532_v2  ;;  %3541 = vmatprep.subr.bf16.mxu1 %v8534_v6  ;;  %v3575_v2 = vld [vmem:[%s15140_s5 + $0x8] sm:$0xff]  ;;  %v12239_v6 = vpack.c.bf16 %v3623_v57, %v3622_v56  ;;  %v12362_v7 = vpack.c.bf16 %v3629_v54, %v3628_v53  ;;  %v3598_v11 = vld [vmem:[%s15140_s5 + $0xc0] sm:$0xff]  ;;  %v3585_v53 = vld [vmem:[%s15140_s5 + $0x58] sm:$0xff] }
 0x174   :  { %15548 = vst [vmem:[#allocation4_spill] sm:$0xff] %v12290_v12  ;;  %v3582_v23 = vld [vmem:[%s15140_s5 + $0x40] sm:$0xff]  ;;  %v3616_v54 = vld [vmem:[%s15140_s5 + $0x150] sm:$0xff] }
 0x176   :  { %3501 = vmatpush1.bf16.msra.mxu0 %v8531_v15  ;;  %3542 = vmatpush1.bf16.msra.mxu1 %v8533_v16  ;;  %v3593_v15 = vld [vmem:[%s15140_s5 + $0x98] sm:$0xff]  ;;  %v445_v16 = vrot.slane %v12226_v58, %v12229_v60 }
 0x177   :  { %3502 = vmatprep.subr.bf16.mxu0 %v8580_v17  ;;  %3543 = vmatprep.subr.bf16.mxu1 %v8582_v18  ;;  %v12257_v17 = vpack.c.bf16 %v3575_v2, %v3574_v1  ;;  %v3624_v18 = vld [vmem:[%s15140_s5 + $0x190] sm:$0xff]  ;;  %v3581_v1 = vld [vmem:[%s15140_s5 + $0x38] sm:$0xff] }
 0x178   :  { %v12186_v30 = vpop.f32.mrb[16].mxu0  ;;  %v12196_v35 = vpop.f32.mrb[16].mxu1  ;;  %v12293_v33 = vpack.c.bf16 %v3625_v19, %v3624_v18  ;;  %v3612_v2 = vld [vmem:[%s15140_s5 + $0x130] sm:$0xff] }
 0x179   :  { %15546 = vst [vmem:[#allocation2_spill] sm:$0xff] %v12186_v30  ;;  %15547 = vst [vmem:[#allocation3_spill] sm:$0xff] %v12196_v35  ;;  %v12198_v36 = vpop.f32.mrb[17].mxu0  ;;  %v12206_v41 = vpop.f32.mrb[17].mxu1  ;;  %v12384_v19 = vpack.c.bf16 %v3613_v8, %v3612_v2  ;;  %v3617_v2 = vld [vmem:[%s15140_s5 + $0x158] sm:$0xff]  ;;  %v3602_v8 = vld [vmem:[%s15140_s5 + $0xe0] sm:$0xff] }
 0x17a   :  { %v2956_v44 = vpop.f32.mrb[18].mxu0  ;;  %3503 = vmatpush1.bf16.msra.mxu0 %v8579_v26  ;;  %v2997_v47 = vpop.f32.mrb[18].mxu1  ;;  %3544 = vmatpush1.bf16.msra.mxu1 %v8581_v27  ;;  %v12278_v26 = vpack.c.bf16 %v3593_v15, %v3592_v13  ;;  %v3609_v27 = vld [vmem:[%s15140_s5 + $0x118] sm:$0xff]  ;;  %v3599_v13 = vld [vmem:[%s15140_s5 + $0xc8] sm:$0xff]  ;;  %v3630_v15 = vld [vmem:[%s15140_s5 + $0x1c0] sm:$0xff]  ;;  %v12506_v35 = vsub.s32 0, %v12194_v34 }
 0x17b   :  { %v2957_v48 = vpop.f32.mrb[19].mxu0  ;;  %3504 = vmatprep.subr.bf16.mxu0 %v8628_v29  ;;  %v2998_v51 = vpop.f32.mrb[19].mxu1  ;;  %3545 = vmatprep.subr.bf16.mxu1 %v8630_v32  ;;  %v3594_v29 = vld [vmem:[%s15140_s5 + $0xa0] sm:$0xff]  ;;  %v3595_v32 = vld [vmem:[%s15140_s5 + $0xa8] sm:$0xff]  ;;  %v12302_v44 = vadd.f32 %v11767_v14, %v445_v16  ;;  %15550 = vst [vmem:[#allocation6_spill] sm:$0xff] %v12384_v19  ;;  %v12386_v22 = vpack.c.bf16 %v3599_v13, %v3598_v11  ;;  %v420_v13 = vld [vmem:[%s15141_s2 + $0x10] sm:$0xff] }
 0x17c   :  { %v12312_v47 = vpack.c.bf16 %v3595_v32, %v3594_v29  ;;  %v3578_v48 = vld [vmem:[%s15140_s5 + $0x20] sm:$0xff]  ;;  %v3579_v14 = vld [vmem:[%s15140_s5 + $0x28] sm:$0xff]  ;;  %v3596_v51 = vld [vmem:[%s15140_s5 + $0xb0] sm:$0xff] }
 0x17d   :  { %15549 = vst [vmem:[#allocation5_spill] sm:$0xff] %v12302_v44  ;;  %v12344_v56 = vpack.c.bf16 %v3579_v14, %v3578_v48  ;;  %v3631_v16 = vld [vmem:[%s15140_s5 + $0x1c8] sm:$0xff]  ;;  %15551 = vst [vmem:[#allocation7_spill] sm:$0xff] %v12386_v22  ;;  %v3632_v48 = vld [vmem:[%s15140_s5 + $0x1d0] sm:$0xff] }
 0x17e   :  { %3505 = vmatpush1.bf16.msra.mxu0 %v8627_v45  ;;  %3546 = vmatpush1.bf16.msra.mxu1 %v8629_v49  ;;  %v12310_v45 = vpack.c.bf16 %v3609_v27, %v3608_v31  ;;  %v12325_v49 = vpack.c.bf16 %v3627_v39, %v3626_v37  ;;  %v3583_v31 = vld [vmem:[%s15140_s5 + $0x48] sm:$0xff]  ;;  %v3614_v27 = vld [vmem:[%s15140_s5 + $0x140] sm:$0xff]  ;;  %v12398_v29 = vpack.c.bf16 %v3631_v16, %v3630_v15  ;;  %v3600_v37 = vld [vmem:[%s15140_s5 + $0xd0] sm:$0xff] }
 0x17f   :  { %3506 = vmatprep.subr.bf16.mxu0 %v8676_v50  ;;  %3547 = vmatprep.subr.bf16.mxu1 %v8678_v52  ;;  %v3611_v50 = vld [vmem:[%s15140_s5 + $0x128] sm:$0xff]  ;;  %v3597_v52 = vld [vmem:[%s15140_s5 + $0xb8] sm:$0xff]  ;;  %v3634_v15 = vld [vmem:[%s15140_s5 + $0x1e0] sm:$0xff] }
 0x180   :  { %15552 = vst [vmem:[#allocation8_spill] sm:$0xff] %v12398_v29  ;;  %v3615_v32 = vld [vmem:[%s15140_s5 + $0x148] sm:$0xff]  ;;  %v3601_v39 = vld [vmem:[%s15140_s5 + $0xd8] sm:$0xff] }
 0x181   :  { %v3633_v14 = vld [vmem:[%s15140_s5 + $0x1d8] sm:$0xff]  ;;  %v3603_v11 = vld [vmem:[%s15140_s5 + $0xe8] sm:$0xff] }
 0x182   :  { %3507 = vmatpush1.bf16.msra.mxu0 %v8675_v3  ;;  %3548 = vmatpush1.bf16.msra.mxu1 %v8677_v61  ;;  %v12350_v3 = vpack.c.bf16 %v3597_v52, %v3596_v51  ;;  %v3580_v61 = vld [vmem:[%s15140_s5 + $0x30] sm:$0xff]  ;;  %v12422_v51 = vpack.c.bf16 %v3601_v39, %v3600_v37  ;;  %v3635_v16 = vld [vmem:[%s15140_s5 + $0x1e8] sm:$0xff]  ;;  %v3586_v37 = vld [vmem:[%s15140_s5 + $0x60] sm:$0xff] }
 0x183   :  { %9685 = vmatprep.subr.bf16.mxu0 %v12231_v62  ;;  %9717 = vmatprep.subr.bf16.mxu1 %v12239_v6  ;;  %v12380_v18 = vpack.c.bf16 %v3581_v1, %v3580_v61  ;;  %v3584_v52 = vld [vmem:[%s15140_s5 + $0x50] sm:$0xff]  ;;  %v12434_v61 = vsub.s32 6, %v12194_v34  ;;  %v12437_v1 = vpack.c.bf16 %v3633_v14, %v3632_v48  ;;  %v3587_v39 = vld [vmem:[%s15140_s5 + $0x68] sm:$0xff]  ;;  %v3618_v48 = vld [vmem:[%s15140_s5 + $0x160] sm:$0xff] }
 0x184   :  { %15555 = vst [vmem:[#allocation11_spill] sm:$0xff] %v12422_v51 }
 0x185   :  { %3525 = vmatmul.mubr.bf16.vlgmr.msra.gmra.mrb[44].mxu0 %v12126_v40  ;;  %3566 = vmatmul.mubr.bf16.vlgmr.msra.gmra.mrb[44].mxu1 %v12126_v40  ;;  %v3610_v40 = vld [vmem:[%s15140_s5 + $0x120] sm:$0xff]  ;;  %15556 = vst [vmem:[#allocation12_spill] sm:$0xff] %v12434_v61  ;;  %15557 = vst [vmem:[#allocation13_spill] sm:$0xff] %v12437_v1 }
 0x186   :  { %9687 = vmatpush3.bf16.msra.mxu0 %v12257_v17  ;;  %4032 = vmatprep.mubr.f32.mxu0 %v12290_v12  ;;  %v12348_v57 = vpack.c.bf16 %v3611_v50, %v3610_v40  ;;  %v12416_v40 = vpack.c.bf16 %v3583_v31, %v3582_v23  ;;  %v12420_v50 = vpack.c.bf16 %v3615_v32, %v3614_v27 }
 0x187   :  { %9719 = vmatpush3.bf16.msra.mxu1 %v12266_v21  ;;  %4102 = vmatprep.mubr.f32.mxu1 %v12302_v44  ;;  %v521_v23 = vrot.slane %v420_v13, %v12434_v61  ;;  %v12459_v31 = vpack.c.bf16 %v3585_v53, %v3584_v52  ;;  %v12463_v27 = vpack.c.bf16 %v3617_v2, %v3616_v54  ;;  %v3619_v53 = vld [vmem:[%s15140_s5 + $0x168] sm:$0xff]  ;;  %v3604_v54 = vld [vmem:[%s15140_s5 + $0xf0] sm:$0xff]  ;;  %v3605_v2 = vld [vmem:[%s15140_s5 + $0xf8] sm:$0xff] }
 0x188   :  { %9689 = vmatprep.subr.bf16.mxu0 %v12278_v26  ;;  %9721 = vmatprep.subr.bf16.mxu1 %v12293_v33  ;;  %15553 = vst [vmem:[#allocation9_spill] sm:$0xff] %v12416_v40  ;;  %15554 = vst [vmem:[#allocation10_spill] sm:$0xff] %v12420_v50  ;;  %v12465_v32 = vpack.c.bf16 %v3603_v11, %v3602_v8  ;;  %v12479_v52 = vpack.c.bf16 %v3635_v16, %v3634_v15  ;;  %v3636_v13 = vld [vmem:[%s15140_s5 + $0x1f0] sm:$0xff]  ;;  %v3637_v15 = vld [vmem:[%s15140_s5 + $0x1f8] sm:$0xff] }
 0x189   :  { %15558 = vst [vmem:[#allocation14_spill] sm:$0xff] %v12459_v31  ;;  %15559 = vst [vmem:[#allocation15_spill] sm:$0xff] %v12463_v27 }
 0x18a   :  { %9691 = vmatpush3.bf16.msra.mxu0 %v12306_v10  ;;  %15560 = vst [vmem:[#allocation16_spill] sm:$0xff] %v12465_v32  ;;  %15562 = vst [vmem:[#allocation18_spill] sm:$0xff] %v12479_v52 }
 0x18b   :  { %9723 = vmatpush3.bf16.msra.mxu1 %v12310_v45  ;;  %9693 = vmatprep.subr.bf16.mxu0 %v12312_v47 }
 0x18c   :  { %9725 = vmatprep.subr.bf16.mxu1 %v12325_v49 }
 0x18e   :  { %9695 = vmatpush3.bf16.msra.mxu0 %v12344_v56 }
 0x18f   :  { %9727 = vmatpush3.bf16.msra.mxu1 %v12348_v57  ;;  %9697 = vmatprep.subr.bf16.mxu0 %v12350_v3 }
 0x190   :  { %9729 = vmatprep.subr.bf16.mxu1 %v12362_v7 }
 0x192   :  { %9699 = vmatpush3.bf16.msra.mxu0 %v12380_v18 }
 0x193   :  { %9731 = vmatpush3.bf16.msra.mxu1 %v12384_v19  ;;  %9701 = vmatprep.subr.bf16.mxu0 %v12386_v22 }
 0x194   :  { %9733 = vmatprep.subr.bf16.mxu1 %v12398_v29 }
 0x196   :  { %9703 = vmatpush3.bf16.msra.mxu0 %v12416_v40 }
 0x197   :  { %9735 = vmatpush3.bf16.msra.mxu1 %v12420_v50  ;;  %9705 = vmatprep.subr.bf16.mxu0 %v12422_v51 }
 0x198   :  { %v12476_v14 = vpop.f32.mrb[20].mxu0  ;;  %9737 = vmatprep.subr.bf16.mxu1 %v12437_v1  ;;  %v3075_v8 = vpop.f32.mrb[20].mxu1  ;;  %v12510_v1 = vpack.c.bf16 %v3619_v53, %v3618_v48  ;;  %v12527_v48 = vpack.c.bf16 %v3637_v15, %v3636_v13  ;;  %v3621_v53 = vld [vmem:[%s15140_s5 + $0x178] sm:$0xff]  ;;  %v3686_v13 = vld [vmem:[%s15140_s5 + $0x380] sm:$0xff]  ;;  %v3687_v15 = vld [vmem:[%s15140_s5 + $0x388] sm:$0xff] }
 0x199   :  { %15561 = vst [vmem:[#allocation17_spill] sm:$0xff] %v12476_v14  ;;  %v12490_v11 = vpop.f32.mrb[21].mxu0  ;;  %v12498_v16 = vadd.f32 %v3075_v8, %v521_v23  ;;  %v12500_v44 = vpop.f32.mrb[21].mxu1  ;;  %v12503_v14 = vpack.c.bf16 %v3587_v39, %v3586_v37  ;;  %v12512_v23 = vpack.c.bf16 %v3605_v2, %v3604_v54  ;;  %v3589_v37 = vld [vmem:[%s15140_s5 + $0x78] sm:$0xff]  ;;  %v3620_v39 = vld [vmem:[%s15140_s5 + $0x170] sm:$0xff]  ;;  %v3654_v54 = vld [vmem:[%s15140_s5 + $0x280] sm:$0xff] }
 0x19a   :  { %15563 = vst [vmem:[#allocation19_spill] sm:$0xff] %v12490_v11  ;;  %15565 = vst [vmem:[#allocation21_spill] sm:$0xff] %v12500_v44  ;;  %v3038_v12 = vpop.f32.mrb[22].mxu0  ;;  %9707 = vmatpush3.bf16.msra.mxu0 %v12459_v31  ;;  %v3079_v11 = vpop.f32.mrb[22].mxu1  ;;  %v3655_v2 = vld [vmem:[%s15140_s5 + $0x288] sm:$0xff]  ;;  %v433_v44 = vrot.slane %v12226_v58, %v12506_v35 }
 0x19b   :  { %15564 = vst [vmem:[#allocation20_spill] sm:$0xff] %v12498_v16  ;;  %15566 = vst [vmem:[#allocation22_spill] sm:$0xff] %v12503_v14  ;;  %9739 = vmatpush3.bf16.msra.mxu1 %v12463_v27  ;;  %v3039_v30 = vpop.f32.mrb[23].mxu0  ;;  %9709 = vmatprep.subr.bf16.mxu0 %v12465_v32  ;;  %v3588_v12 = vld [vmem:[%s15140_s5 + $0x70] sm:$0xff]  ;;  %v3080_v8 = vpop.f32.mrb[23].mxu1  ;;  %v12539_v11 = vsub.s32 5, %v12194_v34  ;;  %v12559_v32 = vpack.c.bf16 %v3655_v2, %v3654_v54 }
 0x19c   :  { %15567 = vst [vmem:[#allocation23_spill] sm:$0xff] %v12510_v1  ;;  %15568 = vst [vmem:[#allocation24_spill] sm:$0xff] %v12512_v23  ;;  %v12524_v30 = vsub.s32 2, %v12194_v34  ;;  %9741 = vmatprep.subr.bf16.mxu1 %v12479_v52  ;;  %v12548_v8 = vsub.s32 7, %v12194_v34  ;;  %v12551_v16 = vpack.c.bf16 %v3589_v37, %v3588_v12  ;;  %v12557_v52 = vpack.c.bf16 %v3621_v53, %v3620_v39  ;;  %v3638_v27 = vld [vmem:[%s15140_s5 + $0x200] sm:$0xff]  ;;  %v3639_v12 = vld [vmem:[%s15140_s5 + $0x208] sm:$0xff] }
 0x19d   :  { %15569 = vst [vmem:[#allocation25_spill] sm:$0xff] %v12527_v48  ;;  %15572 = vst [vmem:[#allocation28_spill] sm:$0xff] %v12559_v32  ;;  %v3670_v39 = vld [vmem:[%s15140_s5 + $0x300] sm:$0xff]  ;;  %v3671_v53 = vld [vmem:[%s15140_s5 + $0x308] sm:$0xff]  ;;  %v453_v54 = vrot.slane %v12226_v58, %v12539_v11  ;;  %v12598_v31 = vadd.f32 %v11749_v5, %v433_v44 }
 0x19e   :  { %9711 = vmatpush3.bf16.msra.mxu0 %v12503_v14  ;;  %15570 = vst [vmem:[#allocation26_spill] sm:$0xff] %v12551_v16  ;;  %15571 = vst [vmem:[#allocation27_spill] sm:$0xff] %v12557_v52  ;;  %v441_v37 = vrot.slane %v12226_v58, %v12524_v30  ;;  %v3656_v2 = vld [vmem:[%s15140_s5 + $0x290] sm:$0xff]  ;;  %v3689_v14 = vld [vmem:[%s15140_s5 + $0x398] sm:$0xff]  ;;  %v12602_v51 = vpack.c.bf16 %v3671_v53, %v3670_v39 }
 0x19f   :  { %9743 = vmatpush3.bf16.msra.mxu1 %v12510_v1  ;;  %9713 = vmatprep.subr.bf16.mxu0 %v12512_v23  ;;  %v12570_v1 = vpack.c.bf16 %v3687_v15, %v3686_v13  ;;  %v3657_v13 = vld [vmem:[%s15140_s5 + $0x298] sm:$0xff]  ;;  %v461_v15 = vrot.slane %v12226_v58, %v12548_v8  ;;  %v3688_v23 = vld [vmem:[%s15140_s5 + $0x390] sm:$0xff]  ;;  %15573 = vst [vmem:[#allocation29_spill] sm:$0xff] %v12598_v31  ;;  %v3658_v53 = vld [vmem:[%s15140_s5 + $0x2a0] sm:$0xff] }
 0x1a0   :  { %9745 = vmatprep.subr.bf16.mxu1 %v12527_v48  ;;  %v12589_v48 = vpack.c.bf16 %v3639_v12, %v3638_v27  ;;  %v3640_v27 = vld [vmem:[%s15140_s5 + $0x210] sm:$0xff]  ;;  %v3641_v12 = vld [vmem:[%s15140_s5 + $0x218] sm:$0xff]  ;;  %v12614_v5 = vadd.f32 %v11757_v9, %v441_v37  ;;  %v12617_v44 = vpack.c.bf16 %v3657_v13, %v3656_v2  ;;  %v12632_v9 = vpack.c.bf16 %v3689_v14, %v3688_v23  ;;  %v3690_v37 = vld [vmem:[%s15140_s5 + $0x3a0] sm:$0xff] }
 0x1a1   :  { %v3673_v39 = vld [vmem:[%s15140_s5 + $0x318] sm:$0xff]  ;;  %v3691_v2 = vld [vmem:[%s15140_s5 + $0x3a8] sm:$0xff]  ;;  %v12641_v13 = vadd.f32 %v11875_v28, %v461_v15  ;;  %v3674_v15 = vld [vmem:[%s15140_s5 + $0x320] sm:$0xff] }
 0x1a2   :  { %9715 = vmatpush3.bf16.msra.mxu0 %v12551_v16  ;;  %v3672_v16 = vld [vmem:[%s15140_s5 + $0x310] sm:$0xff]  ;;  %15574 = vst [vmem:[#allocation30_spill] sm:$0xff] %v12614_v5  ;;  %15575 = vst [vmem:[#allocation31_spill] sm:$0xff] %v12617_v44  ;;  %v3643_v28 = vld [vmem:[%s15140_s5 + $0x228] sm:$0xff] }
 0x1a3   :  { %9747 = vmatpush3.bf16.msra.mxu1 %v12557_v52  ;;  %9749 = vmatprep.subr.bf16.mxu0 %v12559_v32  ;;  %v3659_v32 = vld [vmem:[%s15140_s5 + $0x2a8] sm:$0xff]  ;;  %v12629_v52 = vadd.f32 %v11867_v25, %v453_v54  ;;  %15577 = vst [vmem:[#allocation33_spill] sm:$0xff] %v12632_v9  ;;  %15578 = vst [vmem:[#allocation34_spill] sm:$0xff] %v12641_v13  ;;  %v12645_v25 = vpack.c.bf16 %v3641_v12, %v3640_v27  ;;  %v3642_v54 = vld [vmem:[%s15140_s5 + $0x220] sm:$0xff] }
 0x1a4   :  { %9781 = vmatprep.subr.bf16.mxu1 %v12570_v1  ;;  %v12649_v14 = vpack.c.bf16 %v3673_v39, %v3672_v16  ;;  %v12651_v23 = vpack.c.bf16 %v3659_v32, %v3658_v53  ;;  %v12664_v16 = vpack.c.bf16 %v3691_v2, %v3690_v37  ;;  %v3675_v32 = vld [vmem:[%s15140_s5 + $0x328] sm:$0xff]  ;;  %v3660_v27 = vld [vmem:[%s15140_s5 + $0x2b0] sm:$0xff]  ;;  %v3661_v12 = vld [vmem:[%s15140_s5 + $0x2b8] sm:$0xff]  ;;  %v12683_v37 = vpack.c.bf16 %v3643_v28, %v3642_v54 }
 0x1a5   :  { %15576 = vst [vmem:[#allocation32_spill] sm:$0xff] %v12629_v52  ;;  %4033 = vmatmul.mubr.f32.vlgmr.msra.gmra.mrb[48].mxu0 %v12598_v31  ;;  %15579 = vst [vmem:[#allocation35_spill] sm:$0xff] %v12645_v25  ;;  %v3692_v39 = vld [vmem:[%s15140_s5 + $0x3b0] sm:$0xff]  ;;  %v3693_v53 = vld [vmem:[%s15140_s5 + $0x3b8] sm:$0xff]  ;;  %v12687_v2 = vpack.c.bf16 %v3675_v32, %v3674_v15 }
 0x1a6   :  { %4103 = vmatmul.mubr.f32.vlgmr.msra.gmra.mrb[48].mxu1 %v12614_v5  ;;  %9751 = vmatpush3.bf16.msra.mxu0 %v12589_v48  ;;  %15580 = vst [vmem:[#allocation36_spill] sm:$0xff] %v12649_v14  ;;  %15581 = vst [vmem:[#allocation37_spill] sm:$0xff] %v12651_v23  ;;  %v3645_v5 = vld [vmem:[%s15140_s5 + $0x238] sm:$0xff]  ;;  %v3676_v54 = vld [vmem:[%s15140_s5 + $0x330] sm:$0xff]  ;;  %v12701_v28 = vpack.c.bf16 %v3693_v53, %v3692_v39 }
 0x1a7   :  { %4172 = vmatprep.mubr.f32.mxu0 %v12629_v52  ;;  %9783 = vmatpush3.bf16.msra.mxu1 %v12602_v51  ;;  %15582 = vst [vmem:[#allocation38_spill] sm:$0xff] %v12664_v16  ;;  %15583 = vst [vmem:[#allocation39_spill] sm:$0xff] %v12683_v37  ;;  %v3644_v52 = vld [vmem:[%s15140_s5 + $0x230] sm:$0xff]  ;;  %v3677_v15 = vld [vmem:[%s15140_s5 + $0x338] sm:$0xff] }
 0x1a8   :  { %4242 = vmatprep.mubr.f32.mxu1 %v12641_v13  ;;  %9753 = vmatprep.subr.bf16.mxu0 %v12617_v44  ;;  %15584 = vst [vmem:[#allocation40_spill] sm:$0xff] %v12687_v2  ;;  %v12689_v13 = vpack.c.bf16 %v3661_v12, %v3660_v27  ;;  %15586 = vst [vmem:[#allocation42_spill] sm:$0xff] %v12701_v28  ;;  %v3662_v32 = vld [vmem:[%s15140_s5 + $0x2c0] sm:$0xff]  ;;  %v3663_v27 = vld [vmem:[%s15140_s5 + $0x2c8] sm:$0xff]  ;;  %v12719_v53 = vpack.c.bf16 %v3645_v5, %v3644_v52 }
 0x1a9   :  { %9785 = vmatprep.subr.bf16.mxu1 %v12632_v9  ;;  %v3694_v12 = vld [vmem:[%s15140_s5 + $0x3c0] sm:$0xff]  ;;  %v3695_v39 = vld [vmem:[%s15140_s5 + $0x3c8] sm:$0xff]  ;;  %v12723_v31 = vpack.c.bf16 %v3677_v15, %v3676_v54  ;;  %v3664_v15 = vld [vmem:[%s15140_s5 + $0x2d0] sm:$0xff] }
 0x1aa   :  { %9755 = vmatpush3.bf16.msra.mxu0 %v12645_v25  ;;  %15585 = vst [vmem:[#allocation41_spill] sm:$0xff] %v12689_v13  ;;  %15587 = vst [vmem:[#allocation43_spill] sm:$0xff] %v12719_v53  ;;  %v3678_v52 = vld [vmem:[%s15140_s5 + $0x340] sm:$0xff]  ;;  %v12737_v5 = vpack.c.bf16 %v3695_v39, %v3694_v12  ;;  %v3679_v54 = vld [vmem:[%s15140_s5 + $0x348] sm:$0xff]  ;;  %v12838_v25 = vsub.s32 4, %v12194_v34 }
 0x1ab   :  { %9787 = vmatpush3.bf16.msra.mxu1 %v12649_v14  ;;  %9757 = vmatprep.subr.bf16.mxu0 %v12651_v23  ;;  %15588 = vst [vmem:[#allocation44_spill] sm:$0xff] %v12723_v31  ;;  %v3646_v23 = vld [vmem:[%s15140_s5 + $0x240] sm:$0xff]  ;;  %v3647_v14 = vld [vmem:[%s15140_s5 + $0x248] sm:$0xff]  ;;  %v3697_v12 = vld [vmem:[%s15140_s5 + $0x3d8] sm:$0xff] }
 0x1ac   :  { %9789 = vmatprep.subr.bf16.mxu1 %v12664_v16  ;;  %v12725_v16 = vpack.c.bf16 %v3663_v27, %v3662_v32  ;;  %15590 = vst [vmem:[#allocation46_spill] sm:$0xff] %v12737_v5  ;;  %v3665_v32 = vld [vmem:[%s15140_s5 + $0x2d8] sm:$0xff]  ;;  %v3696_v27 = vld [vmem:[%s15140_s5 + $0x3d0] sm:$0xff]  ;;  %v12755_v39 = vpack.c.bf16 %v3647_v14, %v3646_v23 }
 0x1ad   :  { %v3680_v14 = vld [vmem:[%s15140_s5 + $0x350] sm:$0xff]  ;;  %v12773_v23 = vpack.c.bf16 %v3697_v12, %v3696_v27  ;;  %v3699_v27 = vld [vmem:[%s15140_s5 + $0x3e8] sm:$0xff] }
 0x1ae   :  { %9759 = vmatpush3.bf16.msra.mxu0 %v12683_v37  ;;  %15589 = vst [vmem:[#allocation45_spill] sm:$0xff] %v12725_v16  ;;  %15591 = vst [vmem:[#allocation47_spill] sm:$0xff] %v12755_v39  ;;  %v3649_v37 = vld [vmem:[%s15140_s5 + $0x258] sm:$0xff]  ;;  %v3684_v34 = vld [vmem:[%s15140_s5 + $0x370] sm:$0xff] }
 0x1af   :  { %9791 = vmatpush3.bf16.msra.mxu1 %v12687_v2  ;;  %9761 = vmatprep.subr.bf16.mxu0 %v12689_v13  ;;  %v12761_v13 = vpack.c.bf16 %v3665_v32, %v3664_v15  ;;  %v3648_v2 = vld [vmem:[%s15140_s5 + $0x250] sm:$0xff]  ;;  %15594 = vst [vmem:[#allocation50_spill] sm:$0xff] %v12773_v23  ;;  %v3667_v15 = vld [vmem:[%s15140_s5 + $0x2e8] sm:$0xff]  ;;  %v3698_v32 = vld [vmem:[%s15140_s5 + $0x3e0] sm:$0xff] }
 0x1b0   :  { %9793 = vmatprep.subr.bf16.mxu1 %v12701_v28  ;;  %v12759_v28 = vpack.c.bf16 %v3679_v54, %v3678_v52  ;;  %v3681_v52 = vld [vmem:[%s15140_s5 + $0x358] sm:$0xff]  ;;  %v3666_v54 = vld [vmem:[%s15140_s5 + $0x2e0] sm:$0xff]  ;;  %v12791_v12 = vpack.c.bf16 %v3649_v37, %v3648_v2 }
 0x1b1   :  { %15593 = vst [vmem:[#allocation49_spill] sm:$0xff] %v12761_v13  ;;  %v3682_v37 = vld [vmem:[%s15140_s5 + $0x360] sm:$0xff] }
 0x1b2   :  { %9763 = vmatpush3.bf16.msra.mxu0 %v12719_v53  ;;  %15592 = vst [vmem:[#allocation48_spill] sm:$0xff] %v12759_v28  ;;  %15595 = vst [vmem:[#allocation51_spill] sm:$0xff] %v12791_v12  ;;  %v3651_v53 = vld [vmem:[%s15140_s5 + $0x268] sm:$0xff] }
 0x1b3   :  { %9795 = vmatpush3.bf16.msra.mxu1 %v12723_v31  ;;  %9765 = vmatprep.subr.bf16.mxu0 %v12725_v16  ;;  %v12797_v16 = vpack.c.bf16 %v3667_v15, %v3666_v54  ;;  %v3650_v31 = vld [vmem:[%s15140_s5 + $0x260] sm:$0xff]  ;;  %v3668_v54 = vld [vmem:[%s15140_s5 + $0x2f0] sm:$0xff]  ;;  %v3669_v15 = vld [vmem:[%s15140_s5 + $0x2f8] sm:$0xff] }
 0x1b4   :  { %9797 = vmatprep.subr.bf16.mxu1 %v12737_v5  ;;  %v12795_v5 = vpack.c.bf16 %v3681_v52, %v3680_v14  ;;  %v12811_v14 = vpack.c.bf16 %v3699_v27, %v3698_v32  ;;  %v3683_v52 = vld [vmem:[%s15140_s5 + $0x368] sm:$0xff]  ;;  %v3700_v32 = vld [vmem:[%s15140_s5 + $0x3f0] sm:$0xff]  ;;  %v3701_v27 = vld [vmem:[%s15140_s5 + $0x3f8] sm:$0xff]  ;;  %v12844_v44 = vpack.c.bf16 %v3669_v15, %v3668_v54 }
 0x1b5   :  { %15597 = vst [vmem:[#allocation53_spill] sm:$0xff] %v12797_v16  ;;  %v12842_v9 = vpack.c.bf16 %v3683_v52, %v3682_v37  ;;  %v3718_v37 = vld [vmem:[%s15140_s5 + $0x480] sm:$0xff]  ;;  %v3719_v52 = vld [vmem:[%s15140_s5 + $0x488] sm:$0xff] }
 0x1b6   :  { %9767 = vmatpush3.bf16.msra.mxu0 %v12755_v39  ;;  %15596 = vst [vmem:[#allocation52_spill] sm:$0xff] %v12795_v5  ;;  %15599 = vst [vmem:[#allocation55_spill] sm:$0xff] %v12811_v14  ;;  %v12835_v39 = vpack.c.bf16 %v3651_v53, %v3650_v31  ;;  %v3653_v31 = vld [vmem:[%s15140_s5 + $0x278] sm:$0xff]  ;;  %v3750_v54 = vld [vmem:[%s15140_s5 + $0x580] sm:$0xff] }
 0x1b7   :  { %9799 = vmatpush3.bf16.msra.mxu1 %v12759_v28  ;;  %9769 = vmatprep.subr.bf16.mxu0 %v12761_v13  ;;  %15604 = vst [vmem:[#allocation60_spill] sm:$0xff] %v12842_v9  ;;  %15605 = vst [vmem:[#allocation61_spill] sm:$0xff] %v12844_v44  ;;  %v3685_v53 = vld [vmem:[%s15140_s5 + $0x378] sm:$0xff]  ;;  %v3751_v15 = vld [vmem:[%s15140_s5 + $0x588] sm:$0xff] }
 0x1b8   :  { %v12808_v2 = vpop.f32.mrb[24].mxu0  ;;  %9801 = vmatprep.subr.bf16.mxu1 %v12773_v23  ;;  %v12822_v13 = vpop.f32.mrb[24].mxu1  ;;  %15603 = vst [vmem:[#allocation59_spill] sm:$0xff] %v12835_v39 }
 0x1b9   :  { %15598 = vst [vmem:[#allocation54_spill] sm:$0xff] %v12808_v2  ;;  %15600 = vst [vmem:[#allocation56_spill] sm:$0xff] %v12822_v13  ;;  %v12824_v28 = vpop.f32.mrb[25].mxu0  ;;  %v12832_v2 = vpop.f32.mrb[25].mxu1 }
 0x1ba   :  { %15601 = vst [vmem:[#allocation57_spill] sm:$0xff] %v12824_v28  ;;  %15602 = vst [vmem:[#allocation58_spill] sm:$0xff] %v12832_v2  ;;  %v3120_v23 = vpop.f32.mrb[26].mxu0  ;;  %9771 = vmatpush3.bf16.msra.mxu0 %v12791_v12  ;;  %v3161_v13 = vpop.f32.mrb[26].mxu1  ;;  %v12885_v2 = vpack.c.bf16 %v3685_v53, %v3684_v34  ;;  %v3734_v34 = vld [vmem:[%s15140_s5 + $0x500] sm:$0xff]  ;;  %v3735_v53 = vld [vmem:[%s15140_s5 + $0x508] sm:$0xff] }
 0x1bb   :  { %9803 = vmatpush3.bf16.msra.mxu1 %v12795_v5  ;;  %v3121_v28 = vpop.f32.mrb[27].mxu0  ;;  %9773 = vmatprep.subr.bf16.mxu0 %v12797_v16  ;;  %v3652_v23 = vld [vmem:[%s15140_s5 + $0x270] sm:$0xff]  ;;  %v3162_v13 = vpop.f32.mrb[27].mxu1  ;;  %v3702_v16 = vld [vmem:[%s15140_s5 + $0x400] sm:$0xff]  ;;  %v12930_v5 = vpack.c.bf16 %v3735_v53, %v3734_v34  ;;  %v3737_v34 = vld [vmem:[%s15140_s5 + $0x518] sm:$0xff] }
 0x1bc   :  { %9805 = vmatprep.subr.bf16.mxu1 %v12811_v14  ;;  %v12856_v28 = vpack.c.bf16 %v3701_v27, %v3700_v32  ;;  %v12876_v32 = vld [vmem:[%s15141_s2 + $0x8] sm:$0xff]  ;;  %v12879_v27 = vpack.c.bf16 %v3653_v31, %v3652_v23  ;;  %v449_v13 = vrot.slane %v12226_v58, %v12838_v25  ;;  %15608 = vst [vmem:[#allocation64_spill] sm:$0xff] %v12885_v2  ;;  %v3722_v53 = vld [vmem:[%s15140_s5 + $0x4a0] sm:$0xff] }
 0x1bd   :  { %v12887_v14 = vpack.c.bf16 %v3719_v52, %v3718_v37  ;;  %v3703_v23 = vld [vmem:[%s15140_s5 + $0x408] sm:$0xff]  ;;  %v457_v31 = vrot.slane %v12226_v58, %v12434_v61  ;;  %v469_v37 = vrot.slane %v12876_v32, %v12215_v55  ;;  %v3720_v52 = vld [vmem:[%s15140_s5 + $0x490] sm:$0xff]  ;;  %v3721_v58 = vld [vmem:[%s15140_s5 + $0x498] sm:$0xff]  ;;  %15613 = vst [vmem:[#allocation69_spill] sm:$0xff] %v12930_v5 }
 0x1be   :  { %15606 = vst [vmem:[#allocation62_spill] sm:$0xff] %v12856_v28  ;;  %9775 = vmatpush3.bf16.msra.mxu0 %v12835_v39  ;;  %15607 = vst [vmem:[#allocation63_spill] sm:$0xff] %v12879_v27  ;;  %v12926_v39 = vadd.f32 %v11857_v20, %v449_v13  ;;  %v12945_v13 = vpack.c.bf16 %v3721_v58, %v3720_v52  ;;  %v3755_v52 = vld [vmem:[%s15140_s5 + $0x5a8] sm:$0xff] }
 0x1bf   :  { %9807 = vmatpush3.bf16.msra.mxu1 %v12842_v9  ;;  %9777 = vmatprep.subr.bf16.mxu0 %v12844_v44  ;;  %15609 = vst [vmem:[#allocation65_spill] sm:$0xff] %v12887_v14  ;;  %v12898_v9 = vpack.c.bf16 %v3751_v15, %v3750_v54  ;;  %v477_v54 = vrot.slane %v12876_v32, %v12229_v60  ;;  %v3753_v44 = vld [vmem:[%s15140_s5 + $0x598] sm:$0xff] }
 0x1c0   :  { %9809 = vmatprep.subr.bf16.mxu1 %v12856_v28  ;;  %v12917_v15 = vpack.c.bf16 %v3703_v23, %v3702_v16  ;;  %v3752_v28 = vld [vmem:[%s15140_s5 + $0x590] sm:$0xff]  ;;  %15612 = vst [vmem:[#allocation68_spill] sm:$0xff] %v12926_v39  ;;  %v3705_v23 = vld [vmem:[%s15140_s5 + $0x418] sm:$0xff]  ;;  %v12942_v20 = vadd.f32 %v11865_v24, %v457_v31  ;;  %15615 = vst [vmem:[#allocation71_spill] sm:$0xff] %v12945_v13 }
 0x1c1   :  { %15610 = vst [vmem:[#allocation66_spill] sm:$0xff] %v12898_v9  ;;  %v3704_v16 = vld [vmem:[%s15140_s5 + $0x410] sm:$0xff]  ;;  %v12960_v24 = vpack.c.bf16 %v3753_v44, %v3752_v28  ;;  %v3754_v31 = vld [vmem:[%s15140_s5 + $0x5a0] sm:$0xff]  ;;  %v12969_v58 = vadd.f32 %v11983_v46, %v477_v54  ;;  %v3707_v46 = vld [vmem:[%s15140_s5 + $0x428] sm:$0xff] }
 0x1c2   :  { %9779 = vmatpush3.bf16.msra.mxu0 %v12879_v27  ;;  %15611 = vst [vmem:[#allocation67_spill] sm:$0xff] %v12917_v15  ;;  %v3736_v27 = vld [vmem:[%s15140_s5 + $0x510] sm:$0xff]  ;;  %15614 = vst [vmem:[#allocation70_spill] sm:$0xff] %v12942_v20  ;;  %v3738_v54 = vld [vmem:[%s15140_s5 + $0x520] sm:$0xff] }
 0x1c3   :  { %9811 = vmatpush3.bf16.msra.mxu1 %v12885_v2  ;;  %9813 = vmatprep.subr.bf16.mxu0 %v12887_v14  ;;  %v3723_v14 = vld [vmem:[%s15140_s5 + $0x4a8] sm:$0xff]  ;;  %v12957_v2 = vadd.f32 %v11975_v43, %v469_v37  ;;  %15617 = vst [vmem:[#allocation73_spill] sm:$0xff] %v12960_v24  ;;  %15618 = vst [vmem:[#allocation74_spill] sm:$0xff] %v12969_v58  ;;  %v12973_v43 = vpack.c.bf16 %v3705_v23, %v3704_v16  ;;  %v3706_v37 = vld [vmem:[%s15140_s5 + $0x420] sm:$0xff] }
 0x1c4   :  { %9845 = vmatprep.subr.bf16.mxu1 %v12898_v9  ;;  %v12977_v44 = vpack.c.bf16 %v3737_v34, %v3736_v27  ;;  %v12979_v28 = vpack.c.bf16 %v3723_v14, %v3722_v53  ;;  %v12992_v27 = vpack.c.bf16 %v3755_v52, %v3754_v31  ;;  %v3739_v14 = vld [vmem:[%s15140_s5 + $0x528] sm:$0xff]  ;;  %v3724_v16 = vld [vmem:[%s15140_s5 + $0x4b0] sm:$0xff]  ;;  %v3725_v23 = vld [vmem:[%s15140_s5 + $0x4b8] sm:$0xff]  ;;  %v13011_v31 = vpack.c.bf16 %v3707_v46, %v3706_v37 }
 0x1c5   :  { %15616 = vst [vmem:[#allocation72_spill] sm:$0xff] %v12957_v2  ;;  %4173 = vmatmul.mubr.f32.vlgmr.msra.gmra.mrb[50].mxu0 %v12926_v39  ;;  %15619 = vst [vmem:[#allocation75_spill] sm:$0xff] %v12973_v43  ;;  %v3756_v34 = vld [vmem:[%s15140_s5 + $0x5b0] sm:$0xff]  ;;  %v3757_v53 = vld [vmem:[%s15140_s5 + $0x5b8] sm:$0xff]  ;;  %v13015_v52 = vpack.c.bf16 %v3739_v14, %v3738_v54 }
 0x1c6   :  { %4243 = vmatmul.mubr.f32.vlgmr.msra.gmra.mrb[50].mxu1 %v12942_v20  ;;  %9815 = vmatpush3.bf16.msra.mxu0 %v12917_v15  ;;  %15620 = vst [vmem:[#allocation76_spill] sm:$0xff] %v12977_v44  ;;  %15621 = vst [vmem:[#allocation77_spill] sm:$0xff] %v12979_v28  ;;  %v3709_v20 = vld [vmem:[%s15140_s5 + $0x438] sm:$0xff]  ;;  %v3740_v37 = vld [vmem:[%s15140_s5 + $0x530] sm:$0xff]  ;;  %v13029_v46 = vpack.c.bf16 %v3757_v53, %v3756_v34 }
 0x1c7   :  { %4312 = vmatprep.mubr.f32.mxu0 %v12957_v2  ;;  %9847 = vmatpush3.bf16.msra.mxu1 %v12930_v5  ;;  %15622 = vst [vmem:[#allocation78_spill] sm:$0xff] %v12992_v27  ;;  %15623 = vst [vmem:[#allocation79_spill] sm:$0xff] %v13011_v31  ;;  %v3708_v2 = vld [vmem:[%s15140_s5 + $0x430] sm:$0xff]  ;;  %v3741_v54 = vld [vmem:[%s15140_s5 + $0x538] sm:$0xff] }
 0x1c8   :  { %4382 = vmatprep.mubr.f32.mxu1 %v12969_v58  ;;  %9817 = vmatprep.subr.bf16.mxu0 %v12945_v13  ;;  %15624 = vst [vmem:[#allocation80_spill] sm:$0xff] %v13015_v52  ;;  %v13017_v58 = vpack.c.bf16 %v3725_v23, %v3724_v16  ;;  %15626 = vst [vmem:[#allocation82_spill] sm:$0xff] %v13029_v46  ;;  %v3726_v14 = vld [vmem:[%s15140_s5 + $0x4c0] sm:$0xff]  ;;  %v3727_v16 = vld [vmem:[%s15140_s5 + $0x4c8] sm:$0xff]  ;;  %v13047_v53 = vpack.c.bf16 %v3709_v20, %v3708_v2 }
 0x1c9   :  { %9849 = vmatprep.subr.bf16.mxu1 %v12960_v24  ;;  %v3758_v23 = vld [vmem:[%s15140_s5 + $0x5c0] sm:$0xff]  ;;  %v3759_v34 = vld [vmem:[%s15140_s5 + $0x5c8] sm:$0xff]  ;;  %v13051_v39 = vpack.c.bf16 %v3741_v54, %v3740_v37  ;;  %v3728_v54 = vld [vmem:[%s15140_s5 + $0x4d0] sm:$0xff] }
 0x1ca   :  { %9819 = vmatpush3.bf16.msra.mxu0 %v12973_v43  ;;  %15625 = vst [vmem:[#allocation81_spill] sm:$0xff] %v13017_v58  ;;  %15627 = vst [vmem:[#allocation83_spill] sm:$0xff] %v13047_v53  ;;  %v3742_v2 = vld [vmem:[%s15140_s5 + $0x540] sm:$0xff]  ;;  %v13065_v20 = vpack.c.bf16 %v3759_v34, %v3758_v23  ;;  %v3743_v37 = vld [vmem:[%s15140_s5 + $0x548] sm:$0xff] }
 0x1cb   :  { %9851 = vmatpush3.bf16.msra.mxu1 %v12977_v44  ;;  %9821 = vmatprep.subr.bf16.mxu0 %v12979_v28  ;;  %15628 = vst [vmem:[#allocation84_spill] sm:$0xff] %v13051_v39  ;;  %v3710_v28 = vld [vmem:[%s15140_s5 + $0x440] sm:$0xff]  ;;  %v3711_v44 = vld [vmem:[%s15140_s5 + $0x448] sm:$0xff]  ;;  %v3761_v23 = vld [vmem:[%s15140_s5 + $0x5d8] sm:$0xff] }
 0x1cc   :  { %9853 = vmatprep.subr.bf16.mxu1 %v12992_v27  ;;  %v13053_v27 = vpack.c.bf16 %v3727_v16, %v3726_v14  ;;  %15630 = vst [vmem:[#allocation86_spill] sm:$0xff] %v13065_v20  ;;  %v3729_v14 = vld [vmem:[%s15140_s5 + $0x4d8] sm:$0xff]  ;;  %v3760_v16 = vld [vmem:[%s15140_s5 + $0x5d0] sm:$0xff]  ;;  %v13083_v34 = vpack.c.bf16 %v3711_v44, %v3710_v28 }
 0x1cd   :  { %v3744_v44 = vld [vmem:[%s15140_s5 + $0x550] sm:$0xff]  ;;  %v13101_v28 = vpack.c.bf16 %v3761_v23, %v3760_v16  ;;  %v3763_v16 = vld [vmem:[%s15140_s5 + $0x5e8] sm:$0xff] }
 0x1ce   :  { %9823 = vmatpush3.bf16.msra.mxu0 %v13011_v31  ;;  %15629 = vst [vmem:[#allocation85_spill] sm:$0xff] %v13053_v27  ;;  %15631 = vst [vmem:[#allocation87_spill] sm:$0xff] %v13083_v34  ;;  %v3713_v31 = vld [vmem:[%s15140_s5 + $0x458] sm:$0xff]  ;;  %v3716_v13 = vld [vmem:[%s15140_s5 + $0x470] sm:$0xff] }
 0x1cf   :  { %9855 = vmatpush3.bf16.msra.mxu1 %v13015_v52  ;;  %9825 = vmatprep.subr.bf16.mxu0 %v13017_v58  ;;  %v13089_v58 = vpack.c.bf16 %v3729_v14, %v3728_v54  ;;  %v3712_v52 = vld [vmem:[%s15140_s5 + $0x450] sm:$0xff]  ;;  %15634 = vst [vmem:[#allocation90_spill] sm:$0xff] %v13101_v28  ;;  %v3731_v54 = vld [vmem:[%s15140_s5 + $0x4e8] sm:$0xff]  ;;  %v3762_v14 = vld [vmem:[%s15140_s5 + $0x5e0] sm:$0xff] }
 0x1d0   :  { %9857 = vmatprep.subr.bf16.mxu1 %v13029_v46  ;;  %v13087_v46 = vpack.c.bf16 %v3743_v37, %v3742_v2  ;;  %v3745_v2 = vld [vmem:[%s15140_s5 + $0x558] sm:$0xff]  ;;  %v3730_v37 = vld [vmem:[%s15140_s5 + $0x4e0] sm:$0xff]  ;;  %v13119_v23 = vpack.c.bf16 %v3713_v31, %v3712_v52 }
 0x1d1   :  { %15633 = vst [vmem:[#allocation89_spill] sm:$0xff] %v13089_v58  ;;  %v3746_v31 = vld [vmem:[%s15140_s5 + $0x560] sm:$0xff] }
 0x1d2   :  { %9827 = vmatpush3.bf16.msra.mxu0 %v13047_v53  ;;  %15632 = vst [vmem:[#allocation88_spill] sm:$0xff] %v13087_v46  ;;  %15635 = vst [vmem:[#allocation91_spill] sm:$0xff] %v13119_v23  ;;  %v3715_v53 = vld [vmem:[%s15140_s5 + $0x468] sm:$0xff] }
 0x1d3   :  { %9859 = vmatpush3.bf16.msra.mxu1 %v13051_v39  ;;  %9829 = vmatprep.subr.bf16.mxu0 %v13053_v27  ;;  %v13125_v27 = vpack.c.bf16 %v3731_v54, %v3730_v37  ;;  %v3714_v39 = vld [vmem:[%s15140_s5 + $0x460] sm:$0xff]  ;;  %v3732_v37 = vld [vmem:[%s15140_s5 + $0x4f0] sm:$0xff]  ;;  %v3733_v54 = vld [vmem:[%s15140_s5 + $0x4f8] sm:$0xff] }
 0x1d4   :  { %9861 = vmatprep.subr.bf16.mxu1 %v13065_v20  ;;  %v13123_v20 = vpack.c.bf16 %v3745_v2, %v3744_v44  ;;  %v13139_v44 = vpack.c.bf16 %v3763_v16, %v3762_v14  ;;  %v3747_v2 = vld [vmem:[%s15140_s5 + $0x568] sm:$0xff]  ;;  %v3764_v14 = vld [vmem:[%s15140_s5 + $0x5f0] sm:$0xff]  ;;  %v3765_v16 = vld [vmem:[%s15140_s5 + $0x5f8] sm:$0xff]  ;;  %v13169_v24 = vpack.c.bf16 %v3733_v54, %v3732_v37 }
 0x1d5   :  { %15637 = vst [vmem:[#allocation93_spill] sm:$0xff] %v13125_v27  ;;  %v3814_v37 = vld [vmem:[%s15140_s5 + $0x780] sm:$0xff]  ;;  %v3815_v54 = vld [vmem:[%s15140_s5 + $0x788] sm:$0xff] }
 0x1d6   :  { %9831 = vmatpush3.bf16.msra.mxu0 %v13083_v34  ;;  %15636 = vst [vmem:[#allocation92_spill] sm:$0xff] %v13123_v20  ;;  %15639 = vst [vmem:[#allocation95_spill] sm:$0xff] %v13139_v44  ;;  %v13163_v34 = vpack.c.bf16 %v3715_v53, %v3714_v39  ;;  %v3748_v39 = vld [vmem:[%s15140_s5 + $0x570] sm:$0xff]  ;;  %v3749_v53 = vld [vmem:[%s15140_s5 + $0x578] sm:$0xff] }
 0x1d7   :  { %9863 = vmatpush3.bf16.msra.mxu1 %v13087_v46  ;;  %9833 = vmatprep.subr.bf16.mxu0 %v13089_v58  ;;  %15645 = vst [vmem:[#allocation101_spill] sm:$0xff] %v13169_v24 }
 0x1d8   :  { %v13136_v52 = vpop.f32.mrb[28].mxu0  ;;  %9865 = vmatprep.subr.bf16.mxu1 %v13101_v28  ;;  %v13150_v58 = vpop.f32.mrb[28].mxu1  ;;  %15643 = vst [vmem:[#allocation99_spill] sm:$0xff] %v13163_v34 }
 0x1d9   :  { %15638 = vst [vmem:[#allocation94_spill] sm:$0xff] %v13136_v52  ;;  %15640 = vst [vmem:[#allocation96_spill] sm:$0xff] %v13150_v58  ;;  %v13152_v46 = vpop.f32.mrb[29].mxu0  ;;  %v13160_v52 = vpop.f32.mrb[29].mxu1 }
 0x1da   :  { %15641 = vst [vmem:[#allocation97_spill] sm:$0xff] %v13152_v46  ;;  %15642 = vst [vmem:[#allocation98_spill] sm:$0xff] %v13160_v52  ;;  %v3202_v28 = vpop.f32.mrb[30].mxu0  ;;  %9835 = vmatpush3.bf16.msra.mxu0 %v13119_v23  ;;  %v3243_v43 = vpop.f32.mrb[30].mxu1  ;;  %v13167_v46 = vpack.c.bf16 %v3747_v2, %v3746_v31  ;;  %v3782_v31 = vld [vmem:[%s15140_s5 + $0x680] sm:$0xff]  ;;  %v3783_v2 = vld [vmem:[%s15140_s5 + $0x688] sm:$0xff] }
 0x1db   :  { %9867 = vmatpush3.bf16.msra.mxu1 %v13123_v20  ;;  %v3203_v58 = vpop.f32.mrb[31].mxu0  ;;  %9837 = vmatprep.subr.bf16.mxu0 %v13125_v27  ;;  %v3717_v28 = vld [vmem:[%s15140_s5 + $0x478] sm:$0xff]  ;;  %v3244_v43 = vpop.f32.mrb[31].mxu1  ;;  %v13207_v52 = vpack.c.bf16 %v3783_v2, %v3782_v31  ;;  %v485_v31 = vrot.slane %v12876_v32, %v12539_v11  ;;  %v3784_v2 = vld [vmem:[%s15140_s5 + $0x690] sm:$0xff] }
 0x1dc   :  { %15644 = vst [vmem:[#allocation100_spill] sm:$0xff] %v13167_v46  ;;  %9869 = vmatprep.subr.bf16.mxu1 %v13139_v44  ;;  %v13181_v58 = vpack.c.bf16 %v3765_v16, %v3764_v14  ;;  %v13199_v14 = vpack.c.bf16 %v3717_v28, %v3716_v13  ;;  %v465_v16 = vrot.slane %v12876_v32, %v12506_v35  ;;  %v3766_v44 = vld [vmem:[%s15140_s5 + $0x600] sm:$0xff]  ;;  %v3767_v13 = vld [vmem:[%s15140_s5 + $0x608] sm:$0xff] }
 0x1dd   :  { %v13205_v43 = vpack.c.bf16 %v3749_v53, %v3748_v39  ;;  %15649 = vst [vmem:[#allocation105_spill] sm:$0xff] %v13207_v52  ;;  %v473_v28 = vrot.slane %v12876_v32, %v12524_v30  ;;  %v3798_v39 = vld [vmem:[%s15140_s5 + $0x700] sm:$0xff]  ;;  %v3799_v53 = vld [vmem:[%s15140_s5 + $0x708] sm:$0xff] }
 0x1de   :  { %15646 = vst [vmem:[#allocation102_spill] sm:$0xff] %v13181_v58  ;;  %9839 = vmatpush3.bf16.msra.mxu0 %v13163_v34  ;;  %15647 = vst [vmem:[#allocation103_spill] sm:$0xff] %v13199_v14  ;;  %v3817_v34 = vld [vmem:[%s15140_s5 + $0x798] sm:$0xff]  ;;  %v13246_v27 = vadd.f32 %v11965_v38, %v465_v16  ;;  %v13250_v20 = vpack.c.bf16 %v3799_v53, %v3798_v39  ;;  %v3786_v53 = vld [vmem:[%s15140_s5 + $0x6a0] sm:$0xff] }
 0x1df   :  { %9871 = vmatpush3.bf16.msra.mxu1 %v13167_v46  ;;  %9841 = vmatprep.subr.bf16.mxu0 %v13169_v24  ;;  %15648 = vst [vmem:[#allocation104_spill] sm:$0xff] %v13205_v43  ;;  %v13218_v46 = vpack.c.bf16 %v3815_v54, %v3814_v37  ;;  %v3785_v37 = vld [vmem:[%s15140_s5 + $0x698] sm:$0xff]  ;;  %v493_v54 = vrot.slane %v12876_v32, %v12548_v8  ;;  %v3816_v24 = vld [vmem:[%s15140_s5 + $0x790] sm:$0xff] }
 0x1e0   :  { %9873 = vmatprep.subr.bf16.mxu1 %v13181_v58  ;;  %v13237_v58 = vpack.c.bf16 %v3767_v13, %v3766_v44  ;;  %15652 = vst [vmem:[#allocation108_spill] sm:$0xff] %v13246_v27  ;;  %15653 = vst [vmem:[#allocation109_spill] sm:$0xff] %v13250_v20  ;;  %v3768_v44 = vld [vmem:[%s15140_s5 + $0x610] sm:$0xff]  ;;  %v3769_v13 = vld [vmem:[%s15140_s5 + $0x618] sm:$0xff]  ;;  %v13262_v38 = vadd.f32 %v11973_v42, %v473_v28  ;;  %v13265_v16 = vpack.c.bf16 %v3785_v37, %v3784_v2 }
 0x1e1   :  { %15650 = vst [vmem:[#allocation106_spill] sm:$0xff] %v13218_v46  ;;  %v3801_v39 = vld [vmem:[%s15140_s5 + $0x718] sm:$0xff]  ;;  %v13280_v42 = vpack.c.bf16 %v3817_v34, %v3816_v24  ;;  %v3818_v28 = vld [vmem:[%s15140_s5 + $0x7a0] sm:$0xff]  ;;  %v3819_v2 = vld [vmem:[%s15140_s5 + $0x7a8] sm:$0xff]  ;;  %v13289_v37 = vadd.f32 %v12091_v4, %v493_v54 }
 0x1e2   :  { %9843 = vmatpush3.bf16.msra.mxu0 %v13199_v14  ;;  %15651 = vst [vmem:[#allocation107_spill] sm:$0xff] %v13237_v58  ;;  %v3800_v14 = vld [vmem:[%s15140_s5 + $0x710] sm:$0xff]  ;;  %15654 = vst [vmem:[#allocation110_spill] sm:$0xff] %v13262_v38  ;;  %v3771_v4 = vld [vmem:[%s15140_s5 + $0x628] sm:$0xff] }
 0x1e3   :  { %9875 = vmatpush3.bf16.msra.mxu1 %v13205_v43  ;;  %9877 = vmatprep.subr.bf16.mxu0 %v13207_v52  ;;  %15655 = vst [vmem:[#allocation111_spill] sm:$0xff] %v13265_v16  ;;  %v3787_v52 = vld [vmem:[%s15140_s5 + $0x6a8] sm:$0xff]  ;;  %v13277_v43 = vadd.f32 %v12083_v0, %v485_v31  ;;  %15657 = vst [vmem:[#allocation113_spill] sm:$0xff] %v13280_v42  ;;  %v13293_v0 = vpack.c.bf16 %v3769_v13, %v3768_v44  ;;  %v3770_v31 = vld [vmem:[%s15140_s5 + $0x620] sm:$0xff] }
 0x1e4   :  { %9909 = vmatprep.subr.bf16.mxu1 %v13218_v46  ;;  %15658 = vst [vmem:[#allocation114_spill] sm:$0xff] %v13289_v37  ;;  %v13297_v24 = vpack.c.bf16 %v3801_v39, %v3800_v14  ;;  %v13299_v34 = vpack.c.bf16 %v3787_v52, %v3786_v53  ;;  %v3802_v54 = vld [vmem:[%s15140_s5 + $0x720] sm:$0xff]  ;;  %v13312_v14 = vpack.c.bf16 %v3819_v2, %v3818_v28  ;;  %v3803_v52 = vld [vmem:[%s15140_s5 + $0x728] sm:$0xff]  ;;  %v3788_v44 = vld [vmem:[%s15140_s5 + $0x6b0] sm:$0xff] }
 0x1e5   :  { %15656 = vst [vmem:[#allocation112_spill] sm:$0xff] %v13277_v43  ;;  %4313 = vmatmul.mubr.f32.vlgmr.msra.gmra.mrb[52].mxu0 %v13246_v27  ;;  %15659 = vst [vmem:[#allocation115_spill] sm:$0xff] %v13293_v0  ;;  %v3789_v13 = vld [vmem:[%s15140_s5 + $0x6b8] sm:$0xff]  ;;  %v3820_v39 = vld [vmem:[%s15140_s5 + $0x7b0] sm:$0xff]  ;;  %v13331_v28 = vpack.c.bf16 %v3771_v4, %v3770_v31  ;;  %v13335_v2 = vpack.c.bf16 %v3803_v52, %v3802_v54 }
 0x1e6   :  { %4383 = vmatmul.mubr.f32.vlgmr.msra.gmra.mrb[52].mxu1 %v13262_v38  ;;  %9879 = vmatpush3.bf16.msra.mxu0 %v13237_v58  ;;  %15660 = vst [vmem:[#allocation116_spill] sm:$0xff] %v13297_v24  ;;  %15661 = vst [vmem:[#allocation117_spill] sm:$0xff] %v13299_v34  ;;  %v3821_v53 = vld [vmem:[%s15140_s5 + $0x7b8] sm:$0xff]  ;;  %v3804_v31 = vld [vmem:[%s15140_s5 + $0x730] sm:$0xff] }
 0x1e7   :  { %4452 = vmatprep.mubr.f32.mxu0 %v13277_v43  ;;  %9911 = vmatpush3.bf16.msra.mxu1 %v13250_v20  ;;  %15662 = vst [vmem:[#allocation118_spill] sm:$0xff] %v13312_v14  ;;  %15663 = vst [vmem:[#allocation119_spill] sm:$0xff] %v13331_v28  ;;  %v3772_v43 = vld [vmem:[%s15140_s5 + $0x630] sm:$0xff]  ;;  %v3773_v38 = vld [vmem:[%s15140_s5 + $0x638] sm:$0xff]  ;;  %v13349_v4 = vpack.c.bf16 %v3821_v53, %v3820_v39 }
 0x1e8   :  { %4522 = vmatprep.mubr.f32.mxu1 %v13289_v37  ;;  %9881 = vmatprep.subr.bf16.mxu0 %v13265_v16  ;;  %15664 = vst [vmem:[#allocation120_spill] sm:$0xff] %v13335_v2  ;;  %v13337_v37 = vpack.c.bf16 %v3789_v13, %v3788_v44  ;;  %v3805_v54 = vld [vmem:[%s15140_s5 + $0x738] sm:$0xff]  ;;  %v3790_v52 = vld [vmem:[%s15140_s5 + $0x6c0] sm:$0xff]  ;;  %v3791_v44 = vld [vmem:[%s15140_s5 + $0x6c8] sm:$0xff]  ;;  %v13367_v53 = vpack.c.bf16 %v3773_v38, %v3772_v43 }
 0x1e9   :  { %9913 = vmatprep.subr.bf16.mxu1 %v13280_v42  ;;  %15666 = vst [vmem:[#allocation122_spill] sm:$0xff] %v13349_v4  ;;  %v3822_v13 = vld [vmem:[%s15140_s5 + $0x7c0] sm:$0xff]  ;;  %v3823_v39 = vld [vmem:[%s15140_s5 + $0x7c8] sm:$0xff]  ;;  %v13371_v27 = vpack.c.bf16 %v3805_v54, %v3804_v31  ;;  %v3792_v54 = vld [vmem:[%s15140_s5 + $0x6d0] sm:$0xff] }
 0x1ea   :  { %9883 = vmatpush3.bf16.msra.mxu0 %v13293_v0  ;;  %15665 = vst [vmem:[#allocation121_spill] sm:$0xff] %v13337_v37  ;;  %15667 = vst [vmem:[#allocation123_spill] sm:$0xff] %v13367_v53  ;;  %v3806_v43 = vld [vmem:[%s15140_s5 + $0x740] sm:$0xff]  ;;  %v13385_v38 = vpack.c.bf16 %v3823_v39, %v3822_v13  ;;  %v3807_v31 = vld [vmem:[%s15140_s5 + $0x748] sm:$0xff] }
 0x1eb   :  { %9915 = vmatpush3.bf16.msra.mxu1 %v13297_v24  ;;  %9885 = vmatprep.subr.bf16.mxu0 %v13299_v34  ;;  %15668 = vst [vmem:[#allocation124_spill] sm:$0xff] %v13371_v27  ;;  %v3774_v34 = vld [vmem:[%s15140_s5 + $0x640] sm:$0xff]  ;;  %v3775_v24 = vld [vmem:[%s15140_s5 + $0x648] sm:$0xff]  ;;  %v3825_v13 = vld [vmem:[%s15140_s5 + $0x7d8] sm:$0xff] }
 0x1ec   :  { %9917 = vmatprep.subr.bf16.mxu1 %v13312_v14  ;;  %v13373_v14 = vpack.c.bf16 %v3791_v44, %v3790_v52  ;;  %15670 = vst [vmem:[#allocation126_spill] sm:$0xff] %v13385_v38  ;;  %v3793_v52 = vld [vmem:[%s15140_s5 + $0x6d8] sm:$0xff]  ;;  %v3824_v44 = vld [vmem:[%s15140_s5 + $0x7d0] sm:$0xff]  ;;  %v13403_v39 = vpack.c.bf16 %v3775_v24, %v3774_v34 }
 0x1ed   :  { %v3808_v24 = vld [vmem:[%s15140_s5 + $0x750] sm:$0xff]  ;;  %v13421_v34 = vpack.c.bf16 %v3825_v13, %v3824_v44  ;;  %v3827_v44 = vld [vmem:[%s15140_s5 + $0x7e8] sm:$0xff] }
 0x1ee   :  { %9887 = vmatpush3.bf16.msra.mxu0 %v13331_v28  ;;  %15669 = vst [vmem:[#allocation125_spill] sm:$0xff] %v13373_v14  ;;  %15671 = vst [vmem:[#allocation127_spill] sm:$0xff] %v13403_v39  ;;  %v3777_v28 = vld [vmem:[%s15140_s5 + $0x658] sm:$0xff]  ;;  %v3780_v16 = vld [vmem:[%s15140_s5 + $0x670] sm:$0xff] }
 0x1ef   :  { %9919 = vmatpush3.bf16.msra.mxu1 %v13335_v2  ;;  %9889 = vmatprep.subr.bf16.mxu0 %v13337_v37  ;;  %v13409_v37 = vpack.c.bf16 %v3793_v52, %v3792_v54  ;;  %v3776_v2 = vld [vmem:[%s15140_s5 + $0x650] sm:$0xff]  ;;  %15674 = vst [vmem:[#allocation130_spill] sm:$0xff] %v13421_v34  ;;  %v3795_v54 = vld [vmem:[%s15140_s5 + $0x6e8] sm:$0xff]  ;;  %v3826_v52 = vld [vmem:[%s15140_s5 + $0x7e0] sm:$0xff] }
 0x1f0   :  { %9921 = vmatprep.subr.bf16.mxu1 %v13349_v4  ;;  %v13407_v4 = vpack.c.bf16 %v3807_v31, %v3806_v43  ;;  %v3809_v43 = vld [vmem:[%s15140_s5 + $0x758] sm:$0xff]  ;;  %v3794_v31 = vld [vmem:[%s15140_s5 + $0x6e0] sm:$0xff]  ;;  %v13439_v13 = vpack.c.bf16 %v3777_v28, %v3776_v2 }
 0x1f1   :  { %15673 = vst [vmem:[#allocation129_spill] sm:$0xff] %v13409_v37  ;;  %v3810_v28 = vld [vmem:[%s15140_s5 + $0x760] sm:$0xff] }
 0x1f2   :  { %9891 = vmatpush3.bf16.msra.mxu0 %v13367_v53  ;;  %15672 = vst [vmem:[#allocation128_spill] sm:$0xff] %v13407_v4  ;;  %15675 = vst [vmem:[#allocation131_spill] sm:$0xff] %v13439_v13  ;;  %v3779_v53 = vld [vmem:[%s15140_s5 + $0x668] sm:$0xff] }
 0x1f3   :  { %9923 = vmatpush3.bf16.msra.mxu1 %v13371_v27  ;;  %9893 = vmatprep.subr.bf16.mxu0 %v13373_v14  ;;  %v13445_v14 = vpack.c.bf16 %v3795_v54, %v3794_v31  ;;  %v3778_v27 = vld [vmem:[%s15140_s5 + $0x660] sm:$0xff]  ;;  %v3796_v31 = vld [vmem:[%s15140_s5 + $0x6f0] sm:$0xff]  ;;  %v3797_v54 = vld [vmem:[%s15140_s5 + $0x6f8] sm:$0xff] }
 0x1f4   :  { %9925 = vmatprep.subr.bf16.mxu1 %v13385_v38  ;;  %v13443_v38 = vpack.c.bf16 %v3809_v43, %v3808_v24  ;;  %v13459_v24 = vpack.c.bf16 %v3827_v44, %v3826_v52  ;;  %v3811_v43 = vld [vmem:[%s15140_s5 + $0x768] sm:$0xff]  ;;  %v3828_v52 = vld [vmem:[%s15140_s5 + $0x7f0] sm:$0xff]  ;;  %v3829_v44 = vld [vmem:[%s15140_s5 + $0x7f8] sm:$0xff]  ;;  %v13489_v42 = vpack.c.bf16 %v3797_v54, %v3796_v31  ;;  %v489_v54 = vrot.slane %v12876_v32, %v12434_v61 }
 0x1f5   :  { %15677 = vst [vmem:[#allocation133_spill] sm:$0xff] %v13445_v14 }
 0x1f6   :  { %9895 = vmatpush3.bf16.msra.mxu0 %v13403_v39  ;;  %15676 = vst [vmem:[#allocation132_spill] sm:$0xff] %v13443_v38  ;;  %15679 = vst [vmem:[#allocation135_spill] sm:$0xff] %v13459_v24  ;;  %v13483_v39 = vpack.c.bf16 %v3779_v53, %v3778_v27  ;;  %v3813_v53 = vld [vmem:[%s15140_s5 + $0x778] sm:$0xff] }
 0x1f7   :  { %9927 = vmatpush3.bf16.msra.mxu1 %v13407_v4  ;;  %9897 = vmatprep.subr.bf16.mxu0 %v13409_v37  ;;  %15685 = vst [vmem:[#allocation141_spill] sm:$0xff] %v13489_v42 }
 0x1f8   :  { %v13456_v2 = vpop.f32.mrb[32].mxu0  ;;  %9929 = vmatprep.subr.bf16.mxu1 %v13421_v34  ;;  %v13470_v37 = vpop.f32.mrb[32].mxu1  ;;  %15683 = vst [vmem:[#allocation139_spill] sm:$0xff] %v13483_v39 }
 0x1f9   :  { %15678 = vst [vmem:[#allocation134_spill] sm:$0xff] %v13456_v2  ;;  %15680 = vst [vmem:[#allocation136_spill] sm:$0xff] %v13470_v37  ;;  %v13472_v4 = vpop.f32.mrb[33].mxu0  ;;  %v13480_v2 = vpop.f32.mrb[33].mxu1 }
 0x1fa   :  { %15681 = vst [vmem:[#allocation137_spill] sm:$0xff] %v13472_v4  ;;  %15682 = vst [vmem:[#allocation138_spill] sm:$0xff] %v13480_v2  ;;  %v3284_v34 = vpop.f32.mrb[34].mxu0  ;;  %9899 = vmatpush3.bf16.msra.mxu0 %v13439_v13  ;;  %v3325_v0 = vpop.f32.mrb[34].mxu1  ;;  %v13487_v4 = vpack.c.bf16 %v3811_v43, %v3810_v28  ;;  %v481_v43 = vrot.slane %v12876_v32, %v12838_v25  ;;  %v422_v32 = vld [vmem:[%s15141_s2 + $0x20] sm:$0xff] }
 0x1fb   :  { %9931 = vmatpush3.bf16.msra.mxu1 %v13443_v38  ;;  %v3285_v37 = vpop.f32.mrb[35].mxu0  ;;  %9901 = vmatprep.subr.bf16.mxu0 %v13445_v14  ;;  %v3781_v34 = vld [vmem:[%s15140_s5 + $0x678] sm:$0xff]  ;;  %v3326_v27 = vpop.f32.mrb[35].mxu1  ;;  %v13498_v0 = vpack.c.bf16 %v3829_v44, %v3828_v52  ;;  %v585_v44 = vrot.slane %v422_v32, %v12434_v61 }
 0x1fc   :  { %15684 = vst [vmem:[#allocation140_spill] sm:$0xff] %v13487_v4  ;;  %9933 = vmatprep.subr.bf16.mxu1 %v13459_v24  ;;  %v3812_v37 = vld [vmem:[%s15140_s5 + $0x770] sm:$0xff]  ;;  %v13507_v28 = vpack.c.bf16 %v3781_v34, %v3780_v16  ;;  %v13520_v52 = vadd.f32 %v12073_v59, %v481_v43  ;;  %v13524_v16 = vadd.f32 %v12081_v63, %v489_v54 }
 0x1fd   :  { %15686 = vst [vmem:[#allocation142_spill] sm:$0xff] %v13498_v0  ;;  %v13513_v31 = vpack.c.bf16 %v3813_v53, %v3812_v37 }
 0x1fe   :  { %9903 = vmatpush3.bf16.msra.mxu0 %v13483_v39  ;;  %15687 = vst [vmem:[#allocation143_spill] sm:$0xff] %v13507_v28  ;;  %15689 = vst [vmem:[#allocation145_spill] sm:$0xff] %v13520_v52 }
 0x1ff   :  { %9935 = vmatpush3.bf16.msra.mxu1 %v13487_v4  ;;  %9905 = vmatprep.subr.bf16.mxu0 %v13489_v42  ;;  %15688 = vst [vmem:[#allocation144_spill] sm:$0xff] %v13513_v31  ;;  %15690 = vst [vmem:[#allocation146_spill] sm:$0xff] %v13524_v16 }
 0x200   :  { %9937 = vmatprep.subr.bf16.mxu1 %v13498_v0 }
 0x202   :  { %9907 = vmatpush3.bf16.msra.mxu0 %v13507_v28 }
 0x203   :  { %9939 = vmatpush3.bf16.msra.mxu1 %v13513_v31 }
 0x205   :  { %4453 = vmatmul.mubr.f32.vlgmr.msra.gmra.mrb[54].mxu0 %v13520_v52 }
 0x206   :  { %4523 = vmatmul.mubr.f32.vlgmr.msra.gmra.mrb[54].mxu1 %v13524_v16 }
 0x218   :  { %v13532_v34 = vpop.f32.mrb[36].mxu0  ;;  %v3403_v27 = vpop.f32.mrb[36].mxu1 }
 0x219   :  { %15691 = vst [vmem:[#allocation147_spill] sm:$0xff] %v13532_v34  ;;  %v13534_v59 = vpop.f32.mrb[37].mxu0  ;;  %v13536_v37 = vadd.f32 %v3403_v27, %v585_v44  ;;  %v13538_v53 = vpop.f32.mrb[37].mxu1 }
 0x21a   :  { %15692 = vst [vmem:[#allocation148_spill] sm:$0xff] %v13534_v59  ;;  %15694 = vst [vmem:[#allocation150_spill] sm:$0xff] %v13538_v53  ;;  %v3366_v63 = vpop.f32.mrb[38].mxu0  ;;  %v3407_v43 = vpop.f32.mrb[38].mxu1 }
 0x21b   :  { %15693 = vst [vmem:[#allocation149_spill] sm:$0xff] %v13536_v37  ;;  %v3367_v54 = vpop.f32.mrb[39].mxu0  ;;  %v3408_v2 = vpop.f32.mrb[39].mxu1  ;;  %v15363_v37 = vmov 0.0  }
 0x21c   :  { %9597 = vmatprep.subr.mxu0 %v15363_v37  ;;  %9599 = vmatprep.mubr.msk.f32.mxu0 %vm10896_vm0, %v15363_v37 }
 0x21d   :  { %9618 = vmatprep.mubr.msk.f32.mxu1 %vm10896_vm0, %v15363_v37  ;;  %v3964_v37 = vld [vmem:[%s15142_s3 + $0x28] sm:$0xff] }
 0x238   :  { %v13540_v16 = vpop.f32.mrb[40].mxu0  ;;  %v13542_v52 = vpop.f32.mrb[40].mxu1 }
 0x239   :  { %15695 = vst [vmem:[#allocation151_spill] sm:$0xff] %v13540_v16  ;;  %15696 = vst [vmem:[#allocation152_spill] sm:$0xff] %v13542_v52  ;;  %v13544_v31 = vpop.f32.mrb[41].mxu0  ;;  %v13546_v32 = vpop.f32.mrb[41].mxu1 }
 0x23a   :  { %15697 = vst [vmem:[#allocation153_spill] sm:$0xff] %v13544_v31  ;;  %15698 = vst [vmem:[#allocation154_spill] sm:$0xff] %v13546_v32  ;;  %v3448_v34 = vpop.f32.mrb[42].mxu0  ;;  %v3489_v28 = vpop.f32.mrb[42].mxu1 }
 0x23b   :  { %v3449_v0 = vpop.f32.mrb[43].mxu0  ;;  %v3490_v59 = vpop.f32.mrb[43].mxu1  ;;  %v3959_v28 = vld [vmem:[%s15142_s3] sm:$0xff] }
 0x23c   :  { %v15379_v0 = vmov 0.0|0.0   ;;  %v3962_v59 = vld [vmem:[%s15142_s3 + $0x18] sm:$0xff] }
 0x23d   :  { %9940 = vmatprep.subr.bf16.mxu1 %v15379_v0 }
 0x258   :  { %v13548_v44 = vpop.f32.mrb[44].mxu0  ;;  %v13550_v27 = vpop.f32.mrb[44].mxu1 }
 0x259   :  { %15699 = vst [vmem:[#allocation155_spill] sm:$0xff] %v13548_v44  ;;  %15700 = vst [vmem:[#allocation156_spill] sm:$0xff] %v13550_v27  ;;  %v13552_v63 = vpop.f32.mrb[45].mxu0  ;;  %v13554_v43 = vpop.f32.mrb[45].mxu1 }
 0x25a   :  { %15701 = vst [vmem:[#allocation157_spill] sm:$0xff] %v13552_v63  ;;  %15702 = vst [vmem:[#allocation158_spill] sm:$0xff] %v13554_v43  ;;  %v3530_v2 = vpop.f32.mrb[46].mxu0  ;;  %v3571_v54 = vpop.f32.mrb[46].mxu1 }
 0x25b   :  { %v3531_v16 = vpop.f32.mrb[47].mxu0  ;;  %v3572_v52 = vpop.f32.mrb[47].mxu1  ;;  %v3963_v54 = vld [vmem:[%s15142_s3 + $0x20] sm:$0xff] }
 0x25c   :  { %v3960_v52 = vld [vmem:[%s15142_s3 + $0x8] sm:$0xff]  ;;  %v3961_v16 = vld [vmem:[%s15142_s3 + $0x10] sm:$0xff] }
 0x25d   :  { %v13571_v34 = vpack.c.bf16 %v3960_v52, %v3959_v28  ;;  %v13577_v2 = vpack.c.bf16 %v3962_v59, %v3961_v16  ;;  %v13587_v28 = vpack.c.bf16 %v3964_v37, %v3963_v54 }
 0x25f   :  { %15703 = vst [vmem:[#allocation159_spill] sm:$0xff] %v13571_v34  ;;  %9942 = vmatpush3.bf16.msra.mxu1 %v13571_v34  ;;  %15704 = vst [vmem:[#allocation160_spill] sm:$0xff] %v13577_v2 }
 0x260   :  { %9943 = vmatprep.subr.bf16.mxu1 %v15379_v0  ;;  %15705 = vst [vmem:[#allocation161_spill] sm:$0xff] %v13587_v28 }
 0x263   :  { %9945 = vmatpush3.bf16.msra.mxu1 %v13577_v2 }
 0x264   :  { %9946 = vmatprep.subr.bf16.mxu1 %v15379_v0 }
 0x267   :  { %9948 = vmatpush3.bf16.msra.mxu1 %v13587_v28 }
 0x268   :  { %9949 = vmatprep.subr.bf16.mxu1 %v15379_v0 }
 0x278   :  { %v8750_v52 = vpop.f32.mrb[48].mxu0 }
 0x279   :  { %v8785_v16 = vpop.f32.mrb[48].mxu1  ;;  %v8751_v59 = vpop.f32.mrb[49].mxu0 }
 0x27a   :  { %v8752_v27 = vadd.f32 %v8751_v59, %v8750_v52  ;;  %v8786_v44 = vpop.f32.mrb[49].mxu1 }
 0x27b   :  { %v8787_v43 = vadd.f32 %v8786_v44, %v8785_v16 }
 0x27d   :  { %v4105_v63 = vadd.f32 %v8787_v43, %v8752_v27 }
 0x298   :  { %v8820_v32 = vpop.f32.mrb[50].mxu0 }
 0x299   :  { %v8855_v31 = vpop.f32.mrb[50].mxu1  ;;  %v8821_v53 = vpop.f32.mrb[51].mxu0 }
 0x29a   :  { %v8822_v34 = vadd.f32 %v8821_v53, %v8820_v32  ;;  %v8856_v2 = vpop.f32.mrb[51].mxu1 }
 0x29b   :  { %v8857_v37 = vadd.f32 %v8856_v2, %v8855_v31  ;;  %v3958_v31 = vld [vmem:[%s15143_s7] sm:$0xff]  ;;  %v3847_v2 = vld [vmem:[%s15145_s6 + $0x88] sm:$0xff] }
 0x29c   :  { %v4175_v54 = vadd.f32 %v8822_v34, %v4105_v63  ;;  %v3831_v34 = vld [vmem:[%s15145_s6 + $0x8] sm:$0xff] }
 0x29e   :  { %v4245_v61 = vadd.f32 %v8857_v37, %v4175_v54  ;;  %v13625_v37 = vpack.c.bf16 %v3847_v2, %v3831_v34  ;;  %v3849_v54 = vld [vmem:[%s15145_s6 + $0x98] sm:$0xff]  ;;  %v3880_v34 = vld [vmem:[%s15145_s6 + $0x190] sm:$0xff] }
 0x2a0   :  { %15708 = vst [vmem:[#allocation163_spill] sm:$0xff] %v13625_v37 }
 0x2b8   :  { %v8890_v42 = vpop.f32.mrb[52].mxu0 }
 0x2b9   :  { %v8925_v4 = vpop.f32.mrb[52].mxu1  ;;  %v8891_v28 = vpop.f32.mrb[53].mxu0 }
 0x2ba   :  { %v8892_v39 = vadd.f32 %v8891_v28, %v8890_v42  ;;  %v8926_v0 = vpop.f32.mrb[53].mxu1  ;;  %v15706_v42 = vmov 0.0   ;;  %v3833_v28 = vld [vmem:[%s15145_s6 + $0x18] sm:$0xff] }
 0x2bb   :  { %v8927_v24 = vadd.f32 %v8926_v0, %v8925_v4 }
 0x2bc   :  { %v4315_v14 = vadd.f32 %v8892_v39, %v4245_v61  ;;  %v3965_v61 = vld [vmem:[%s15142_s3 + $0x30] sm:$0xff] }
 0x2be   :  { %v4385_v38 = vadd.f32 %v8927_v24, %v4315_v14  ;;  %v3966_v14 = vld [vmem:[%s15142_s3 + $0x38] sm:$0xff]  ;;  %v3967_v24 = vld [vmem:[%s15144_s4] sm:$0xf] }
 0x2bf   :  { %v13605_v4 = vpack.c.bf16 %v3966_v14, %v3965_v61  ;;  %v3879_v61 = vld [vmem:[%s15145_s6 + $0x188] sm:$0xff]  ;;  %v3865_v14 = vld [vmem:[%s15145_s6 + $0x118] sm:$0xff] }
 0x2c1   :  { %15707 = vst [vmem:[#allocation162_spill] sm:$0xff] %v13605_v4  ;;  %9951 = vmatpush3.bf16.msra.mxu1 %v13605_v4 }
 0x2d8   :  { %v8960_v52 = vpop.f32.mrb[54].mxu0 }
 0x2d9   :  { %v8995_v59 = vpop.f32.mrb[54].mxu1  ;;  %v8961_v44 = vpop.f32.mrb[55].mxu0 }
 0x2da   :  { %v8962_v27 = vadd.f32 %v8961_v44, %v8960_v52  ;;  %v8996_v43 = vpop.f32.mrb[55].mxu1  ;;  %v3830_v52 = vld [vmem:[%s15145_s6] sm:$0xff]  ;;  %v13636_v44 = vpack.c.bf16 %v3849_v54, %v3833_v28  ;;  %v3895_v28 = vld [vmem:[%s15145_s6 + $0x208] sm:$0xff] }
 0x2db   :  { %v8997_v16 = vadd.f32 %v8996_v43, %v8995_v59  ;;  %v3846_v59 = vld [vmem:[%s15145_s6 + $0x80] sm:$0xff]  ;;  %v3832_v43 = vld [vmem:[%s15145_s6 + $0x10] sm:$0xff]  ;;  %v3911_v54 = vld [vmem:[%s15145_s6 + $0x288] sm:$0xff] }
 0x2dc   :  { %v4455_v13 = vadd.f32 %v8962_v27, %v4385_v38  ;;  %15709 = vst [vmem:[#allocation164_spill] sm:$0xff] %v13636_v44  ;;  %v13638_v27 = vpack.c.bf16 %v3846_v59, %v3830_v52  ;;  %9969 = vmatprep.subr.bf16.mxu1 %v13636_v44  ;;  %v3897_v52 = vld [vmem:[%s15145_s6 + $0x218] sm:$0xff]  ;;  %v13696_v59 = vpack.c.bf16 %v3911_v54, %v3895_v28 }
 0x2dd   :  { %v3929_v28 = vld [vmem:[%s15145_s6 + $0x318] sm:$0xff] }
 0x2de   :  { %v4525_v53 = vadd.f32 %v8997_v16, %v4455_v13  ;;  %15710 = vst [vmem:[#allocation165_spill] sm:$0xff] %v13638_v27  ;;  %v3848_v16 = vld [vmem:[%s15145_s6 + $0x90] sm:$0xff]  ;;  %15716 = vst [vmem:[#allocation171_spill] sm:$0xff] %v13696_v59  ;;  %v3945_v54 = vld [vmem:[%s15145_s6 + $0x398] sm:$0xff] }
 0x2e0   :  { %9598 = vmatpush3.msra.mxu0 %v4525_v53  ;;  %v13647_v53 = vpack.c.bf16 %v3848_v16, %v3832_v43  ;;  %v3913_v43 = vld [vmem:[%s15145_s6 + $0x298] sm:$0xff]  ;;  %v3894_v16 = vld [vmem:[%s15145_s6 + $0x200] sm:$0xff] }
 0x2e1   :  { %9600 = vmatmul.mubr.msk.f32.vlgmr.msra.gmra.mrb[56].mxu0 %vm4528_vm1, %v3958_v31  ;;  %9621 = vmatprep.subr.mxu0 %v15706_v42  ;;  %v3863_v31 = vld [vmem:[%s15145_s6 + $0x108] sm:$0xff] }
 0x2e2   :  { %9623 = vmatprep.mubr.msk.f32.mxu0 %vm10896_vm0, %v15706_v42  ;;  %9622 = vmatpush3.msk.msra.mxu0 %vm4682_vm3, %v3967_v24  ;;  %15711 = vst [vmem:[#allocation166_spill] sm:$0xff] %v13647_v53  ;;  %v3878_v24 = vld [vmem:[%s15145_s6 + $0x180] sm:$0xff] }
 0x2e3   :  { %9953 = vmatprep.subr.bf16.mxu0 %v13625_v37 }
 0x3b4   :  { %v4598_v38 = vpop.f32.mrb[56].mxu0 }
 0x3b5   :  { %v4602_v39 = vmul.f32 0.015625, %v4598_v38  ;;  %v9601_v13 = vpop.f32.mrb[57].mxu0  ;;  %v13661_v38 = vpack.c.bf16 %v3879_v61, %v3863_v31  ;;  %v3910_v31 = vld [vmem:[%s15145_s6 + $0x280] sm:$0xff]  ;;  %v13708_v61 = vpack.c.bf16 %v3913_v43, %v3897_v52  ;;  %v13736_v43 = vpack.c.bf16 %v3945_v54, %v3929_v28  ;;  %v3851_v28 = vld [vmem:[%s15145_s6 + $0xa8] sm:$0xff] }
 0x3b6   :  { %v3862_v13 = vld [vmem:[%s15145_s6 + $0x100] sm:$0xff] }
 0x3b7   :  { %9619 = vmatmul.mubr.msk.f32.vlgmr.msra.gmra.mrb[56].mxu1 %vm4603_vm2, %v4602_v39  ;;  %15712 = vst [vmem:[#allocation167_spill] sm:$0xff] %v13661_v38  ;;  %v3881_v39 = vld [vmem:[%s15145_s6 + $0x198] sm:$0xff]  ;;  %15717 = vst [vmem:[#allocation172_spill] sm:$0xff] %v13708_v61 }
 0x3b8   :  { %4900 = vmatprep.mubr.f32.mxu1 %v15706_v42  ;;  %9971 = vmatpush1.bf16.msra.mxu1 %v13647_v53  ;;  %15721 = vst [vmem:[#allocation176_spill] sm:$0xff] %v13736_v43  ;;  %v3882_v53 = vld [vmem:[%s15145_s6 + $0x1a0] sm:$0xff] }
 0x48a   :  { %v4673_v32 = vpop.f32.mrb[56].mxu1 }
 0x48b   :  { %v4677_v63 = vmax.f32 %v4673_v32, 0.0  ;;  %v9620_v0 = vpop.f32.mrb[57].mxu1  ;;  %v13672_v32 = vpack.c.bf16 %v3881_v39, %v3865_v14  ;;  %v13710_v14 = vpack.c.bf16 %v3910_v31, %v3894_v16  ;;  %v3896_v39 = vld [vmem:[%s15145_s6 + $0x210] sm:$0xff]  ;;  %v3926_v16 = vld [vmem:[%s15145_s6 + $0x300] sm:$0xff] }
 0x48c   :  { %v3864_v0 = vld [vmem:[%s15145_s6 + $0x110] sm:$0xff]  ;;  %v3942_v31 = vld [vmem:[%s15145_s6 + $0x380] sm:$0xff] }
 0x48d   :  { %9624 = vmatmul.mubr.msk.f32.vlgmr.msra.gmra.mrb[58].mxu0 %vm4678_vm4, %v4677_v63  ;;  %15713 = vst [vmem:[#allocation168_spill] sm:$0xff] %v13672_v32  ;;  %v13674_v63 = vpack.c.bf16 %v3878_v24, %v3862_v13  ;;  %v13683_v2 = vpack.c.bf16 %v3880_v34, %v3864_v0  ;;  %9973 = vmatprep.subr.bf16.mxu1 %v13672_v32  ;;  %15718 = vst [vmem:[#allocation173_spill] sm:$0xff] %v13710_v14  ;;  %v3912_v13 = vld [vmem:[%s15145_s6 + $0x290] sm:$0xff]  ;;  %v3927_v24 = vld [vmem:[%s15145_s6 + $0x308] sm:$0xff] }
 0x48e   :  { %4829 = vmatprep.mubr.f32.mxu0 %v15706_v42  ;;  %9955 = vmatpush1.bf16.msra.mxu0 %v13638_v27  ;;  %v13722_v0 = vpack.c.bf16 %v3912_v13, %v3896_v39  ;;  %v3943_v34 = vld [vmem:[%s15145_s6 + $0x388] sm:$0xff]  ;;  %v3928_v39 = vld [vmem:[%s15145_s6 + $0x310] sm:$0xff]  ;;  %v13748_v13 = vpack.c.bf16 %v3942_v31, %v3926_v16  ;;  %v3837_v31 = vld [vmem:[%s15145_s6 + $0x38] sm:$0xff] }
 0x48f   :  { %15714 = vst [vmem:[#allocation169_spill] sm:$0xff] %v13674_v63  ;;  %9957 = vmatprep.subr.bf16.mxu0 %v13661_v38  ;;  %15715 = vst [vmem:[#allocation170_spill] sm:$0xff] %v13683_v2  ;;  %9975 = vmatpush1.bf16.msra.mxu1 %v13683_v2  ;;  %v13734_v52 = vpack.c.bf16 %v3943_v34, %v3927_v24  ;;  %v3944_v24 = vld [vmem:[%s15145_s6 + $0x390] sm:$0xff]  ;;  %v3835_v34 = vld [vmem:[%s15145_s6 + $0x28] sm:$0xff] }
 0x490   :  { %15719 = vst [vmem:[#allocation174_spill] sm:$0xff] %v13722_v0  ;;  %9977 = vmatprep.subr.bf16.mxu1 %v13708_v61  ;;  %15722 = vst [vmem:[#allocation177_spill] sm:$0xff] %v13748_v13  ;;  %v13761_v54 = vpack.c.bf16 %v3944_v24, %v3928_v39  ;;  %v13763_v16 = vpack.c.bf16 %v3851_v28, %v3835_v34  ;;  %v3853_v61 = vld [vmem:[%s15145_s6 + $0xb8] sm:$0xff]  ;;  %v3866_v32 = vld [vmem:[%s15145_s6 + $0x120] sm:$0xff] }
 0x491   :  { %15720 = vst [vmem:[#allocation175_spill] sm:$0xff] %v13734_v52  ;;  %v13772_v2 = vpack.c.bf16 %v3853_v61, %v3837_v31  ;;  %v3834_v61 = vld [vmem:[%s15145_s6 + $0x20] sm:$0xff] }
 0x492   :  { %9959 = vmatpush1.bf16.msra.mxu0 %v13674_v63  ;;  %15723 = vst [vmem:[#allocation178_spill] sm:$0xff] %v13761_v54  ;;  %15724 = vst [vmem:[#allocation179_spill] sm:$0xff] %v13763_v16  ;;  %v3850_v31 = vld [vmem:[%s15145_s6 + $0xa0] sm:$0xff] }
 0x493   :  { %9961 = vmatprep.subr.bf16.mxu0 %v13696_v59  ;;  %9979 = vmatpush1.bf16.msra.mxu1 %v13722_v0  ;;  %15725 = vst [vmem:[#allocation180_spill] sm:$0xff] %v13772_v2 }
 0x494   :  { %9981 = vmatprep.subr.bf16.mxu1 %v13736_v43 }
 0x496   :  { %9963 = vmatpush1.bf16.msra.mxu0 %v13710_v14 }
 0x497   :  { %9965 = vmatprep.subr.bf16.mxu0 %v13734_v52  ;;  %9983 = vmatpush1.bf16.msra.mxu1 %v13761_v54  ;;  %v3836_v54 = vld [vmem:[%s15145_s6 + $0x30] sm:$0xff]  ;;  %v3914_v52 = vld [vmem:[%s15145_s6 + $0x2a0] sm:$0xff] }
 0x498   :  { %10001 = vmatprep.subr.bf16.mxu1 %v13772_v2  ;;  %v13802_v2 = vpack.c.bf16 %v3850_v31, %v3834_v61  ;;  %v3899_v61 = vld [vmem:[%s15145_s6 + $0x228] sm:$0xff] }
 0x49a   :  { %9967 = vmatpush1.bf16.msra.mxu0 %v13748_v13  ;;  %15726 = vst [vmem:[#allocation181_spill] sm:$0xff] %v13802_v2  ;;  %v3898_v13 = vld [vmem:[%s15145_s6 + $0x220] sm:$0xff] }
 0x49b   :  { %9985 = vmatprep.subr.bf16.mxu0 %v13763_v16  ;;  %v3868_v16 = vld [vmem:[%s15145_s6 + $0x130] sm:$0xff] }
 0x560   :  { %v4752_v39 = vpop.f32.mrb[58].mxu0 }
 0x561   :  { %v8683_v24 = vmul.f32 -1.442695, %v4752_v39  ;;  %v9625_v34 = vpop.f32.mrb[59].mxu0  ;;  %v3852_v39 = vld [vmem:[%s15145_s6 + $0xb0] sm:$0xff] }
 0x562   :  { %v3869_v34 = vld [vmem:[%s15145_s6 + $0x138] sm:$0xff]  ;;  %v13804_v43 = vpack.c.bf16 %v3852_v39, %v3836_v54  ;;  %v3884_v54 = vld [vmem:[%s15145_s6 + $0x1b0] sm:$0xff]  ;;  %v3915_v39 = vld [vmem:[%s15145_s6 + $0x2a8] sm:$0xff] }
 0x563   :  { %10876 = vpow2.f32 %v8683_v24  ;;  %v3883_v24 = vld [vmem:[%s15145_s6 + $0x1a8] sm:$0xff]  ;;  %v13854_v14 = vpack.c.bf16 %v3915_v39, %v3899_v61  ;;  %v3933_v61 = vld [vmem:[%s15145_s6 + $0x338] sm:$0xff] }
 0x564   :  { %15727 = vst [vmem:[#allocation182_spill] sm:$0xff] %v13804_v43  ;;  %v3949_v39 = vld [vmem:[%s15145_s6 + $0x3b8] sm:$0xff] }
 0x565   :  { %15732 = vst [vmem:[#allocation187_spill] sm:$0xff] %v13854_v14 }
 0x56d   :  { %v10877_v28 = vpop.eup %10876 }
 0x56e   :  { %v4759_v0 = vadd.f32 1.0, %v10877_v28  ;;  %v3885_v28 = vld [vmem:[%s15145_s6 + $0x1b8] sm:$0xff] }
 0x56f   :  { %v13814_v4 = vpack.c.bf16 %v3885_v28, %v3869_v34  ;;  %v13842_v34 = vpack.c.bf16 %v3882_v53, %v3866_v32  ;;  %v13844_v28 = vpack.c.bf16 %v3884_v54, %v3868_v16  ;;  %v3900_v53 = vld [vmem:[%s15145_s6 + $0x230] sm:$0xff]  ;;  %v3931_v16 = vld [vmem:[%s15145_s6 + $0x328] sm:$0xff] }
 0x570   :  { %10878 = vrcp.f32 %v4759_v0  ;;  %v3867_v0 = vld [vmem:[%s15145_s6 + $0x128] sm:$0xff]  ;;  %v3916_v32 = vld [vmem:[%s15145_s6 + $0x2b0] sm:$0xff] }
 0x571   :  { %v13812_v44 = vpack.c.bf16 %v3883_v24, %v3867_v0  ;;  %15729 = vst [vmem:[#allocation184_spill] sm:$0xff] %v13814_v4  ;;  %v3901_v0 = vld [vmem:[%s15145_s6 + $0x238] sm:$0xff]  ;;  %15730 = vst [vmem:[#allocation185_spill] sm:$0xff] %v13842_v34  ;;  %v3947_v54 = vld [vmem:[%s15145_s6 + $0x3a8] sm:$0xff] }
 0x572   :  { %v3917_v24 = vld [vmem:[%s15145_s6 + $0x2b8] sm:$0xff]  ;;  %15731 = vst [vmem:[#allocation186_spill] sm:$0xff] %v13844_v28 }
 0x573   :  { %15728 = vst [vmem:[#allocation183_spill] sm:$0xff] %v13812_v44 }
 0x57a   :  { %v13825_v31 = vpop.eup %10878 }
 0x57b   :  { %8684 = vmatmul.mubr.msk.f32.vlgmr.msra.gmra.mrb[60].mxu0 %vm4603_vm2, %v13825_v31  ;;  %8685 = vmatmul.mubr.msk.f32.vlgmr.msra.gmra.mrb[58].mxu1 %vm4603_vm2, %v13825_v31 }
 0x57c   :  { %9987 = vmatpush1.bf16.msra.mxu0 %v13802_v2  ;;  %10003 = vmatpush1.bf16.msra.mxu1 %v13804_v43  ;;  %v13856_v2 = vpack.c.bf16 %v3917_v24, %v3901_v0  ;;  %v13880_v0 = vpack.c.bf16 %v3914_v52, %v3898_v13  ;;  %v13882_v24 = vpack.c.bf16 %v3916_v32, %v3900_v53  ;;  %v3932_v52 = vld [vmem:[%s15145_s6 + $0x330] sm:$0xff]  ;;  %v3839_v53 = vld [vmem:[%s15145_s6 + $0x48] sm:$0xff] }
 0x57d   :  { %9989 = vmatprep.subr.bf16.mxu0 %v13812_v44  ;;  %10005 = vmatprep.subr.bf16.mxu1 %v13814_v4  ;;  %v3930_v4 = vld [vmem:[%s15145_s6 + $0x320] sm:$0xff]  ;;  %v13892_v43 = vpack.c.bf16 %v3947_v54, %v3931_v16  ;;  %v3948_v13 = vld [vmem:[%s15145_s6 + $0x3b0] sm:$0xff]  ;;  %v3855_v32 = vld [vmem:[%s15145_s6 + $0xc8] sm:$0xff] }
 0x57e   :  { %15733 = vst [vmem:[#allocation188_spill] sm:$0xff] %v13856_v2  ;;  %4971 = vmatprep.mubr.f32.mxu0 %v15706_v42  ;;  %5042 = vmatprep.mubr.f32.mxu1 %v15706_v42  ;;  %15734 = vst [vmem:[#allocation189_spill] sm:$0xff] %v13880_v0  ;;  %v3946_v44 = vld [vmem:[%s15145_s6 + $0x3a0] sm:$0xff]  ;;  %v3841_v16 = vld [vmem:[%s15145_s6 + $0x58] sm:$0xff] }
 0x57f   :  { %15735 = vst [vmem:[#allocation190_spill] sm:$0xff] %v13882_v24  ;;  %15736 = vst [vmem:[#allocation191_spill] sm:$0xff] %v13892_v43  ;;  %v3857_v54 = vld [vmem:[%s15145_s6 + $0xd8] sm:$0xff] }
 0x580   :  { %9991 = vmatpush1.bf16.msra.mxu0 %v13842_v34  ;;  %10007 = vmatpush1.bf16.msra.mxu1 %v13844_v28  ;;  %v13894_v34 = vpack.c.bf16 %v3949_v39, %v3933_v61  ;;  %v13916_v61 = vpack.c.bf16 %v3946_v44, %v3930_v4  ;;  %v13918_v39 = vpack.c.bf16 %v3948_v13, %v3932_v52  ;;  %v3840_v4 = vld [vmem:[%s15145_s6 + $0x50] sm:$0xff]  ;;  %v3871_v52 = vld [vmem:[%s15145_s6 + $0x148] sm:$0xff] }
 0x581   :  { %9993 = vmatprep.subr.bf16.mxu0 %v13854_v14  ;;  %10009 = vmatprep.subr.bf16.mxu1 %v13856_v2  ;;  %v3838_v2 = vld [vmem:[%s15145_s6 + $0x40] sm:$0xff]  ;;  %v13928_v28 = vpack.c.bf16 %v3855_v32, %v3839_v53  ;;  %v3856_v44 = vld [vmem:[%s15145_s6 + $0xd0] sm:$0xff]  ;;  %v3887_v13 = vld [vmem:[%s15145_s6 + $0x1c8] sm:$0xff] }
 0x582   :  { %15737 = vst [vmem:[#allocation192_spill] sm:$0xff] %v13894_v34  ;;  %15738 = vst [vmem:[#allocation193_spill] sm:$0xff] %v13916_v61  ;;  %v3854_v14 = vld [vmem:[%s15145_s6 + $0xc0] sm:$0xff]  ;;  %v3873_v53 = vld [vmem:[%s15145_s6 + $0x158] sm:$0xff] }
 0x583   :  { %15739 = vst [vmem:[#allocation194_spill] sm:$0xff] %v13918_v39  ;;  %15740 = vst [vmem:[#allocation195_spill] sm:$0xff] %v13928_v28  ;;  %v3889_v32 = vld [vmem:[%s15145_s6 + $0x1d8] sm:$0xff] }
 0x584   :  { %9995 = vmatpush1.bf16.msra.mxu0 %v13880_v0  ;;  %10011 = vmatpush1.bf16.msra.mxu1 %v13882_v24  ;;  %v13930_v0 = vpack.c.bf16 %v3857_v54, %v3841_v16  ;;  %v13952_v16 = vpack.c.bf16 %v3854_v14, %v3838_v2  ;;  %v13954_v54 = vpack.c.bf16 %v3856_v44, %v3840_v4  ;;  %v3872_v2 = vld [vmem:[%s15145_s6 + $0x150] sm:$0xff]  ;;  %v3903_v4 = vld [vmem:[%s15145_s6 + $0x248] sm:$0xff] }
 0x585   :  { %9997 = vmatprep.subr.bf16.mxu0 %v13892_v43  ;;  %10013 = vmatprep.subr.bf16.mxu1 %v13894_v34  ;;  %v3870_v34 = vld [vmem:[%s15145_s6 + $0x140] sm:$0xff]  ;;  %v13964_v24 = vpack.c.bf16 %v3887_v13, %v3871_v52  ;;  %v3888_v14 = vld [vmem:[%s15145_s6 + $0x1d0] sm:$0xff]  ;;  %v3919_v44 = vld [vmem:[%s15145_s6 + $0x2c8] sm:$0xff] }
 0x586   :  { %15741 = vst [vmem:[#allocation196_spill] sm:$0xff] %v13930_v0  ;;  %15742 = vst [vmem:[#allocation197_spill] sm:$0xff] %v13952_v16  ;;  %v3886_v43 = vld [vmem:[%s15145_s6 + $0x1c0] sm:$0xff]  ;;  %v3905_v52 = vld [vmem:[%s15145_s6 + $0x258] sm:$0xff] }
 0x587   :  { %15743 = vst [vmem:[#allocation198_spill] sm:$0xff] %v13954_v54  ;;  %15744 = vst [vmem:[#allocation199_spill] sm:$0xff] %v13964_v24  ;;  %v3921_v13 = vld [vmem:[%s15145_s6 + $0x2d8] sm:$0xff] }
 0x588   :  { %9999 = vmatpush1.bf16.msra.mxu0 %v13916_v61  ;;  %10015 = vmatpush1.bf16.msra.mxu1 %v13918_v39  ;;  %v13966_v61 = vpack.c.bf16 %v3889_v32, %v3873_v53  ;;  %v13992_v53 = vpack.c.bf16 %v3886_v43, %v3870_v34  ;;  %v13994_v32 = vpack.c.bf16 %v3888_v14, %v3872_v2  ;;  %v3904_v43 = vld [vmem:[%s15145_s6 + $0x250] sm:$0xff]  ;;  %v3935_v2 = vld [vmem:[%s15145_s6 + $0x348] sm:$0xff] }
 0x589   :  { %10017 = vmatprep.subr.bf16.mxu0 %v13928_v28  ;;  %10033 = vmatprep.subr.bf16.mxu1 %v13930_v0  ;;  %v3902_v0 = vld [vmem:[%s15145_s6 + $0x240] sm:$0xff]  ;;  %v14004_v39 = vpack.c.bf16 %v3919_v44, %v3903_v4  ;;  %v3920_v34 = vld [vmem:[%s15145_s6 + $0x2d0] sm:$0xff]  ;;  %v3951_v14 = vld [vmem:[%s15145_s6 + $0x3c8] sm:$0xff] }
 0x58a   :  { %15745 = vst [vmem:[#allocation200_spill] sm:$0xff] %v13966_v61  ;;  %15746 = vst [vmem:[#allocation201_spill] sm:$0xff] %v13992_v53  ;;  %v3918_v28 = vld [vmem:[%s15145_s6 + $0x2c0] sm:$0xff]  ;;  %v3937_v4 = vld [vmem:[%s15145_s6 + $0x358] sm:$0xff] }
 0x58b   :  { %8686 = vmatmul.mubr.msk.f32.vlgmr.msra.gmra.mrb[62].mxu0 %vm4603_vm2, %v13825_v31  ;;  %8687 = vmatmul.mubr.msk.f32.vlgmr.msra.gmra.mrb[60].mxu1 %vm4603_vm2, %v13825_v31  ;;  %15747 = vst [vmem:[#allocation202_spill] sm:$0xff] %v13994_v32  ;;  %15748 = vst [vmem:[#allocation203_spill] sm:$0xff] %v14004_v39  ;;  %v3953_v44 = vld [vmem:[%s15145_s6 + $0x3d8] sm:$0xff] }
 0x58c   :  { %10019 = vmatpush1.bf16.msra.mxu0 %v13952_v16  ;;  %10035 = vmatpush1.bf16.msra.mxu1 %v13954_v54  ;;  %v14006_v16 = vpack.c.bf16 %v3921_v13, %v3905_v52  ;;  %v14030_v52 = vpack.c.bf16 %v3918_v28, %v3902_v0  ;;  %v14032_v13 = vpack.c.bf16 %v3920_v34, %v3904_v43  ;;  %v3936_v28 = vld [vmem:[%s15145_s6 + $0x350] sm:$0xff]  ;;  %v3843_v43 = vld [vmem:[%s15145_s6 + $0x68] sm:$0xff] }
 0x58d   :  { %10021 = vmatprep.subr.bf16.mxu0 %v13964_v24  ;;  %10037 = vmatprep.subr.bf16.mxu1 %v13966_v61  ;;  %v3934_v61 = vld [vmem:[%s15145_s6 + $0x340] sm:$0xff]  ;;  %v14042_v54 = vpack.c.bf16 %v3951_v14, %v3935_v2  ;;  %v3952_v0 = vld [vmem:[%s15145_s6 + $0x3d0] sm:$0xff]  ;;  %v3859_v34 = vld [vmem:[%s15145_s6 + $0xe8] sm:$0xff] }
 0x58e   :  { %15749 = vst [vmem:[#allocation204_spill] sm:$0xff] %v14006_v16  ;;  %5113 = vmatprep.mubr.f32.mxu0 %v15706_v42  ;;  %5184 = vmatprep.mubr.f32.mxu1 %v15706_v42  ;;  %15750 = vst [vmem:[#allocation205_spill] sm:$0xff] %v14030_v52  ;;  %v3950_v24 = vld [vmem:[%s15145_s6 + $0x3c0] sm:$0xff]  ;;  %v3845_v2 = vld [vmem:[%s15145_s6 + $0x78] sm:$0xff] }
 0x58f   :  { %15751 = vst [vmem:[#allocation206_spill] sm:$0xff] %v14032_v13  ;;  %15752 = vst [vmem:[#allocation207_spill] sm:$0xff] %v14042_v54  ;;  %v3861_v14 = vld [vmem:[%s15145_s6 + $0xf8] sm:$0xff] }
 0x590   :  { %10023 = vmatpush1.bf16.msra.mxu0 %v13992_v53  ;;  %10039 = vmatpush1.bf16.msra.mxu1 %v13994_v32  ;;  %v14044_v53 = vpack.c.bf16 %v3953_v44, %v3937_v4  ;;  %v14066_v4 = vpack.c.bf16 %v3950_v24, %v3934_v61  ;;  %v14068_v44 = vpack.c.bf16 %v3952_v0, %v3936_v28  ;;  %v3844_v24 = vld [vmem:[%s15145_s6 + $0x70] sm:$0xff]  ;;  %v3875_v28 = vld [vmem:[%s15145_s6 + $0x168] sm:$0xff] }
 0x591   :  { %10025 = vmatprep.subr.bf16.mxu0 %v14004_v39  ;;  %10041 = vmatprep.subr.bf16.mxu1 %v14006_v16  ;;  %v3842_v16 = vld [vmem:[%s15145_s6 + $0x60] sm:$0xff]  ;;  %v14078_v32 = vpack.c.bf16 %v3859_v34, %v3843_v43  ;;  %v3860_v61 = vld [vmem:[%s15145_s6 + $0xf0] sm:$0xff]  ;;  %v3891_v0 = vld [vmem:[%s15145_s6 + $0x1e8] sm:$0xff] }
 0x592   :  { %15753 = vst [vmem:[#allocation208_spill] sm:$0xff] %v14044_v53  ;;  %15754 = vst [vmem:[#allocation209_spill] sm:$0xff] %v14066_v4  ;;  %v3858_v39 = vld [vmem:[%s15145_s6 + $0xe0] sm:$0xff]  ;;  %v3877_v43 = vld [vmem:[%s15145_s6 + $0x178] sm:$0xff] }
 0x593   :  { %15755 = vst [vmem:[#allocation210_spill] sm:$0xff] %v14068_v44  ;;  %15756 = vst [vmem:[#allocation211_spill] sm:$0xff] %v14078_v32  ;;  %v3893_v34 = vld [vmem:[%s15145_s6 + $0x1f8] sm:$0xff] }
 0x594   :  { %10027 = vmatpush1.bf16.msra.mxu0 %v14030_v52  ;;  %10043 = vmatpush1.bf16.msra.mxu1 %v14032_v13  ;;  %v14080_v52 = vpack.c.bf16 %v3861_v14, %v3845_v2  ;;  %v14102_v2 = vpack.c.bf16 %v3858_v39, %v3842_v16  ;;  %v14104_v14 = vpack.c.bf16 %v3860_v61, %v3844_v24  ;;  %v3876_v39 = vld [vmem:[%s15145_s6 + $0x170] sm:$0xff]  ;;  %v3907_v24 = vld [vmem:[%s15145_s6 + $0x268] sm:$0xff] }
 0x595   :  { %10029 = vmatprep.subr.bf16.mxu0 %v14042_v54  ;;  %10045 = vmatprep.subr.bf16.mxu1 %v14044_v53  ;;  %v3874_v53 = vld [vmem:[%s15145_s6 + $0x160] sm:$0xff]  ;;  %v14114_v13 = vpack.c.bf16 %v3891_v0, %v3875_v28  ;;  %v3892_v16 = vld [vmem:[%s15145_s6 + $0x1f0] sm:$0xff]  ;;  %v3923_v61 = vld [vmem:[%s15145_s6 + $0x2e8] sm:$0xff] }
 0x596   :  { %15757 = vst [vmem:[#allocation212_spill] sm:$0xff] %v14080_v52  ;;  %15758 = vst [vmem:[#allocation213_spill] sm:$0xff] %v14102_v2  ;;  %v3890_v54 = vld [vmem:[%s15145_s6 + $0x1e0] sm:$0xff]  ;;  %v3909_v28 = vld [vmem:[%s15145_s6 + $0x278] sm:$0xff] }
 0x597   :  { %15759 = vst [vmem:[#allocation214_spill] sm:$0xff] %v14104_v14  ;;  %15760 = vst [vmem:[#allocation215_spill] sm:$0xff] %v14114_v13  ;;  %v3925_v0 = vld [vmem:[%s15145_s6 + $0x2f8] sm:$0xff] }
 0x598   :  { %10031 = vmatpush1.bf16.msra.mxu0 %v14066_v4  ;;  %10047 = vmatpush1.bf16.msra.mxu1 %v14068_v44  ;;  %v14116_v4 = vpack.c.bf16 %v3893_v34, %v3877_v43  ;;  %v14142_v43 = vpack.c.bf16 %v3890_v54, %v3874_v53  ;;  %v14144_v34 = vpack.c.bf16 %v3892_v16, %v3876_v39  ;;  %v3908_v54 = vld [vmem:[%s15145_s6 + $0x270] sm:$0xff]  ;;  %v3939_v39 = vld [vmem:[%s15145_s6 + $0x368] sm:$0xff] }
 0x599   :  { %10049 = vmatprep.subr.bf16.mxu0 %v14078_v32  ;;  %10065 = vmatprep.subr.bf16.mxu1 %v14080_v52  ;;  %v3906_v52 = vld [vmem:[%s15145_s6 + $0x260] sm:$0xff]  ;;  %v14154_v44 = vpack.c.bf16 %v3923_v61, %v3907_v24  ;;  %v3924_v53 = vld [vmem:[%s15145_s6 + $0x2f0] sm:$0xff]  ;;  %v3955_v16 = vld [vmem:[%s15145_s6 + $0x3e8] sm:$0xff] }
 0x59a   :  { %15761 = vst [vmem:[#allocation216_spill] sm:$0xff] %v14116_v4  ;;  %15762 = vst [vmem:[#allocation217_spill] sm:$0xff] %v14144_v34  ;;  %v3922_v32 = vld [vmem:[%s15145_s6 + $0x2e0] sm:$0xff]  ;;  %v3941_v24 = vld [vmem:[%s15145_s6 + $0x378] sm:$0xff] }
 0x59b   :  { %8688 = vmatmul.mubr.msk.f32.vlgmr.msra.gmra.mrb[64].mxu0 %vm4603_vm2, %v13825_v31  ;;  %8689 = vmatmul.mubr.msk.f32.vlgmr.msra.gmra.mrb[62].mxu1 %vm4603_vm2, %v13825_v31  ;;  %15763 = vst [vmem:[#allocation218_spill] sm:$0xff] %v14154_v44  ;;  %v3957_v61 = vld [vmem:[%s15145_s6 + $0x3f8] sm:$0xff] }
 0x59c   :  { %10051 = vmatpush1.bf16.msra.mxu0 %v14102_v2  ;;  %10067 = vmatpush1.bf16.msra.mxu1 %v14104_v14  ;;  %v14156_v2 = vpack.c.bf16 %v3925_v0, %v3909_v28  ;;  %v14180_v28 = vpack.c.bf16 %v3922_v32, %v3906_v52  ;;  %v14182_v0 = vpack.c.bf16 %v3924_v53, %v3908_v54  ;;  %v3940_v32 = vld [vmem:[%s15145_s6 + $0x370] sm:$0xff] }
 0x59d   :  { %10053 = vmatprep.subr.bf16.mxu0 %v14114_v13  ;;  %10069 = vmatprep.subr.bf16.mxu1 %v14116_v4  ;;  %v3938_v4 = vld [vmem:[%s15145_s6 + $0x360] sm:$0xff]  ;;  %v14189_v13 = vpack.c.bf16 %v3955_v16, %v3939_v39  ;;  %v14191_v14 = vpack.c.bf16 %v3957_v61, %v3941_v24  ;;  %v3956_v52 = vld [vmem:[%s15145_s6 + $0x3f0] sm:$0xff]  ;;  %v15773_v61 = vld [vmem:[#allocation15_spill] sm:$0xff] }
 0x59e   :  { %5255 = vmatprep.mubr.f32.mxu0 %v15706_v42  ;;  %5326 = vmatprep.mubr.f32.mxu1 %v15706_v42  ;;  %15764 = vst [vmem:[#allocation219_spill] sm:$0xff] %v14180_v28  ;;  %15765 = vst [vmem:[#allocation220_spill] sm:$0xff] %v14182_v0  ;;  %v14206_v53 = vpack.c.bf16 %v3956_v52, %v3940_v32  ;;  %v14213_v39 = vld [vmem:[%s15141_s2 + $0x10] sm:$0xff]  ;;  %v15775_v52 = vld [vmem:[#allocation18_spill] sm:$0xff] }
 0x59f   :  { %15766 = vst [vmem:[#allocation221_spill] sm:$0xff] %v14189_v13  ;;  %15767 = vst [vmem:[#allocation222_spill] sm:$0xff] %v14191_v14  ;;  %v501_v16 = vrot.slane %v14213_v39, %v12215_v55  ;;  %v509_v24 = vrot.slane %v14213_v39, %v12229_v60  ;;  %v15774_v32 = vld [vmem:[#allocation16_spill] sm:$0xff] }
 0x5a0   :  { %10055 = vmatpush1.bf16.msra.mxu0 %v14142_v43  ;;  %10071 = vmatpush1.bf16.msra.mxu1 %v14144_v34  ;;  %v3954_v34 = vld [vmem:[%s15145_s6 + $0x3e0] sm:$0xff] }
 0x5a1   :  { %10057 = vmatprep.subr.bf16.mxu0 %v14154_v44  ;;  %10073 = vmatprep.subr.bf16.mxu1 %v14156_v2  ;;  %v14204_v54 = vpack.c.bf16 %v3954_v34, %v3938_v4  ;;  %v14224_v4 = vadd.f32 %v12198_v36, %v501_v16  ;;  %v14227_v34 = vadd.f32 %v12206_v41, %v509_v24  ;;  %v15770_v36 = vld [vmem:[#allocation11_spill] sm:$0xff]  ;;  %v15771_v41 = vld [vmem:[#allocation13_spill] sm:$0xff]  ;;  %v15776_v16 = vld [vmem:[#allocation22_spill] sm:$0xff] }
 0x5a2   :  { %v497_v24 = vrot.slane %v14213_v39, %v12506_v35 }
 0x5a3   :  { %15768 = vst [vmem:[#allocation223_spill] sm:$0xff] %v14224_v4  ;;  %15769 = vst [vmem:[#allocation224_spill] sm:$0xff] %v14227_v34 }
 0x5a4   :  { %10059 = vmatpush1.bf16.msra.mxu0 %v14180_v28  ;;  %10075 = vmatpush1.bf16.msra.mxu1 %v14182_v0 }
 0x5a5   :  { %10061 = vmatprep.subr.bf16.mxu0 %v14189_v13  ;;  %10077 = vmatprep.subr.bf16.mxu1 %v14191_v14 }
 0x5a8   :  { %10063 = vmatpush1.bf16.msra.mxu0 %v14204_v54  ;;  %10079 = vmatpush1.bf16.msra.mxu1 %v14206_v53 }
 0x5a9   :  { %10081 = vmatprep.subr.bf16.mxu0 %v12231_v62  ;;  %10113 = vmatprep.subr.bf16.mxu1 %v12239_v6 }
 0x5ab   :  { %8690 = vmatmul.mubr.msk.f32.vlgmr.msra.gmra.mrb[66].mxu0 %vm4603_vm2, %v13825_v31  ;;  %8691 = vmatmul.mubr.msk.f32.vlgmr.msra.gmra.mrb[64].mxu1 %vm4603_vm2, %v13825_v31  ;;  %v15772_v31 = vld [vmem:[#allocation14_spill] sm:$0xff] }
 0x5ac   :  { %10083 = vmatpush3.bf16.msra.mxu0 %v12257_v17  ;;  %5477 = vmatprep.mubr.f32.mxu0 %v14224_v4  ;;  %v15778_v4 = vld [vmem:[#allocation24_spill] sm:$0xff] }
 0x5ad   :  { %10115 = vmatpush3.bf16.msra.mxu1 %v12266_v21  ;;  %5547 = vmatprep.mubr.f32.mxu1 %v14227_v34  ;;  %v15777_v34 = vld [vmem:[#allocation23_spill] sm:$0xff] }
 0x5ae   :  { %10085 = vmatprep.subr.bf16.mxu0 %v12278_v26  ;;  %10117 = vmatprep.subr.bf16.mxu1 %v12293_v33 }
 0x5b0   :  { %10087 = vmatpush3.bf16.msra.mxu0 %v12306_v10 }
 0x5b1   :  { %10119 = vmatpush3.bf16.msra.mxu1 %v12310_v45  ;;  %10089 = vmatprep.subr.bf16.mxu0 %v12312_v47 }
 0x5b2   :  { %10121 = vmatprep.subr.bf16.mxu1 %v12325_v49 }
 0x5b4   :  { %10091 = vmatpush3.bf16.msra.mxu0 %v12344_v56 }
 0x5b5   :  { %10123 = vmatpush3.bf16.msra.mxu1 %v12348_v57  ;;  %10093 = vmatprep.subr.bf16.mxu0 %v12350_v3 }
 0x5b6   :  { %10125 = vmatprep.subr.bf16.mxu1 %v12362_v7 }
 0x5b8   :  { %10095 = vmatpush3.bf16.msra.mxu0 %v12380_v18 }
 0x5b9   :  { %10127 = vmatpush3.bf16.msra.mxu1 %v12384_v19  ;;  %10097 = vmatprep.subr.bf16.mxu0 %v12386_v22  ;;  %v15789_v22 = vld [vmem:[#allocation21_spill] sm:$0xff] }
 0x5ba   :  { %10129 = vmatprep.subr.bf16.mxu1 %v12398_v29 }
 0x5bc   :  { %10099 = vmatpush3.bf16.msra.mxu0 %v12416_v40 }
 0x5bd   :  { %10131 = vmatpush3.bf16.msra.mxu1 %v12420_v50  ;;  %10101 = vmatprep.subr.bf16.mxu0 %v15770_v36  ;;  %v15779_v36 = vld [vmem:[#allocation25_spill] sm:$0xff]  ;;  %v15783_v50 = vld [vmem:[#allocation27_spill] sm:$0xff] }
 0x5be   :  { %10133 = vmatprep.subr.bf16.mxu1 %v15771_v41  ;;  %v505_v41 = vrot.slane %v14213_v39, %v12524_v30 }
 0x5c0   :  { %10103 = vmatpush3.bf16.msra.mxu0 %v15772_v31 }
 0x5c1   :  { %10135 = vmatpush3.bf16.msra.mxu1 %v15773_v61  ;;  %10105 = vmatprep.subr.bf16.mxu0 %v15774_v32  ;;  %v517_v61 = vrot.slane %v14213_v39, %v12539_v11  ;;  %v15780_v32 = vld [vmem:[#allocation26_spill] sm:$0xff] }
 0x5c2   :  { %10137 = vmatprep.subr.bf16.mxu1 %v15775_v52  ;;  %v525_v52 = vrot.slane %v14213_v39, %v12548_v8 }
 0x5c4   :  { %10107 = vmatpush3.bf16.msra.mxu0 %v15776_v16  ;;  %v15781_v16 = vld [vmem:[#allocation2_spill] sm:$0xff]  ;;  %v14286_v19 = vadd.f32 %v15789_v22, %v525_v52  ;;  %v15795_v22 = vld [vmem:[#allocation37_spill] sm:$0xff] }
 0x5c5   :  { %10139 = vmatpush3.bf16.msra.mxu1 %v15777_v34  ;;  %10109 = vmatprep.subr.bf16.mxu0 %v15778_v4  ;;  %v14273_v31 = vadd.f32 %v15781_v16, %v497_v24  ;;  %v15784_v34 = vld [vmem:[#allocation28_spill] sm:$0xff]  ;;  %v15785_v4 = vld [vmem:[#allocation3_spill] sm:$0xff]  ;;  %v15796_v52 = vld [vmem:[#allocation38_spill] sm:$0xff] }
 0x5c6   :  { %10141 = vmatprep.subr.bf16.mxu1 %v15779_v36  ;;  %v14278_v40 = vadd.f32 %v15785_v4, %v505_v41  ;;  %v15787_v36 = vld [vmem:[#allocation19_spill] sm:$0xff]  ;;  %15790 = vst [vmem:[#allocation28_spill] sm:$0xff] %v14286_v19  ;;  %v15792_v41 = vld [vmem:[#allocation33_spill] sm:$0xff]  ;;  %v15798_v24 = vld [vmem:[#allocation40_spill] sm:$0xff] }
 0x5c7   :  { %15782 = vst [vmem:[#allocation26_spill] sm:$0xff] %v14273_v31  ;;  %v14282_v29 = vadd.f32 %v15787_v36, %v517_v61  ;;  %v15791_v4 = vld [vmem:[#allocation31_spill] sm:$0xff]  ;;  %v15794_v61 = vld [vmem:[#allocation36_spill] sm:$0xff] }
 0x5c8   :  { %10111 = vmatpush3.bf16.msra.mxu0 %v15780_v32  ;;  %15786 = vst [vmem:[#allocation2_spill] sm:$0xff] %v14278_v40  ;;  %v15793_v36 = vld [vmem:[#allocation35_spill] sm:$0xff] }
 0x5c9   :  { %10143 = vmatpush3.bf16.msra.mxu1 %v15783_v50  ;;  %10145 = vmatprep.subr.bf16.mxu0 %v15784_v34  ;;  %15788 = vst [vmem:[#allocation27_spill] sm:$0xff] %v14282_v29  ;;  %v15797_v16 = vld [vmem:[#allocation39_spill] sm:$0xff] }
 0x5ca   :  { %10177 = vmatprep.subr.bf16.mxu1 %v12570_v1 }
 0x5cb   :  { %5478 = vmatmul.mubr.f32.vlgmr.msra.gmra.mrb[68].mxu0 %v14273_v31  ;;  %v15802_v31 = vld [vmem:[#allocation44_spill] sm:$0xff] }
 0x5cc   :  { %5548 = vmatmul.mubr.f32.vlgmr.msra.gmra.mrb[66].mxu1 %v14278_v40  ;;  %10147 = vmatpush3.bf16.msra.mxu0 %v12589_v48  ;;  %v15800_v40 = vld [vmem:[#allocation42_spill] sm:$0xff] }
 0x5cd   :  { %5617 = vmatprep.mubr.f32.mxu0 %v14282_v29  ;;  %10179 = vmatpush3.bf16.msra.mxu1 %v12602_v51  ;;  %v15799_v29 = vld [vmem:[#allocation41_spill] sm:$0xff] }
 0x5ce   :  { %5687 = vmatprep.mubr.f32.mxu1 %v14286_v19  ;;  %10149 = vmatprep.subr.bf16.mxu0 %v15791_v4  ;;  %v15801_v19 = vld [vmem:[#allocation43_spill] sm:$0xff]  ;;  %v15825_v4 = vld [vmem:[#allocation20_spill] sm:$0xff] }
 0x5cf   :  { %10181 = vmatprep.subr.bf16.mxu1 %v15792_v41  ;;  %v15803_v41 = vld [vmem:[#allocation45_spill] sm:$0xff] }
 0x5d0   :  { %10151 = vmatpush3.bf16.msra.mxu0 %v15793_v36  ;;  %v15804_v36 = vld [vmem:[#allocation46_spill] sm:$0xff] }
 0x5d1   :  { %10183 = vmatpush3.bf16.msra.mxu1 %v15794_v61  ;;  %10153 = vmatprep.subr.bf16.mxu0 %v15795_v22  ;;  %v15805_v61 = vld [vmem:[#allocation47_spill] sm:$0xff]  ;;  %v15806_v22 = vld [vmem:[#allocation48_spill] sm:$0xff] }
 0x5d2   :  { %10185 = vmatprep.subr.bf16.mxu1 %v15796_v52  ;;  %v15807_v52 = vld [vmem:[#allocation49_spill] sm:$0xff] }
 0x5d4   :  { %10155 = vmatpush3.bf16.msra.mxu0 %v15797_v16  ;;  %v15808_v16 = vld [vmem:[#allocation50_spill] sm:$0xff] }
 0x5d5   :  { %10187 = vmatpush3.bf16.msra.mxu1 %v15798_v24  ;;  %10157 = vmatprep.subr.bf16.mxu0 %v15799_v29  ;;  %v15809_v29 = vld [vmem:[#allocation52_spill] sm:$0xff] }
 0x5d6   :  { %10189 = vmatprep.subr.bf16.mxu1 %v15800_v40  ;;  %v15810_v40 = vld [vmem:[#allocation53_spill] sm:$0xff] }
 0x5d8   :  { %10159 = vmatpush3.bf16.msra.mxu0 %v15801_v19  ;;  %v15811_v19 = vld [vmem:[#allocation55_spill] sm:$0xff] }
 0x5d9   :  { %10191 = vmatpush3.bf16.msra.mxu1 %v15802_v31  ;;  %10161 = vmatprep.subr.bf16.mxu0 %v15803_v41  ;;  %v15817_v41 = vld [vmem:[#allocation17_spill] sm:$0xff] }
 0x5da   :  { %10193 = vmatprep.subr.bf16.mxu1 %v15804_v36  ;;  %v14318_v36 = vld [vmem:[%s15141_s2 + $0x18] sm:$0xff] }
 0x5dc   :  { %10163 = vmatpush3.bf16.msra.mxu0 %v15805_v61  ;;  %v15812_v61 = vld [vmem:[#allocation59_spill] sm:$0xff] }
 0x5dd   :  { %10195 = vmatpush3.bf16.msra.mxu1 %v15806_v22  ;;  %10165 = vmatprep.subr.bf16.mxu0 %v15807_v52  ;;  %v513_v52 = vrot.slane %v14213_v39, %v12838_v25  ;;  %v15813_v22 = vld [vmem:[#allocation60_spill] sm:$0xff]  ;;  %v15820_v39 = vld [vmem:[#allocation65_spill] sm:$0xff] }
 0x5de   :  { %10197 = vmatprep.subr.bf16.mxu1 %v15808_v16  ;;  %v15814_v16 = vld [vmem:[#allocation61_spill] sm:$0xff] }
 0x5df   :  { %v14332_v31 = vadd.f32 %v15817_v41, %v513_v52  ;;  %v15826_v41 = vld [vmem:[#allocation71_spill] sm:$0xff]  ;;  %v15827_v52 = vld [vmem:[#allocation73_spill] sm:$0xff] }
 0x5e0   :  { %10167 = vmatpush3.bf16.msra.mxu0 %v12791_v12  ;;  %v15815_v12 = vld [vmem:[#allocation62_spill] sm:$0xff] }
 0x5e1   :  { %10199 = vmatpush3.bf16.msra.mxu1 %v15809_v29  ;;  %10169 = vmatprep.subr.bf16.mxu0 %v15810_v40  ;;  %v533_v40 = vrot.slane %v14318_v36, %v12215_v55  ;;  %v15816_v29 = vld [vmem:[#allocation63_spill] sm:$0xff]  ;;  %15818 = vst [vmem:[#allocation3_spill] sm:$0xff] %v14332_v31 }
 0x5e2   :  { %10201 = vmatprep.subr.bf16.mxu1 %v15811_v19  ;;  %v541_v19 = vrot.slane %v14318_v36, %v12229_v60 }
 0x5e4   :  { %10171 = vmatpush3.bf16.msra.mxu0 %v15812_v61  ;;  %v15819_v61 = vld [vmem:[#allocation64_spill] sm:$0xff] }
 0x5e5   :  { %10203 = vmatpush3.bf16.msra.mxu1 %v15813_v22  ;;  %10173 = vmatprep.subr.bf16.mxu0 %v15814_v16  ;;  %v15821_v16 = vld [vmem:[#allocation57_spill] sm:$0xff] }
 0x5e6   :  { %10205 = vmatprep.subr.bf16.mxu1 %v15815_v12  ;;  %v14338_v22 = vadd.f32 %v15821_v16, %v533_v40  ;;  %v15823_v12 = vld [vmem:[#allocation58_spill] sm:$0xff]  ;;  %v15828_v40 = vld [vmem:[#allocation75_spill] sm:$0xff]  ;;  %v15829_v16 = vld [vmem:[#allocation76_spill] sm:$0xff] }
 0x5e7   :  { %v14342_v24 = vadd.f32 %v15823_v12, %v541_v19  ;;  %v15830_v19 = vld [vmem:[#allocation77_spill] sm:$0xff]  ;;  %v15831_v12 = vld [vmem:[#allocation78_spill] sm:$0xff] }
 0x5e8   :  { %10175 = vmatpush3.bf16.msra.mxu0 %v15816_v29  ;;  %15822 = vst [vmem:[#allocation19_spill] sm:$0xff] %v14338_v22 }
 0x5e9   :  { %10207 = vmatpush3.bf16.msra.mxu1 %v15819_v61  ;;  %10209 = vmatprep.subr.bf16.mxu0 %v15820_v39  ;;  %15824 = vst [vmem:[#allocation21_spill] sm:$0xff] %v14342_v24 }
 0x5ea   :  { %10241 = vmatprep.subr.bf16.mxu1 %v12898_v9  ;;  %v15860_v9 = vld [vmem:[#allocation98_spill] sm:$0xff] }
 0x5eb   :  { %5618 = vmatmul.mubr.f32.vlgmr.msra.gmra.mrb[70].mxu0 %v14332_v31  ;;  %v15833_v31 = vld [vmem:[#allocation80_spill] sm:$0xff] }
 0x5ec   :  { %5688 = vmatmul.mubr.f32.vlgmr.msra.gmra.mrb[68].mxu1 %v15825_v4  ;;  %10211 = vmatpush3.bf16.msra.mxu0 %v12917_v15  ;;  %v15832_v4 = vld [vmem:[#allocation79_spill] sm:$0xff] }
 0x5ed   :  { %5757 = vmatprep.mubr.f32.mxu0 %v14338_v22  ;;  %10243 = vmatpush3.bf16.msra.mxu1 %v12930_v5  ;;  %v15834_v22 = vld [vmem:[#allocation81_spill] sm:$0xff]  ;;  %v15835_v5 = vld [vmem:[#allocation82_spill] sm:$0xff] }
 0x5ee   :  { %5827 = vmatprep.mubr.f32.mxu1 %v14342_v24  ;;  %10213 = vmatprep.subr.bf16.mxu0 %v15826_v41  ;;  %v15836_v24 = vld [vmem:[#allocation83_spill] sm:$0xff]  ;;  %v15837_v41 = vld [vmem:[#allocation84_spill] sm:$0xff] }
 0x5ef   :  { %10245 = vmatprep.subr.bf16.mxu1 %v15827_v52  ;;  %v15838_v52 = vld [vmem:[#allocation85_spill] sm:$0xff] }
 0x5f0   :  { %10215 = vmatpush3.bf16.msra.mxu0 %v15828_v40  ;;  %v15839_v40 = vld [vmem:[#allocation86_spill] sm:$0xff] }
 0x5f1   :  { %10247 = vmatpush3.bf16.msra.mxu1 %v15829_v16  ;;  %10217 = vmatprep.subr.bf16.mxu0 %v15830_v19  ;;  %v15840_v16 = vld [vmem:[#allocation87_spill] sm:$0xff]  ;;  %v15841_v19 = vld [vmem:[#allocation88_spill] sm:$0xff] }
 0x5f2   :  { %10249 = vmatprep.subr.bf16.mxu1 %v15831_v12  ;;  %v15842_v12 = vld [vmem:[#allocation89_spill] sm:$0xff] }
 0x5f4   :  { %10219 = vmatpush3.bf16.msra.mxu0 %v15832_v4  ;;  %v15843_v4 = vld [vmem:[#allocation90_spill] sm:$0xff] }
 0x5f5   :  { %10251 = vmatpush3.bf16.msra.mxu1 %v15833_v31  ;;  %10221 = vmatprep.subr.bf16.mxu0 %v15834_v22  ;;  %v15844_v22 = vld [vmem:[#allocation92_spill] sm:$0xff] }
 0x5f6   :  { %10253 = vmatprep.subr.bf16.mxu1 %v15835_v5  ;;  %v15845_v5 = vld [vmem:[#allocation93_spill] sm:$0xff] }
 0x5f8   :  { %10223 = vmatpush3.bf16.msra.mxu0 %v15836_v24  ;;  %v15846_v24 = vld [vmem:[#allocation95_spill] sm:$0xff] }
 0x5f9   :  { %10255 = vmatpush3.bf16.msra.mxu1 %v15837_v41  ;;  %10225 = vmatprep.subr.bf16.mxu0 %v15838_v52  ;;  %v15847_v41 = vld [vmem:[#allocation99_spill] sm:$0xff]  ;;  %v15854_v52 = vld [vmem:[#allocation104_spill] sm:$0xff] }
 0x5fa   :  { %10257 = vmatprep.subr.bf16.mxu1 %v15839_v40  ;;  %v529_v40 = vrot.slane %v14318_v36, %v12506_v35 }
 0x5fc   :  { %10227 = vmatpush3.bf16.msra.mxu0 %v15840_v16  ;;  %v15848_v16 = vld [vmem:[#allocation100_spill] sm:$0xff] }
 0x5fd   :  { %10259 = vmatpush3.bf16.msra.mxu1 %v15841_v19  ;;  %10229 = vmatprep.subr.bf16.mxu0 %v15842_v12  ;;  %v15849_v19 = vld [vmem:[#allocation101_spill] sm:$0xff]  ;;  %v15850_v12 = vld [vmem:[#allocation102_spill] sm:$0xff] }
 0x5fe   :  { %10261 = vmatprep.subr.bf16.mxu1 %v15843_v4  ;;  %v537_v4 = vrot.slane %v14318_v36, %v12524_v30 }
 0x600   :  { %10231 = vmatpush3.bf16.msra.mxu0 %v13119_v23 }
 0x601   :  { %10263 = vmatpush3.bf16.msra.mxu1 %v15844_v22  ;;  %10233 = vmatprep.subr.bf16.mxu0 %v15845_v5  ;;  %v549_v22 = vrot.slane %v14318_v36, %v12539_v11  ;;  %v15851_v5 = vld [vmem:[#allocation103_spill] sm:$0xff] }
 0x602   :  { %10265 = vmatprep.subr.bf16.mxu1 %v15846_v24  ;;  %v557_v24 = vrot.slane %v14318_v36, %v12548_v8 }
 0x604   :  { %10235 = vmatpush3.bf16.msra.mxu0 %v15847_v41  ;;  %v15852_v41 = vld [vmem:[#allocation54_spill] sm:$0xff]  ;;  %v14398_v39 = vadd.f32 %v15860_v9, %v557_v24  ;;  %v15866_v9 = vld [vmem:[#allocation117_spill] sm:$0xff] }
 0x605   :  { %10267 = vmatpush3.bf16.msra.mxu1 %v15848_v16  ;;  %10237 = vmatprep.subr.bf16.mxu0 %v15849_v19  ;;  %v14385_v23 = vadd.f32 %v15852_v41, %v529_v40  ;;  %v15855_v16 = vld [vmem:[#allocation105_spill] sm:$0xff]  ;;  %v15856_v19 = vld [vmem:[#allocation56_spill] sm:$0xff]  ;;  %v15867_v24 = vld [vmem:[#allocation118_spill] sm:$0xff] }
 0x606   :  { %10269 = vmatprep.subr.bf16.mxu1 %v15850_v12  ;;  %v14390_v31 = vadd.f32 %v15856_v19, %v537_v4  ;;  %v15858_v12 = vld [vmem:[#allocation97_spill] sm:$0xff]  ;;  %15861 = vst [vmem:[#allocation57_spill] sm:$0xff] %v14398_v39  ;;  %v15862_v4 = vld [vmem:[#allocation111_spill] sm:$0xff]  ;;  %v15865_v40 = vld [vmem:[#allocation116_spill] sm:$0xff] }
 0x607   :  { %15853 = vst [vmem:[#allocation63_spill] sm:$0xff] %v14385_v23  ;;  %v14394_v15 = vadd.f32 %v15858_v12, %v549_v22  ;;  %v15863_v41 = vld [vmem:[#allocation113_spill] sm:$0xff]  ;;  %v15864_v22 = vld [vmem:[#allocation115_spill] sm:$0xff]  ;;  %v15869_v12 = vld [vmem:[#allocation120_spill] sm:$0xff] }
 0x608   :  { %10239 = vmatpush3.bf16.msra.mxu0 %v15851_v5  ;;  %15857 = vst [vmem:[#allocation17_spill] sm:$0xff] %v14390_v31  ;;  %v15868_v19 = vld [vmem:[#allocation119_spill] sm:$0xff] }
 0x609   :  { %10271 = vmatpush3.bf16.msra.mxu1 %v15854_v52  ;;  %10273 = vmatprep.subr.bf16.mxu0 %v15855_v16  ;;  %15859 = vst [vmem:[#allocation64_spill] sm:$0xff] %v14394_v15 }
 0x60a   :  { %10305 = vmatprep.subr.bf16.mxu1 %v13218_v46 }
 0x60b   :  { %5758 = vmatmul.mubr.f32.vlgmr.msra.gmra.mrb[72].mxu0 %v14385_v23  ;;  %v15873_v23 = vld [vmem:[#allocation124_spill] sm:$0xff] }
 0x60c   :  { %5828 = vmatmul.mubr.f32.vlgmr.msra.gmra.mrb[70].mxu1 %v14390_v31  ;;  %10275 = vmatpush3.bf16.msra.mxu0 %v13237_v58  ;;  %v15871_v31 = vld [vmem:[#allocation122_spill] sm:$0xff] }
 0x60d   :  { %5897 = vmatprep.mubr.f32.mxu0 %v14394_v15  ;;  %10307 = vmatpush3.bf16.msra.mxu1 %v13250_v20  ;;  %v15870_v15 = vld [vmem:[#allocation121_spill] sm:$0xff] }
 0x60e   :  { %5967 = vmatprep.mubr.f32.mxu1 %v14398_v39  ;;  %10277 = vmatprep.subr.bf16.mxu0 %v15862_v4  ;;  %v15872_v39 = vld [vmem:[#allocation123_spill] sm:$0xff] }
 0x60f   :  { %10309 = vmatprep.subr.bf16.mxu1 %v15863_v41  ;;  %v15874_v41 = vld [vmem:[#allocation125_spill] sm:$0xff] }
 0x610   :  { %10279 = vmatpush3.bf16.msra.mxu0 %v15864_v22  ;;  %v15875_v22 = vld [vmem:[#allocation126_spill] sm:$0xff] }
 0x611   :  { %10311 = vmatpush3.bf16.msra.mxu1 %v15865_v40  ;;  %10281 = vmatprep.subr.bf16.mxu0 %v15866_v9  ;;  %v15876_v40 = vld [vmem:[#allocation127_spill] sm:$0xff]  ;;  %v15877_v9 = vld [vmem:[#allocation128_spill] sm:$0xff] }
 0x612   :  { %10313 = vmatprep.subr.bf16.mxu1 %v15867_v24  ;;  %v15878_v24 = vld [vmem:[#allocation129_spill] sm:$0xff] }
 0x614   :  { %10283 = vmatpush3.bf16.msra.mxu0 %v15868_v19  ;;  %v15879_v19 = vld [vmem:[#allocation130_spill] sm:$0xff] }
 0x615   :  { %10315 = vmatpush3.bf16.msra.mxu1 %v15869_v12  ;;  %10285 = vmatprep.subr.bf16.mxu0 %v15870_v15  ;;  %v15880_v12 = vld [vmem:[#allocation131_spill] sm:$0xff]  ;;  %v15881_v15 = vld [vmem:[#allocation132_spill] sm:$0xff] }
 0x616   :  { %10317 = vmatprep.subr.bf16.mxu1 %v15871_v31  ;;  %v15882_v31 = vld [vmem:[#allocation133_spill] sm:$0xff] }
 0x618   :  { %10287 = vmatpush3.bf16.msra.mxu0 %v15872_v39  ;;  %v15883_v39 = vld [vmem:[#allocation135_spill] sm:$0xff] }
 0x619   :  { %10319 = vmatpush3.bf16.msra.mxu1 %v15873_v23  ;;  %10289 = vmatprep.subr.bf16.mxu0 %v15874_v41  ;;  %v15884_v23 = vld [vmem:[#allocation139_spill] sm:$0xff]  ;;  %v15888_v41 = vld [vmem:[#allocation142_spill] sm:$0xff] }
 0x61a   :  { %10321 = vmatprep.subr.bf16.mxu1 %v15875_v22  ;;  %v545_v22 = vrot.slane %v14318_v36, %v12838_v25 }
 0x61c   :  { %10291 = vmatpush3.bf16.msra.mxu0 %v15876_v40  ;;  %v15885_v40 = vld [vmem:[#allocation140_spill] sm:$0xff] }
 0x61d   :  { %10323 = vmatpush3.bf16.msra.mxu1 %v15877_v9  ;;  %10293 = vmatprep.subr.bf16.mxu0 %v15878_v24  ;;  %v15886_v9 = vld [vmem:[#allocation141_spill] sm:$0xff]  ;;  %v15887_v24 = vld [vmem:[#allocation12_spill] sm:$0xff] }
 0x61e   :  { %10325 = vmatprep.subr.bf16.mxu1 %v15879_v19  ;;  %v553_v19 = vrot.slane %v14318_v36, %v15887_v24  ;;  %v15897_v36 = vld [vmem:[#allocation177_spill] sm:$0xff]  ;;  %v15900_v24 = vld [vmem:[#allocation30_spill] sm:$0xff] }
 0x620   :  { %10295 = vmatpush3.bf16.msra.mxu0 %v15880_v12  ;;  %v15889_v12 = vld [vmem:[#allocation143_spill] sm:$0xff] }
 0x621   :  { %10327 = vmatpush3.bf16.msra.mxu1 %v15881_v15  ;;  %10297 = vmatprep.subr.bf16.mxu0 %v15882_v31  ;;  %v15890_v15 = vld [vmem:[#allocation94_spill] sm:$0xff] }
 0x622   :  { %10329 = vmatprep.subr.bf16.mxu1 %v15883_v39  ;;  %v14437_v31 = vadd.f32 %v15890_v15, %v545_v22  ;;  %v15892_v39 = vld [vmem:[#allocation144_spill] sm:$0xff]  ;;  %v15895_v15 = vld [vmem:[#allocation173_spill] sm:$0xff]  ;;  %v15898_v22 = vld [vmem:[#allocation179_spill] sm:$0xff] }
 0x624   :  { %10299 = vmatpush3.bf16.msra.mxu0 %v15884_v23  ;;  %15891 = vst [vmem:[#allocation58_spill] sm:$0xff] %v14437_v31  ;;  %v15893_v23 = vld [vmem:[#allocation96_spill] sm:$0xff] }
 0x625   :  { %10331 = vmatpush3.bf16.msra.mxu1 %v15885_v40  ;;  %10301 = vmatprep.subr.bf16.mxu0 %v15886_v9  ;;  %v14442_v4 = vadd.f32 %v15893_v23, %v553_v19  ;;  %v15896_v23 = vld [vmem:[#allocation175_spill] sm:$0xff]  ;;  %v15901_v9 = vld [vmem:[#allocation4_spill] sm:$0xff]  ;;  %v15902_v40 = vld [vmem:[#allocation5_spill] sm:$0xff] }
 0x626   :  { %10333 = vmatprep.subr.bf16.mxu1 %v15888_v41  ;;  %v15899_v41 = vld [vmem:[#allocation29_spill] sm:$0xff] }
 0x627   :  { %15894 = vst [vmem:[#allocation54_spill] sm:$0xff] %v14442_v4 }
 0x628   :  { %10303 = vmatpush3.bf16.msra.mxu0 %v15889_v12 }
 0x629   :  { %10335 = vmatpush3.bf16.msra.mxu1 %v15892_v39  ;;  %9626 = vmatprep.subr.mxu0 %v15706_v42 }
 0x62a   :  { %10349 = vmatprep.subr.bf16.mxu1 %v13625_v37 }
 0x62b   :  { %5898 = vmatmul.mubr.f32.vlgmr.msra.gmra.mrb[74].mxu0 %v14437_v31 }
 0x62c   :  { %5968 = vmatmul.mubr.f32.vlgmr.msra.gmra.mrb[72].mxu1 %v14442_v4  ;;  %9628 = vmatprep.mubr.msk.f32.mxu0 %vm10896_vm0, %v15706_v42 }
 0x62d   :  { %10351 = vmatpush1.bf16.msra.mxu1 %v13638_v27  ;;  %6264 = vmatprep.mubr.f32.mxu1 %v15706_v42 }
 0x62e   :  { %10353 = vmatprep.subr.bf16.mxu1 %v13661_v38 }
 0x631   :  { %10355 = vmatpush1.bf16.msra.mxu1 %v13674_v63 }
 0x632   :  { %10357 = vmatprep.subr.bf16.mxu1 %v13696_v59 }
 0x635   :  { %10359 = vmatpush1.bf16.msra.mxu1 %v15895_v15 }
 0x636   :  { %10361 = vmatprep.subr.bf16.mxu1 %v15896_v23 }
 0x639   :  { %10363 = vmatpush1.bf16.msra.mxu1 %v15897_v36 }
 0x63a   :  { %10381 = vmatprep.subr.bf16.mxu1 %v15898_v22 }
 0x64e   :  { %v4831_v19 = vpop.f32.mrb[60].mxu0  ;;  %v4902_v4 = vpop.f32.mrb[58].mxu1 }
 0x64f   :  { %v5333_v31 = vsub.f32 0.0, %v4831_v19  ;;  %v5335_v27 = vsub.f32 0.0, %v4902_v4  ;;  %v4833_v37 = vpop.f32.mrb[61].mxu0  ;;  %v4904_v39 = vpop.f32.mrb[59].mxu1 }
 0x650   :  { %v5334_v12 = vsub.f32 0.0, %v4833_v37  ;;  %v5336_v38 = vsub.f32 0.0, %v4904_v39 }
 0x651   :  { %v5349_v63 = vmax.f32 %v5333_v31, %v15899_v41  ;;  %v5351_v59 = vmax.f32 %v5335_v27, %v15900_v24  ;;  %v15903_v31 = vld [vmem:[#allocation68_spill] sm:$0xff] }
 0x652   :  { %v5350_v15 = vmax.f32 %v5334_v12, %v15901_v9  ;;  %v5352_v23 = vmax.f32 %v5336_v38, %v15902_v40 }
 0x653   :  { %v5365_v20 = vmin.f32 %v4831_v19, %v5349_v63  ;;  %v5367_v36 = vmin.f32 %v4902_v4, %v5351_v59  ;;  %v15904_v4 = vld [vmem:[#allocation70_spill] sm:$0xff] }
 0x654   :  { %v5366_v58 = vmin.f32 %v4833_v37, %v5350_v15  ;;  %v5368_v22 = vmin.f32 %v4904_v39, %v5352_v23 }
 0x655   :  { %v5381_v46 = vsub.f32 %v15899_v41, %v5365_v20  ;;  %v5383_v16 = vsub.f32 %v15900_v24, %v5367_v36  ;;  %v15905_v41 = vld [vmem:[#allocation32_spill] sm:$0xff] }
 0x656   :  { %v5382_v52 = vsub.f32 %v15901_v9, %v5366_v58  ;;  %v5384_v5 = vsub.f32 %v15902_v40, %v5368_v22  ;;  %v15906_v9 = vld [vmem:[#allocation34_spill] sm:$0xff] }
 0x657   :  { %5397 = vst [vmem:[%s15146_s8] sm:$0xff] %v5381_v46  ;;  %5399 = vst [vmem:[%s15146_s8 + $0x10] sm:$0xff] %v5383_v16 }
 0x658   :  { %5398 = vst [vmem:[%s15146_s8 + $0x8] sm:$0xff] %v5382_v52  ;;  %5400 = vst [vmem:[%s15146_s8 + $0x18] sm:$0xff] %v5384_v5 }
 0x65e   :  { %v4973_v20 = vpop.f32.mrb[62].mxu0  ;;  %v5044_v58 = vpop.f32.mrb[60].mxu1 }
 0x65f   :  { %v5337_v37 = vsub.f32 0.0, %v4973_v20  ;;  %v5339_v27 = vsub.f32 0.0, %v5044_v58  ;;  %v4975_v38 = vpop.f32.mrb[63].mxu0  ;;  %v5046_v63 = vpop.f32.mrb[61].mxu1 }
 0x660   :  { %v5338_v59 = vsub.f32 0.0, %v4975_v38  ;;  %v5340_v46 = vsub.f32 0.0, %v5046_v63 }
 0x661   :  { %v5353_v39 = vmax.f32 %v5337_v37, %v15903_v31  ;;  %v5355_v16 = vmax.f32 %v5339_v27, %v15904_v4 }
 0x662   :  { %v5354_v40 = vmax.f32 %v5338_v59, %v15905_v41  ;;  %v5356_v52 = vmax.f32 %v5340_v46, %v15906_v9 }
 0x663   :  { %v5369_v24 = vmin.f32 %v4973_v20, %v5353_v39  ;;  %v5371_v12 = vmin.f32 %v5044_v58, %v5355_v16 }
 0x664   :  { %v5370_v15 = vmin.f32 %v4975_v38, %v5354_v40  ;;  %v5372_v5 = vmin.f32 %v5046_v63, %v5356_v52 }
 0x665   :  { %v5385_v23 = vsub.f32 %v15903_v31, %v5369_v24  ;;  %v5387_v36 = vsub.f32 %v15904_v4, %v5371_v12  ;;  %v15907_v31 = vld [vmem:[#allocation108_spill] sm:$0xff]  ;;  %v15908_v4 = vld [vmem:[#allocation110_spill] sm:$0xff] }
 0x666   :  { %v5386_v22 = vsub.f32 %v15905_v41, %v5370_v15  ;;  %v5388_v19 = vsub.f32 %v15906_v9, %v5372_v5  ;;  %v15909_v41 = vld [vmem:[#allocation72_spill] sm:$0xff]  ;;  %v15910_v9 = vld [vmem:[#allocation74_spill] sm:$0xff] }
 0x667   :  { %5401 = vst [vmem:[%s15146_s8 + $0x20] sm:$0xff] %v5385_v23  ;;  %5403 = vst [vmem:[%s15146_s8 + $0x30] sm:$0xff] %v5387_v36 }
 0x668   :  { %5402 = vst [vmem:[%s15146_s8 + $0x28] sm:$0xff] %v5386_v22  ;;  %5404 = vst [vmem:[%s15146_s8 + $0x38] sm:$0xff] %v5388_v19 }
 0x66e   :  { %v5115_v20 = vpop.f32.mrb[64].mxu0  ;;  %v5186_v58 = vpop.f32.mrb[62].mxu1 }
 0x66f   :  { %v5341_v37 = vsub.f32 0.0, %v5115_v20  ;;  %v5343_v27 = vsub.f32 0.0, %v5186_v58  ;;  %v5117_v38 = vpop.f32.mrb[65].mxu0  ;;  %v5188_v63 = vpop.f32.mrb[63].mxu1 }
 0x670   :  { %v5342_v59 = vsub.f32 0.0, %v5117_v38  ;;  %v5344_v46 = vsub.f32 0.0, %v5188_v63 }
 0x671   :  { %v5357_v39 = vmax.f32 %v5341_v37, %v15907_v31  ;;  %v5359_v16 = vmax.f32 %v5343_v27, %v15908_v4 }
 0x672   :  { %v5358_v40 = vmax.f32 %v5342_v59, %v15909_v41  ;;  %v5360_v52 = vmax.f32 %v5344_v46, %v15910_v9 }
 0x673   :  { %v5373_v24 = vmin.f32 %v5115_v20, %v5357_v39  ;;  %v5375_v12 = vmin.f32 %v5186_v58, %v5359_v16 }
 0x674   :  { %v5374_v15 = vmin.f32 %v5117_v38, %v5358_v40  ;;  %v5376_v5 = vmin.f32 %v5188_v63, %v5360_v52 }
 0x675   :  { %v5389_v23 = vsub.f32 %v15907_v31, %v5373_v24  ;;  %v5391_v36 = vsub.f32 %v15908_v4, %v5375_v12  ;;  %v15911_v31 = vld [vmem:[#allocation145_spill] sm:$0xff]  ;;  %v15912_v4 = vld [vmem:[#allocation146_spill] sm:$0xff] }
 0x676   :  { %v5390_v22 = vsub.f32 %v15909_v41, %v5374_v15  ;;  %v5392_v19 = vsub.f32 %v15910_v9, %v5376_v5  ;;  %v15913_v41 = vld [vmem:[#allocation112_spill] sm:$0xff]  ;;  %v15914_v9 = vld [vmem:[#allocation114_spill] sm:$0xff] }
 0x677   :  { %5405 = vst [vmem:[%s15146_s8 + $0x40] sm:$0xff] %v5389_v23  ;;  %5407 = vst [vmem:[%s15146_s8 + $0x50] sm:$0xff] %v5391_v36 }
 0x678   :  { %5406 = vst [vmem:[%s15146_s8 + $0x48] sm:$0xff] %v5390_v22  ;;  %5408 = vst [vmem:[%s15146_s8 + $0x58] sm:$0xff] %v5392_v19 }
 0x67e   :  { %v5257_v20 = vpop.f32.mrb[66].mxu0  ;;  %v5328_v58 = vpop.f32.mrb[64].mxu1 }
 0x67f   :  { %v5345_v37 = vsub.f32 0.0, %v5257_v20  ;;  %v5347_v27 = vsub.f32 0.0, %v5328_v58  ;;  %v5259_v38 = vpop.f32.mrb[67].mxu0  ;;  %v5330_v63 = vpop.f32.mrb[65].mxu1 }
 0x680   :  { %v5346_v59 = vsub.f32 0.0, %v5259_v38  ;;  %v5348_v46 = vsub.f32 0.0, %v5330_v63 }
 0x681   :  { %v5361_v39 = vmax.f32 %v5345_v37, %v15911_v31  ;;  %v5363_v16 = vmax.f32 %v5347_v27, %v15912_v4 }
 0x682   :  { %v5362_v40 = vmax.f32 %v5346_v59, %v15913_v41  ;;  %v5364_v52 = vmax.f32 %v5348_v46, %v15914_v9 }
 0x683   :  { %v5377_v24 = vmin.f32 %v5257_v20, %v5361_v39  ;;  %v5379_v12 = vmin.f32 %v5328_v58, %v5363_v16 }
 0x684   :  { %v5378_v15 = vmin.f32 %v5259_v38, %v5362_v40  ;;  %v5380_v5 = vmin.f32 %v5330_v63, %v5364_v52 }
 0x685   :  { %v5393_v23 = vsub.f32 %v15911_v31, %v5377_v24  ;;  %v5395_v36 = vsub.f32 %v15912_v4, %v5379_v12 }
 0x686   :  { %v5394_v22 = vsub.f32 %v15913_v41, %v5378_v15  ;;  %v5396_v19 = vsub.f32 %v15914_v9, %v5380_v5 }
 0x687   :  { %5409 = vst [vmem:[%s15146_s8 + $0x60] sm:$0xff] %v5393_v23  ;;  %5411 = vst [vmem:[%s15146_s8 + $0x70] sm:$0xff] %v5395_v36 }
 0x688   :  { %5410 = vst [vmem:[%s15146_s8 + $0x68] sm:$0xff] %v5394_v22  ;;  %5412 = vst [vmem:[%s15146_s8 + $0x78] sm:$0xff] %v5396_v19 }
 0x69e   :  { %v9043_v20 = vpop.f32.mrb[68].mxu0 }
 0x69f   :  { %v9078_v58 = vpop.f32.mrb[66].mxu1  ;;  %v9044_v37 = vpop.f32.mrb[69].mxu0 }
 0x6a0   :  { %v9045_v27 = vadd.f32 %v9044_v37, %v9043_v20  ;;  %v9079_v38 = vpop.f32.mrb[67].mxu1 }
 0x6a1   :  { %v9080_v63 = vadd.f32 %v9079_v38, %v9078_v58 }
 0x6a3   :  { %v5550_v59 = vadd.f32 %v9080_v63, %v9045_v27 }
 0x6be   :  { %v9113_v46 = vpop.f32.mrb[70].mxu0 }
 0x6bf   :  { %v9148_v31 = vpop.f32.mrb[68].mxu1  ;;  %v9114_v39 = vpop.f32.mrb[71].mxu0 }
 0x6c0   :  { %v9115_v4 = vadd.f32 %v9114_v39, %v9113_v46  ;;  %v9149_v16 = vpop.f32.mrb[69].mxu1  ;;  %v15916_v39 = vld [vmem:[#allocation159_spill] sm:$0xff] }
 0x6c1   :  { %v9150_v41 = vadd.f32 %v9149_v16, %v9148_v31  ;;  %v15915_v31 = vmov 0.0|0.0   ;;  %v15918_v16 = vld [vmem:[#allocation161_spill] sm:$0xff] }
 0x6c2   :  { %v5620_v40 = vadd.f32 %v9115_v4, %v5550_v59  ;;  %v14541_v59 = vld [vmem:[%s15143_s7] sm:$0xff]  ;;  %v15917_v4 = vld [vmem:[#allocation160_spill] sm:$0xff] }
 0x6c4   :  { %v5690_v9 = vadd.f32 %v9150_v41, %v5620_v40  ;;  %v15919_v41 = vld [vmem:[#allocation162_spill] sm:$0xff] }
 0x6de   :  { %v9183_v52 = vpop.f32.mrb[72].mxu0 }
 0x6df   :  { %v9218_v24 = vpop.f32.mrb[70].mxu1  ;;  %v9184_v12 = vpop.f32.mrb[73].mxu0 }
 0x6e0   :  { %v9185_v15 = vadd.f32 %v9184_v12, %v9183_v52  ;;  %v9219_v5 = vpop.f32.mrb[71].mxu1  ;;  %v15920_v12 = vld [vmem:[#allocation164_spill] sm:$0xff] }
 0x6e1   :  { %v9220_v23 = vadd.f32 %v9219_v5, %v9218_v24  ;;  %v14560_v24 = vld [vmem:[%s15144_s4] sm:$0xf] }
 0x6e2   :  { %v5760_v36 = vadd.f32 %v9185_v15, %v5690_v9 }
 0x6e4   :  { %v5830_v22 = vadd.f32 %v9220_v23, %v5760_v36  ;;  %v15921_v36 = vld [vmem:[#allocation166_spill] sm:$0xff] }
 0x6fe   :  { %v9253_v19 = vpop.f32.mrb[74].mxu0 }
 0x6ff   :  { %v9288_v20 = vpop.f32.mrb[72].mxu1  ;;  %v9254_v58 = vpop.f32.mrb[75].mxu0 }
 0x700   :  { %v9255_v37 = vadd.f32 %v9254_v58, %v9253_v19  ;;  %v9289_v27 = vpop.f32.mrb[73].mxu1  ;;  %v15923_v19 = vld [vmem:[#allocation170_spill] sm:$0xff] }
 0x701   :  { %v9290_v38 = vadd.f32 %v9289_v27, %v9288_v20  ;;  %v15924_v20 = vld [vmem:[#allocation172_spill] sm:$0xff]  ;;  %v15925_v58 = vld [vmem:[#allocation174_spill] sm:$0xff] }
 0x702   :  { %v5900_v63 = vadd.f32 %v9255_v37, %v5830_v22  ;;  %v15922_v22 = vld [vmem:[#allocation168_spill] sm:$0xff]  ;;  %v15927_v27 = vld [vmem:[#allocation178_spill] sm:$0xff] }
 0x703   :  { %v15926_v37 = vld [vmem:[#allocation176_spill] sm:$0xff] }
 0x704   :  { %v5970_v46 = vadd.f32 %v9290_v38, %v5900_v63  ;;  %v15928_v38 = vld [vmem:[#allocation180_spill] sm:$0xff] }
 0x706   :  { %9627 = vmatpush3.msra.mxu0 %v5970_v46 }
 0x707   :  { %9629 = vmatmul.mubr.msk.f32.vlgmr.msra.gmra.mrb[76].mxu0 %vm4528_vm1, %v14541_v59  ;;  %10336 = vmatprep.subr.bf16.mxu0 %v15915_v31 }
 0x708   :  { %10338 = vmatpush3.bf16.msra.mxu0 %v15916_v39  ;;  %9647 = vmatprep.mubr.msk.f32.mxu0 %vm10896_vm0, %v15706_v42 }
 0x709   :  { %10339 = vmatprep.subr.bf16.mxu0 %v15915_v31 }
 0x70c   :  { %10341 = vmatpush3.bf16.msra.mxu0 %v15917_v4 }
 0x70d   :  { %10342 = vmatprep.subr.bf16.mxu0 %v15915_v31 }
 0x710   :  { %10344 = vmatpush3.bf16.msra.mxu0 %v15918_v16 }
 0x711   :  { %10345 = vmatprep.subr.bf16.mxu0 %v15915_v31 }
 0x714   :  { %10347 = vmatpush3.bf16.msra.mxu0 %v15919_v41 }
 0x715   :  { %9650 = vmatprep.subr.mxu0 %v15706_v42 }
 0x7da   :  { %v6039_v40 = vpop.f32.mrb[76].mxu0 }
 0x7db   :  { %v6043_v9 = vmul.f32 0.015625, %v6039_v40  ;;  %v9630_v52 = vpop.f32.mrb[77].mxu0 }
 0x7dd   :  { %9648 = vmatmul.mubr.msk.f32.vlgmr.msra.gmra.mrb[78].mxu0 %vm4603_vm2, %v6043_v9 }
 0x7de   :  { %9651 = vmatpush3.msk.msra.mxu0 %vm4682_vm3, %v14560_v24  ;;  %9652 = vmatprep.mubr.msk.f32.mxu0 %vm10896_vm0, %v15706_v42 }
 0x7df   :  { %10365 = vmatprep.subr.bf16.mxu0 %v15920_v12 }
 0x8b0   :  { %v6113_v15 = vpop.f32.mrb[78].mxu0 }
 0x8b1   :  { %v6117_v5 = vmax.f32 %v6113_v15, 0.0  ;;  %v9649_v23 = vpop.f32.mrb[79].mxu0 }
 0x8b2   :  { %v15930_v23 = vld [vmem:[#allocation182_spill] sm:$0xff] }
 0x8b3   :  { %9653 = vmatmul.mubr.msk.f32.vlgmr.msra.gmra.mrb[80].mxu0 %vm4678_vm4, %v6117_v5  ;;  %v15929_v5 = vld [vmem:[#allocation181_spill] sm:$0xff] }
 0x8b4   :  { %10367 = vmatpush1.bf16.msra.mxu0 %v15921_v36  ;;  %6335 = vmatprep.mubr.f32.mxu0 %v15706_v42 }
 0x8b5   :  { %10369 = vmatprep.subr.bf16.mxu0 %v15922_v22 }
 0x8b8   :  { %10371 = vmatpush1.bf16.msra.mxu0 %v15923_v19 }
 0x8b9   :  { %10373 = vmatprep.subr.bf16.mxu0 %v15924_v20 }
 0x8bc   :  { %10375 = vmatpush1.bf16.msra.mxu0 %v15925_v58  ;;  %v15943_v58 = vld [vmem:[#allocation195_spill] sm:$0xff] }
 0x8bd   :  { %10377 = vmatprep.subr.bf16.mxu0 %v15926_v37  ;;  %v15942_v37 = vld [vmem:[#allocation194_spill] sm:$0xff] }
 0x8c0   :  { %10379 = vmatpush1.bf16.msra.mxu0 %v15927_v27  ;;  %v15937_v27 = vld [vmem:[#allocation189_spill] sm:$0xff] }
 0x8c1   :  { %10397 = vmatprep.subr.bf16.mxu0 %v15928_v38  ;;  %v15931_v38 = vld [vmem:[#allocation183_spill] sm:$0xff] }
 0x986   :  { %v6187_v63 = vpop.f32.mrb[80].mxu0 }
 0x987   :  { %v8696_v46 = vmul.f32 -1.442695, %v6187_v63  ;;  %v9654_v40 = vpop.f32.mrb[81].mxu0  ;;  %v15932_v63 = vld [vmem:[#allocation184_spill] sm:$0xff] }
 0x988   :  { %v15934_v40 = vld [vmem:[#allocation186_spill] sm:$0xff] }
 0x989   :  { %10880 = vpow2.f32 %v8696_v46  ;;  %v15933_v46 = vld [vmem:[#allocation185_spill] sm:$0xff] }
 0x993   :  { %v10881_v9 = vpop.eup %10880 }
 0x994   :  { %v6194_v52 = vadd.f32 1.0, %v10881_v9  ;;  %v15935_v9 = vld [vmem:[#allocation187_spill] sm:$0xff] }
 0x996   :  { %10882 = vrcp.f32 %v6194_v52  ;;  %v15936_v52 = vld [vmem:[#allocation188_spill] sm:$0xff] }
 0x9a0   :  { %v14577_v15 = vpop.eup %10882 }
 0x9a1   :  { %8697 = vmatmul.mubr.msk.f32.vlgmr.msra.gmra.mrb[74].mxu1 %vm4603_vm2, %v14577_v15  ;;  %8698 = vmatmul.mubr.msk.f32.vlgmr.msra.gmra.mrb[82].mxu0 %vm4603_vm2, %v14577_v15 }
 0x9a2   :  { %10383 = vmatpush1.bf16.msra.mxu1 %v15929_v5  ;;  %10399 = vmatpush1.bf16.msra.mxu0 %v15930_v23  ;;  %v15938_v5 = vld [vmem:[#allocation190_spill] sm:$0xff]  ;;  %v15939_v23 = vld [vmem:[#allocation191_spill] sm:$0xff] }
 0x9a3   :  { %10385 = vmatprep.subr.bf16.mxu1 %v15931_v38  ;;  %10401 = vmatprep.subr.bf16.mxu0 %v15932_v63  ;;  %v15940_v38 = vld [vmem:[#allocation192_spill] sm:$0xff]  ;;  %v15941_v63 = vld [vmem:[#allocation193_spill] sm:$0xff] }
 0x9a4   :  { %6406 = vmatprep.mubr.f32.mxu1 %v15706_v42  ;;  %6477 = vmatprep.mubr.f32.mxu0 %v15706_v42 }
 0x9a6   :  { %10387 = vmatpush1.bf16.msra.mxu1 %v15933_v46  ;;  %10403 = vmatpush1.bf16.msra.mxu0 %v15934_v40  ;;  %v15944_v46 = vld [vmem:[#allocation196_spill] sm:$0xff]  ;;  %v15959_v40 = vld [vmem:[#allocation211_spill] sm:$0xff] }
 0x9a7   :  { %10389 = vmatprep.subr.bf16.mxu1 %v15935_v9  ;;  %10405 = vmatprep.subr.bf16.mxu0 %v15936_v52  ;;  %v15953_v52 = vld [vmem:[#allocation205_spill] sm:$0xff]  ;;  %v15958_v9 = vld [vmem:[#allocation210_spill] sm:$0xff] }
 0x9aa   :  { %10391 = vmatpush1.bf16.msra.mxu1 %v15937_v27  ;;  %10407 = vmatpush1.bf16.msra.mxu0 %v15938_v5  ;;  %v15945_v27 = vld [vmem:[#allocation197_spill] sm:$0xff]  ;;  %v15946_v5 = vld [vmem:[#allocation198_spill] sm:$0xff] }
 0x9ab   :  { %10393 = vmatprep.subr.bf16.mxu1 %v15939_v23  ;;  %10409 = vmatprep.subr.bf16.mxu0 %v15940_v38  ;;  %v15947_v23 = vld [vmem:[#allocation199_spill] sm:$0xff]  ;;  %v15948_v38 = vld [vmem:[#allocation200_spill] sm:$0xff] }
 0x9ae   :  { %10395 = vmatpush1.bf16.msra.mxu1 %v15941_v63  ;;  %10411 = vmatpush1.bf16.msra.mxu0 %v15942_v37  ;;  %v15951_v37 = vld [vmem:[#allocation203_spill] sm:$0xff]  ;;  %v15952_v63 = vld [vmem:[#allocation204_spill] sm:$0xff] }
 0x9af   :  { %10413 = vmatprep.subr.bf16.mxu1 %v15943_v58  ;;  %10429 = vmatprep.subr.bf16.mxu0 %v15944_v46  ;;  %v15949_v58 = vld [vmem:[#allocation201_spill] sm:$0xff]  ;;  %v15950_v46 = vld [vmem:[#allocation202_spill] sm:$0xff] }
 0x9b1   :  { %8699 = vmatmul.mubr.msk.f32.vlgmr.msra.gmra.mrb[76].mxu1 %vm4603_vm2, %v14577_v15  ;;  %8700 = vmatmul.mubr.msk.f32.vlgmr.msra.gmra.mrb[84].mxu0 %vm4603_vm2, %v14577_v15 }
 0x9b2   :  { %10415 = vmatpush1.bf16.msra.mxu1 %v15945_v27  ;;  %10431 = vmatpush1.bf16.msra.mxu0 %v15946_v5  ;;  %v15954_v27 = vld [vmem:[#allocation206_spill] sm:$0xff]  ;;  %v15955_v5 = vld [vmem:[#allocation207_spill] sm:$0xff] }
 0x9b3   :  { %10417 = vmatprep.subr.bf16.mxu1 %v15947_v23  ;;  %10433 = vmatprep.subr.bf16.mxu0 %v15948_v38  ;;  %v15956_v23 = vld [vmem:[#allocation208_spill] sm:$0xff]  ;;  %v15957_v38 = vld [vmem:[#allocation209_spill] sm:$0xff] }
 0x9b4   :  { %6548 = vmatprep.mubr.f32.mxu1 %v15706_v42  ;;  %6619 = vmatprep.mubr.f32.mxu0 %v15706_v42 }
 0x9b6   :  { %10419 = vmatpush1.bf16.msra.mxu1 %v15949_v58  ;;  %10435 = vmatpush1.bf16.msra.mxu0 %v15950_v46  ;;  %v15960_v58 = vld [vmem:[#allocation212_spill] sm:$0xff] }
 0x9b7   :  { %10421 = vmatprep.subr.bf16.mxu1 %v15951_v37  ;;  %10437 = vmatprep.subr.bf16.mxu0 %v15952_v63 }
 0x9ba   :  { %10423 = vmatpush1.bf16.msra.mxu1 %v15953_v52  ;;  %10439 = vmatpush1.bf16.msra.mxu0 %v15954_v27  ;;  %v15961_v52 = vld [vmem:[#allocation213_spill] sm:$0xff]  ;;  %v15962_v27 = vld [vmem:[#allocation214_spill] sm:$0xff] }
 0x9bb   :  { %10425 = vmatprep.subr.bf16.mxu1 %v15955_v5  ;;  %10441 = vmatprep.subr.bf16.mxu0 %v15956_v23  ;;  %v15963_v5 = vld [vmem:[#allocation215_spill] sm:$0xff]  ;;  %v15964_v23 = vld [vmem:[#allocation216_spill] sm:$0xff] }
 0x9be   :  { %10427 = vmatpush1.bf16.msra.mxu1 %v15957_v38  ;;  %10443 = vmatpush1.bf16.msra.mxu0 %v15958_v9 }
 0x9bf   :  { %10445 = vmatprep.subr.bf16.mxu1 %v15959_v40  ;;  %10461 = vmatprep.subr.bf16.mxu0 %v15960_v58  ;;  %v15965_v58 = vld [vmem:[#allocation217_spill] sm:$0xff] }
 0x9c1   :  { %8701 = vmatmul.mubr.msk.f32.vlgmr.msra.gmra.mrb[78].mxu1 %vm4603_vm2, %v14577_v15  ;;  %8702 = vmatmul.mubr.msk.f32.vlgmr.msra.gmra.mrb[86].mxu0 %vm4603_vm2, %v14577_v15 }
 0x9c2   :  { %10447 = vmatpush1.bf16.msra.mxu1 %v15961_v52  ;;  %10463 = vmatpush1.bf16.msra.mxu0 %v15962_v27 }
 0x9c3   :  { %10449 = vmatprep.subr.bf16.mxu1 %v15963_v5  ;;  %10465 = vmatprep.subr.bf16.mxu0 %v15964_v23  ;;  %v14644_v23 = vld [vmem:[%s15141_s2 + $0x20] sm:$0xff] }
 0x9c4   :  { %6690 = vmatprep.mubr.f32.mxu1 %v15706_v42  ;;  %6761 = vmatprep.mubr.f32.mxu0 %v15706_v42 }
 0x9c6   :  { %10451 = vmatpush1.bf16.msra.mxu1 %v14142_v43  ;;  %10467 = vmatpush1.bf16.msra.mxu0 %v15965_v58  ;;  %v565_v58 = vrot.slane %v14644_v23, %v12215_v55 }
 0x9c7   :  { %10453 = vmatprep.subr.bf16.mxu1 %v14154_v44  ;;  %10469 = vmatprep.subr.bf16.mxu0 %v14156_v2  ;;  %v573_v44 = vrot.slane %v14644_v23, %v12229_v60 }
 0x9ca   :  { %10455 = vmatpush1.bf16.msra.mxu1 %v14180_v28  ;;  %10471 = vmatpush1.bf16.msra.mxu0 %v14182_v0  ;;  %v15967_v0 = vld [vmem:[#allocation138_spill] sm:$0xff] }
 0x9cb   :  { %10457 = vmatprep.subr.bf16.mxu1 %v14189_v13  ;;  %10473 = vmatprep.subr.bf16.mxu0 %v14191_v14  ;;  %v15966_v14 = vld [vmem:[#allocation137_spill] sm:$0xff]  ;;  %v14658_v28 = vadd.f32 %v15967_v0, %v573_v44  ;;  %v569_v44 = vrot.slane %v14644_v23, %v12524_v30  ;;  %v581_v0 = vrot.slane %v14644_v23, %v12539_v11 }
 0x9cc   :  { %v14655_v13 = vadd.f32 %v15966_v14, %v565_v58  ;;  %v15982_v14 = vld [vmem:[#allocation25_spill] sm:$0xff]  ;;  %v589_v58 = vrot.slane %v14644_v23, %v12548_v8 }
 0x9ce   :  { %10459 = vmatpush1.bf16.msra.mxu1 %v14204_v54  ;;  %10475 = vmatpush1.bf16.msra.mxu0 %v14206_v53 }
 0x9cf   :  { %10477 = vmatprep.subr.bf16.mxu1 %v12231_v62  ;;  %10509 = vmatprep.subr.bf16.mxu0 %v12239_v6  ;;  %v15968_v62 = vld [vmem:[#allocation6_spill] sm:$0xff]  ;;  %v15969_v6 = vld [vmem:[#allocation7_spill] sm:$0xff] }
 0x9d1   :  { %8703 = vmatmul.mubr.msk.f32.vlgmr.msra.gmra.mrb[80].mxu1 %vm4603_vm2, %v14577_v15  ;;  %8704 = vmatmul.mubr.msk.f32.vlgmr.msra.gmra.mrb[88].mxu0 %vm4603_vm2, %v14577_v15  ;;  %v15983_v15 = vld [vmem:[#allocation134_spill] sm:$0xff] }
 0x9d2   :  { %10479 = vmatpush3.bf16.msra.mxu1 %v12257_v17  ;;  %6912 = vmatprep.mubr.f32.mxu1 %v14655_v13  ;;  %v15970_v17 = vld [vmem:[#allocation8_spill] sm:$0xff] }
 0x9d3   :  { %10511 = vmatpush3.bf16.msra.mxu0 %v12266_v21  ;;  %6982 = vmatprep.mubr.f32.mxu0 %v14658_v28  ;;  %v15971_v21 = vld [vmem:[#allocation9_spill] sm:$0xff] }
 0x9d4   :  { %10481 = vmatprep.subr.bf16.mxu1 %v12278_v26  ;;  %10513 = vmatprep.subr.bf16.mxu0 %v12293_v33  ;;  %v15972_v26 = vld [vmem:[#allocation10_spill] sm:$0xff]  ;;  %v15973_v33 = vld [vmem:[#allocation11_spill] sm:$0xff] }
 0x9d6   :  { %10483 = vmatpush3.bf16.msra.mxu1 %v12306_v10  ;;  %v15974_v10 = vld [vmem:[#allocation13_spill] sm:$0xff] }
 0x9d7   :  { %10515 = vmatpush3.bf16.msra.mxu0 %v12310_v45  ;;  %10485 = vmatprep.subr.bf16.mxu1 %v12312_v47  ;;  %v15975_v45 = vld [vmem:[#allocation14_spill] sm:$0xff]  ;;  %v15976_v47 = vld [vmem:[#allocation15_spill] sm:$0xff] }
 0x9d8   :  { %10517 = vmatprep.subr.bf16.mxu0 %v12325_v49  ;;  %v15977_v49 = vld [vmem:[#allocation16_spill] sm:$0xff] }
 0x9da   :  { %10487 = vmatpush3.bf16.msra.mxu1 %v12344_v56  ;;  %v15978_v56 = vld [vmem:[#allocation18_spill] sm:$0xff] }
 0x9db   :  { %10519 = vmatpush3.bf16.msra.mxu0 %v12348_v57  ;;  %10489 = vmatprep.subr.bf16.mxu1 %v12350_v3  ;;  %v15979_v57 = vld [vmem:[#allocation22_spill] sm:$0xff]  ;;  %v561_v3 = vrot.slane %v14644_v23, %v12506_v35 }
 0x9dc   :  { %10521 = vmatprep.subr.bf16.mxu0 %v12362_v7  ;;  %v15980_v7 = vld [vmem:[#allocation23_spill] sm:$0xff] }
 0x9de   :  { %10491 = vmatpush3.bf16.msra.mxu1 %v12380_v18  ;;  %v15981_v18 = vld [vmem:[#allocation24_spill] sm:$0xff] }
 0x9df   :  { %10523 = vmatpush3.bf16.msra.mxu0 %v15968_v62  ;;  %10493 = vmatprep.subr.bf16.mxu1 %v15969_v6  ;;  %v14704_v62 = vadd.f32 %v15983_v15, %v561_v3  ;;  %v15984_v6 = vld [vmem:[#allocation136_spill] sm:$0xff]  ;;  %v16005_v15 = vld [vmem:[#allocation51_spill] sm:$0xff] }
 0x9e0   :  { %10525 = vmatprep.subr.bf16.mxu0 %v15970_v17  ;;  %v14709_v17 = vadd.f32 %v15984_v6, %v569_v44  ;;  %v15998_v3 = vld [vmem:[#allocation44_spill] sm:$0xff]  ;;  %v16001_v44 = vld [vmem:[#allocation47_spill] sm:$0xff] }
 0x9e1   :  { %v16006_v6 = vld [vmem:[#allocation52_spill] sm:$0xff] }
 0x9e2   :  { %10495 = vmatpush3.bf16.msra.mxu1 %v15971_v21  ;;  %v15985_v21 = vld [vmem:[#allocation148_spill] sm:$0xff] }
 0x9e3   :  { %10527 = vmatpush3.bf16.msra.mxu0 %v15972_v26  ;;  %10497 = vmatprep.subr.bf16.mxu1 %v15973_v33  ;;  %v14713_v26 = vadd.f32 %v15985_v21, %v581_v0  ;;  %v15986_v33 = vld [vmem:[#allocation150_spill] sm:$0xff]  ;;  %v16003_v0 = vld [vmem:[#allocation49_spill] sm:$0xff] }
 0x9e4   :  { %10529 = vmatprep.subr.bf16.mxu0 %v15974_v10  ;;  %v14717_v10 = vadd.f32 %v15986_v33, %v589_v58  ;;  %v16004_v58 = vld [vmem:[#allocation50_spill] sm:$0xff]  ;;  %v16007_v21 = vld [vmem:[#allocation53_spill] sm:$0xff]  ;;  %v16008_v33 = vld [vmem:[#allocation55_spill] sm:$0xff] }
 0x9e6   :  { %10499 = vmatpush3.bf16.msra.mxu1 %v15975_v45  ;;  %v15991_v45 = vld [vmem:[#allocation37_spill] sm:$0xff] }
 0x9e7   :  { %10531 = vmatpush3.bf16.msra.mxu0 %v15976_v47  ;;  %10501 = vmatprep.subr.bf16.mxu1 %v15977_v49  ;;  %v15992_v47 = vld [vmem:[#allocation38_spill] sm:$0xff]  ;;  %v15993_v49 = vld [vmem:[#allocation39_spill] sm:$0xff] }
 0x9e8   :  { %10533 = vmatprep.subr.bf16.mxu0 %v15978_v56  ;;  %v15995_v56 = vld [vmem:[#allocation41_spill] sm:$0xff] }
 0x9ea   :  { %10503 = vmatpush3.bf16.msra.mxu1 %v15979_v57  ;;  %v15997_v57 = vld [vmem:[#allocation43_spill] sm:$0xff] }
 0x9eb   :  { %10535 = vmatpush3.bf16.msra.mxu0 %v15980_v7  ;;  %10505 = vmatprep.subr.bf16.mxu1 %v15981_v18  ;;  %v15999_v7 = vld [vmem:[#allocation45_spill] sm:$0xff]  ;;  %v16000_v18 = vld [vmem:[#allocation46_spill] sm:$0xff] }
 0x9ec   :  { %10537 = vmatprep.subr.bf16.mxu0 %v15982_v14  ;;  %v16002_v14 = vld [vmem:[#allocation48_spill] sm:$0xff] }
 0x9ee   :  { %10507 = vmatpush3.bf16.msra.mxu1 %v15780_v32  ;;  %v15990_v32 = vld [vmem:[#allocation36_spill] sm:$0xff] }
 0x9ef   :  { %10539 = vmatpush3.bf16.msra.mxu0 %v15783_v50  ;;  %10541 = vmatprep.subr.bf16.mxu1 %v15784_v34  ;;  %v15987_v50 = vld [vmem:[#allocation31_spill] sm:$0xff] }
 0x9f0   :  { %10573 = vmatprep.subr.bf16.mxu0 %v12570_v1  ;;  %v15988_v1 = vld [vmem:[#allocation33_spill] sm:$0xff]  ;;  %v15989_v34 = vld [vmem:[#allocation35_spill] sm:$0xff] }
 0x9f1   :  { %6913 = vmatmul.mubr.f32.vlgmr.msra.gmra.mrb[82].mxu1 %v14704_v62 }
 0x9f2   :  { %6983 = vmatmul.mubr.f32.vlgmr.msra.gmra.mrb[90].mxu0 %v14709_v17  ;;  %10543 = vmatpush3.bf16.msra.mxu1 %v12589_v48  ;;  %v15994_v48 = vld [vmem:[#allocation40_spill] sm:$0xff] }
 0x9f3   :  { %7052 = vmatprep.mubr.f32.mxu1 %v14713_v26  ;;  %10575 = vmatpush3.bf16.msra.mxu0 %v12602_v51  ;;  %v15996_v51 = vld [vmem:[#allocation42_spill] sm:$0xff] }
 0x9f4   :  { %7122 = vmatprep.mubr.f32.mxu0 %v14717_v10  ;;  %10545 = vmatprep.subr.bf16.mxu1 %v15987_v50  ;;  %v14749_v50 = vld [vmem:[%s15141_s2 + $0x28] sm:$0xff] }
 0x9f5   :  { %10577 = vmatprep.subr.bf16.mxu0 %v15988_v1  ;;  %v16009_v1 = vld [vmem:[#allocation59_spill] sm:$0xff] }
 0x9f6   :  { %10547 = vmatpush3.bf16.msra.mxu1 %v15989_v34  ;;  %v577_v34 = vrot.slane %v14644_v23, %v12838_v25  ;;  %v16014_v23 = vld [vmem:[#allocation65_spill] sm:$0xff] }
 0x9f7   :  { %10579 = vmatpush3.bf16.msra.mxu0 %v15990_v32  ;;  %10549 = vmatprep.subr.bf16.mxu1 %v15991_v45  ;;  %v16010_v32 = vld [vmem:[#allocation60_spill] sm:$0xff]  ;;  %v16011_v45 = vld [vmem:[#allocation61_spill] sm:$0xff] }
 0x9f8   :  { %10581 = vmatprep.subr.bf16.mxu0 %v15992_v47  ;;  %v16012_v47 = vld [vmem:[#allocation62_spill] sm:$0xff] }
 0x9fa   :  { %10551 = vmatpush3.bf16.msra.mxu1 %v15993_v49  ;;  %v597_v49 = vrot.slane %v14749_v50, %v12215_v55  ;;  %v16017_v55 = vld [vmem:[#allocation154_spill] sm:$0xff] }
 0x9fb   :  { %10583 = vmatpush3.bf16.msra.mxu0 %v15994_v48  ;;  %10553 = vmatprep.subr.bf16.mxu1 %v15995_v56  ;;  %v605_v48 = vrot.slane %v14749_v50, %v12229_v60  ;;  %v16013_v56 = vld [vmem:[#allocation147_spill] sm:$0xff]  ;;  %v16018_v60 = vld [vmem:[#allocation149_spill] sm:$0xff] }
 0x9fc   :  { %10585 = vmatprep.subr.bf16.mxu0 %v15996_v51  ;;  %v14763_v51 = vadd.f32 %v16013_v56, %v577_v34  ;;  %v16030_v34 = vld [vmem:[#allocation82_spill] sm:$0xff]  ;;  %v16036_v56 = vld [vmem:[#allocation88_spill] sm:$0xff] }
 0x9fe   :  { %10555 = vmatpush3.bf16.msra.mxu1 %v15997_v57  ;;  %v16015_v57 = vld [vmem:[#allocation66_spill] sm:$0xff] }
 0x9ff   :  { %10587 = vmatpush3.bf16.msra.mxu0 %v15998_v3  ;;  %10557 = vmatprep.subr.bf16.mxu1 %v15999_v7  ;;  %v16016_v3 = vld [vmem:[#allocation153_spill] sm:$0xff] }
 0xa00   :  { %10589 = vmatprep.subr.bf16.mxu0 %v16000_v18  ;;  %v14769_v7 = vadd.f32 %v16016_v3, %v597_v49  ;;  %v14773_v18 = vadd.f32 %v16017_v55, %v605_v48  ;;  %v16034_v49 = vld [vmem:[#allocation86_spill] sm:$0xff]  ;;  %v16035_v48 = vld [vmem:[#allocation87_spill] sm:$0xff]  ;;  %v16040_v55 = vld [vmem:[#allocation92_spill] sm:$0xff] }
 0xa01   :  { %v16039_v3 = vld [vmem:[#allocation91_spill] sm:$0xff] }
 0xa02   :  { %10559 = vmatpush3.bf16.msra.mxu1 %v16001_v44  ;;  %v16020_v44 = vld [vmem:[#allocation69_spill] sm:$0xff] }
 0xa03   :  { %10591 = vmatpush3.bf16.msra.mxu0 %v16002_v14  ;;  %10561 = vmatprep.subr.bf16.mxu1 %v16003_v0  ;;  %v16022_v14 = vld [vmem:[#allocation73_spill] sm:$0xff]  ;;  %v16023_v0 = vld [vmem:[#allocation75_spill] sm:$0xff] }
 0xa04   :  { %10593 = vmatprep.subr.bf16.mxu0 %v16004_v58  ;;  %v16024_v58 = vld [vmem:[#allocation76_spill] sm:$0xff] }
 0xa06   :  { %10563 = vmatpush3.bf16.msra.mxu1 %v16005_v15  ;;  %v16025_v15 = vld [vmem:[#allocation77_spill] sm:$0xff] }
 0xa07   :  { %10595 = vmatpush3.bf16.msra.mxu0 %v16006_v6  ;;  %10565 = vmatprep.subr.bf16.mxu1 %v16007_v21  ;;  %v16026_v6 = vld [vmem:[#allocation78_spill] sm:$0xff]  ;;  %v16027_v21 = vld [vmem:[#allocation79_spill] sm:$0xff] }
 0xa08   :  { %10597 = vmatprep.subr.bf16.mxu0 %v16008_v33  ;;  %v16028_v33 = vld [vmem:[#allocation80_spill] sm:$0xff] }
 0xa0a   :  { %10567 = vmatpush3.bf16.msra.mxu1 %v16009_v1  ;;  %v16029_v1 = vld [vmem:[#allocation81_spill] sm:$0xff] }
 0xa0b   :  { %10599 = vmatpush3.bf16.msra.mxu0 %v16010_v32  ;;  %10569 = vmatprep.subr.bf16.mxu1 %v16011_v45  ;;  %v16031_v32 = vld [vmem:[#allocation83_spill] sm:$0xff]  ;;  %v16032_v45 = vld [vmem:[#allocation84_spill] sm:$0xff] }
 0xa0c   :  { %10601 = vmatprep.subr.bf16.mxu0 %v16012_v47  ;;  %v16033_v47 = vld [vmem:[#allocation85_spill] sm:$0xff] }
 0xa0e   :  { %10571 = vmatpush3.bf16.msra.mxu1 %v15816_v29  ;;  %v16019_v29 = vld [vmem:[#allocation67_spill] sm:$0xff] }
 0xa0f   :  { %10603 = vmatpush3.bf16.msra.mxu0 %v15819_v61  ;;  %10605 = vmatprep.subr.bf16.mxu1 %v16014_v23  ;;  %v16021_v61 = vld [vmem:[#allocation71_spill] sm:$0xff]  ;;  %v16037_v23 = vld [vmem:[#allocation89_spill] sm:$0xff] }
 0xa10   :  { %10637 = vmatprep.subr.bf16.mxu0 %v16015_v57  ;;  %v16038_v57 = vld [vmem:[#allocation90_spill] sm:$0xff] }
 0xa11   :  { %7053 = vmatmul.mubr.f32.vlgmr.msra.gmra.mrb[84].mxu1 %v14763_v51 }
 0xa12   :  { %7123 = vmatmul.mubr.f32.vlgmr.msra.gmra.mrb[92].mxu0 %v16018_v60  ;;  %10607 = vmatpush3.bf16.msra.mxu1 %v16019_v29  ;;  %v16041_v29 = vld [vmem:[#allocation93_spill] sm:$0xff] }
 0xa13   :  { %7192 = vmatprep.mubr.f32.mxu1 %v14769_v7  ;;  %10639 = vmatpush3.bf16.msra.mxu0 %v16020_v44  ;;  %v16042_v44 = vld [vmem:[#allocation95_spill] sm:$0xff] }
 0xa14   :  { %7262 = vmatprep.mubr.f32.mxu0 %v14773_v18  ;;  %10609 = vmatprep.subr.bf16.mxu1 %v16021_v61  ;;  %v16043_v61 = vld [vmem:[#allocation99_spill] sm:$0xff] }
 0xa15   :  { %10641 = vmatprep.subr.bf16.mxu0 %v16022_v14  ;;  %v593_v14 = vrot.slane %v14749_v50, %v12506_v35  ;;  %v16049_v35 = vld [vmem:[#allocation104_spill] sm:$0xff] }
 0xa16   :  { %10611 = vmatpush3.bf16.msra.mxu1 %v16023_v0  ;;  %v16044_v0 = vld [vmem:[#allocation100_spill] sm:$0xff] }
 0xa17   :  { %10643 = vmatpush3.bf16.msra.mxu0 %v16024_v58  ;;  %10613 = vmatprep.subr.bf16.mxu1 %v16025_v15  ;;  %v16045_v58 = vld [vmem:[#allocation101_spill] sm:$0xff]  ;;  %v601_v15 = vrot.slane %v14749_v50, %v12524_v30  ;;  %v16052_v30 = vld [vmem:[#allocation106_spill] sm:$0xff] }
 0xa18   :  { %10645 = vmatprep.subr.bf16.mxu0 %v16026_v6  ;;  %v16046_v6 = vld [vmem:[#allocation102_spill] sm:$0xff] }
 0xa1a   :  { %10615 = vmatpush3.bf16.msra.mxu1 %v16027_v21  ;;  %v613_v21 = vrot.slane %v14749_v50, %v12539_v11  ;;  %v16054_v11 = vld [vmem:[#allocation158_spill] sm:$0xff] }
 0xa1b   :  { %10647 = vmatpush3.bf16.msra.mxu0 %v16028_v33  ;;  %10617 = vmatprep.subr.bf16.mxu1 %v16029_v1  ;;  %v621_v33 = vrot.slane %v14749_v50, %v12548_v8  ;;  %v16047_v1 = vld [vmem:[#allocation103_spill] sm:$0xff] }
 0xa1c   :  { %10649 = vmatprep.subr.bf16.mxu0 %v16030_v34  ;;  %v16048_v34 = vld [vmem:[#allocation151_spill] sm:$0xff] }
 0xa1d   :  { %v14829_v8 = vadd.f32 %v16054_v11, %v621_v33  ;;  %v16069_v33 = vld [vmem:[#allocation124_spill] sm:$0xff] }
 0xa1e   :  { %10619 = vmatpush3.bf16.msra.mxu1 %v16031_v32  ;;  %v14816_v32 = vadd.f32 %v16048_v34, %v593_v14  ;;  %v16063_v14 = vld [vmem:[#allocation118_spill] sm:$0xff]  ;;  %v16077_v11 = vld [vmem:[#allocation132_spill] sm:$0xff] }
 0xa1f   :  { %10651 = vmatpush3.bf16.msra.mxu0 %v16032_v45  ;;  %10621 = vmatprep.subr.bf16.mxu1 %v16033_v47  ;;  %v16050_v45 = vld [vmem:[#allocation105_spill] sm:$0xff]  ;;  %v16051_v47 = vld [vmem:[#allocation152_spill] sm:$0xff]  ;;  %16055 = vst [vmem:[#allocation56_spill] sm:$0xff] %v14829_v8  ;;  %v16071_v34 = vld [vmem:[#allocation126_spill] sm:$0xff] }
 0xa20   :  { %10653 = vmatprep.subr.bf16.mxu0 %v16034_v49  ;;  %v14821_v49 = vadd.f32 %v16051_v47, %v601_v15  ;;  %v16066_v15 = vld [vmem:[#allocation121_spill] sm:$0xff] }
 0xa21   :  { %v16074_v47 = vld [vmem:[#allocation129_spill] sm:$0xff] }
 0xa22   :  { %10623 = vmatpush3.bf16.msra.mxu1 %v16035_v48  ;;  %v16053_v48 = vld [vmem:[#allocation157_spill] sm:$0xff] }
 0xa23   :  { %10655 = vmatpush3.bf16.msra.mxu0 %v16036_v56  ;;  %10625 = vmatprep.subr.bf16.mxu1 %v16037_v23  ;;  %v14825_v56 = vadd.f32 %v16053_v48, %v613_v21  ;;  %v16056_v23 = vld [vmem:[#allocation107_spill] sm:$0xff] }
 0xa24   :  { %10657 = vmatprep.subr.bf16.mxu0 %v16038_v57  ;;  %v16057_v57 = vld [vmem:[#allocation109_spill] sm:$0xff]  ;;  %v16068_v21 = vld [vmem:[#allocation123_spill] sm:$0xff] }
 0xa25   :  { %v16076_v48 = vld [vmem:[#allocation131_spill] sm:$0xff] }
 0xa26   :  { %10627 = vmatpush3.bf16.msra.mxu1 %v16039_v3  ;;  %v16058_v3 = vld [vmem:[#allocation111_spill] sm:$0xff] }
 0xa27   :  { %10659 = vmatpush3.bf16.msra.mxu0 %v16040_v55  ;;  %10629 = vmatprep.subr.bf16.mxu1 %v16041_v29  ;;  %v16059_v55 = vld [vmem:[#allocation113_spill] sm:$0xff]  ;;  %v16060_v29 = vld [vmem:[#allocation115_spill] sm:$0xff] }
 0xa28   :  { %10661 = vmatprep.subr.bf16.mxu0 %v16042_v44  ;;  %v16061_v44 = vld [vmem:[#allocation116_spill] sm:$0xff] }
 0xa2a   :  { %10631 = vmatpush3.bf16.msra.mxu1 %v16043_v61  ;;  %v16062_v61 = vld [vmem:[#allocation117_spill] sm:$0xff] }
 0xa2b   :  { %10663 = vmatpush3.bf16.msra.mxu0 %v16044_v0  ;;  %10633 = vmatprep.subr.bf16.mxu1 %v16045_v58  ;;  %v16064_v0 = vld [vmem:[#allocation119_spill] sm:$0xff]  ;;  %v16065_v58 = vld [vmem:[#allocation120_spill] sm:$0xff] }
 0xa2c   :  { %10665 = vmatprep.subr.bf16.mxu0 %v16046_v6  ;;  %v16067_v6 = vld [vmem:[#allocation122_spill] sm:$0xff] }
 0xa2e   :  { %10635 = vmatpush3.bf16.msra.mxu1 %v16047_v1  ;;  %v16070_v1 = vld [vmem:[#allocation125_spill] sm:$0xff] }
 0xa2f   :  { %10667 = vmatpush3.bf16.msra.mxu0 %v16049_v35  ;;  %10669 = vmatprep.subr.bf16.mxu1 %v16050_v45  ;;  %v16072_v35 = vld [vmem:[#allocation127_spill] sm:$0xff]  ;;  %v16073_v45 = vld [vmem:[#allocation128_spill] sm:$0xff] }
 0xa30   :  { %10701 = vmatprep.subr.bf16.mxu0 %v16052_v30  ;;  %v16075_v30 = vld [vmem:[#allocation130_spill] sm:$0xff] }
 0xa31   :  { %7193 = vmatmul.mubr.f32.vlgmr.msra.gmra.mrb[86].mxu1 %v14816_v32 }
 0xa32   :  { %7263 = vmatmul.mubr.f32.vlgmr.msra.gmra.mrb[94].mxu0 %v14821_v49  ;;  %10671 = vmatpush3.bf16.msra.mxu1 %v16056_v23  ;;  %v16078_v23 = vld [vmem:[#allocation133_spill] sm:$0xff] }
 0xa33   :  { %7332 = vmatprep.mubr.f32.mxu1 %v14825_v56  ;;  %10703 = vmatpush3.bf16.msra.mxu0 %v16057_v57  ;;  %v16079_v57 = vld [vmem:[#allocation135_spill] sm:$0xff] }
 0xa34   :  { %7402 = vmatprep.mubr.f32.mxu0 %v14829_v8  ;;  %10673 = vmatprep.subr.bf16.mxu1 %v16058_v3  ;;  %v16080_v3 = vld [vmem:[#allocation139_spill] sm:$0xff] }
 0xa35   :  { %10705 = vmatprep.subr.bf16.mxu0 %v16059_v55  ;;  %v609_v55 = vrot.slane %v14749_v50, %v12838_v25 }
 0xa36   :  { %10675 = vmatpush3.bf16.msra.mxu1 %v16060_v29  ;;  %v16081_v29 = vld [vmem:[#allocation140_spill] sm:$0xff] }
 0xa37   :  { %10707 = vmatpush3.bf16.msra.mxu0 %v16061_v44  ;;  %10677 = vmatprep.subr.bf16.mxu1 %v16062_v61  ;;  %v16082_v44 = vld [vmem:[#allocation141_spill] sm:$0xff]  ;;  %v16083_v61 = vld [vmem:[#allocation12_spill] sm:$0xff] }
 0xa38   :  { %10709 = vmatprep.subr.bf16.mxu0 %v16063_v14  ;;  %v617_v14 = vrot.slane %v14749_v50, %v16083_v61  ;;  %v16089_v50 = vld [vmem:[#allocation163_spill] sm:$0xff] }
 0xa3a   :  { %10679 = vmatpush3.bf16.msra.mxu1 %v16064_v0  ;;  %v16084_v0 = vld [vmem:[#allocation142_spill] sm:$0xff] }
 0xa3b   :  { %10711 = vmatpush3.bf16.msra.mxu0 %v16065_v58  ;;  %10681 = vmatprep.subr.bf16.mxu1 %v16066_v15  ;;  %v16085_v58 = vld [vmem:[#allocation143_spill] sm:$0xff] }
 0xa3c   :  { %10713 = vmatprep.subr.bf16.mxu0 %v16067_v6  ;;  %v16086_v15 = vld [vmem:[#allocation155_spill] sm:$0xff] }
 0xa3d   :  { %v14868_v6 = vadd.f32 %v16086_v15, %v609_v55 }
 0xa3e   :  { %10683 = vmatpush3.bf16.msra.mxu1 %v16068_v21  ;;  %v16087_v21 = vld [vmem:[#allocation144_spill] sm:$0xff] }
 0xa3f   :  { %10715 = vmatpush3.bf16.msra.mxu0 %v16069_v33  ;;  %10685 = vmatprep.subr.bf16.mxu1 %v16070_v1  ;;  %v16088_v33 = vld [vmem:[#allocation156_spill] sm:$0xff] }
 0xa40   :  { %10717 = vmatprep.subr.bf16.mxu0 %v16071_v34  ;;  %v14873_v25 = vadd.f32 %v16088_v33, %v617_v14 }
 0xa42   :  { %10687 = vmatpush3.bf16.msra.mxu1 %v16072_v35 }
 0xa43   :  { %10719 = vmatpush3.bf16.msra.mxu0 %v16073_v45  ;;  %10689 = vmatprep.subr.bf16.mxu1 %v16074_v47 }
 0xa44   :  { %10721 = vmatprep.subr.bf16.mxu0 %v16075_v30 }
 0xa46   :  { %10691 = vmatpush3.bf16.msra.mxu1 %v16076_v48 }
 0xa47   :  { %10723 = vmatpush3.bf16.msra.mxu0 %v16077_v11  ;;  %10693 = vmatprep.subr.bf16.mxu1 %v16078_v23  ;;  %v16090_v23 = vld [vmem:[#allocation26_spill] sm:$0xff] }
 0xa48   :  { %10725 = vmatprep.subr.bf16.mxu0 %v16079_v57 }
 0xa4a   :  { %10695 = vmatpush3.bf16.msra.mxu1 %v16080_v3  ;;  %v16091_v3 = vld [vmem:[#allocation2_spill] sm:$0xff] }
 0xa4b   :  { %10727 = vmatpush3.bf16.msra.mxu0 %v16081_v29  ;;  %10697 = vmatprep.subr.bf16.mxu1 %v16082_v44  ;;  %v16092_v29 = vld [vmem:[#allocation223_spill] sm:$0xff] }
 0xa4c   :  { %10729 = vmatprep.subr.bf16.mxu0 %v16084_v0 }
 0xa4e   :  { %10699 = vmatpush3.bf16.msra.mxu1 %v16085_v58 }
 0xa4f   :  { %10731 = vmatpush3.bf16.msra.mxu0 %v16087_v21  ;;  %9655 = vmatprep.subr.mxu1 %v15706_v42 }
 0xa50   :  { %9679 = vmatprep.subr.mxu0 %v15706_v42 }
 0xa51   :  { %7333 = vmatmul.mubr.f32.vlgmr.msra.gmra.mrb[88].mxu1 %v14868_v6 }
 0xa52   :  { %7403 = vmatmul.mubr.f32.vlgmr.msra.gmra.mrb[96].mxu0 %v14873_v25  ;;  %9657 = vmatprep.mubr.msk.f32.mxu1 %vm10896_vm0, %v15706_v42 }
 0xa53   :  { %9680 = vmatpush3.msk.msra.mxu0 %vm4682_vm3, %v14560_v24  ;;  %9681 = vmatprep.mubr.msk.f32.mxu0 %vm10896_vm0, %v15706_v42  ;;  %v16093_v24 = vld [vmem:[#allocation224_spill] sm:$0xff] }
 0xa54   :  { %10745 = vmatprep.subr.bf16.mxu0 %v16089_v50 }
 0xa74   :  { %v6266_v1 = vpop.f32.mrb[74].mxu1  ;;  %v6337_v34 = vpop.f32.mrb[82].mxu0 }
 0xa75   :  { %v6768_v35 = vsub.f32 0.0, %v6266_v1  ;;  %v6770_v45 = vsub.f32 0.0, %v6337_v34  ;;  %v6268_v47 = vpop.f32.mrb[75].mxu1  ;;  %v6339_v30 = vpop.f32.mrb[83].mxu0 }
 0xa76   :  { %v6769_v48 = vsub.f32 0.0, %v6268_v47  ;;  %v6771_v11 = vsub.f32 0.0, %v6339_v30 }
 0xa77   :  { %v6784_v57 = vmax.f32 %v6768_v35, %v16090_v23  ;;  %v6786_v55 = vmax.f32 %v6770_v45, %v16091_v3 }
 0xa78   :  { %v6785_v44 = vmax.f32 %v6769_v48, %v16092_v29  ;;  %v6787_v61 = vmax.f32 %v6771_v11, %v16093_v24 }
 0xa79   :  { %v6800_v14 = vmin.f32 %v6266_v1, %v6784_v57  ;;  %v6802_v0 = vmin.f32 %v6337_v34, %v6786_v55 }
 0xa7a   :  { %v6801_v58 = vmin.f32 %v6268_v47, %v6785_v44  ;;  %v6803_v15 = vmin.f32 %v6339_v30, %v6787_v61 }
 0xa7b   :  { %v6816_v21 = vsub.f32 %v16090_v23, %v6800_v14  ;;  %v6818_v33 = vsub.f32 %v16091_v3, %v6802_v0  ;;  %v16094_v23 = vld [vmem:[#allocation3_spill] sm:$0xff]  ;;  %v16095_v3 = vld [vmem:[#allocation20_spill] sm:$0xff] }
 0xa7c   :  { %v6817_v50 = vsub.f32 %v16092_v29, %v6801_v58  ;;  %v6819_v8 = vsub.f32 %v16093_v24, %v6803_v15  ;;  %v16096_v29 = vld [vmem:[#allocation27_spill] sm:$0xff]  ;;  %v16097_v24 = vld [vmem:[#allocation28_spill] sm:$0xff] }
 0xa7d   :  { %6832 = vst [vmem:[%s15147_s9] sm:$0xff] %v6816_v21  ;;  %6834 = vst [vmem:[%s15147_s9 + $0x10] sm:$0xff] %v6818_v33 }
 0xa7e   :  { %6833 = vst [vmem:[%s15147_s9 + $0x8] sm:$0xff] %v6817_v50  ;;  %6835 = vst [vmem:[%s15147_s9 + $0x18] sm:$0xff] %v6819_v8 }
 0xa84   :  { %v6408_v1 = vpop.f32.mrb[76].mxu1  ;;  %v6479_v34 = vpop.f32.mrb[84].mxu0 }
 0xa85   :  { %v6772_v35 = vsub.f32 0.0, %v6408_v1  ;;  %v6774_v45 = vsub.f32 0.0, %v6479_v34  ;;  %v6410_v47 = vpop.f32.mrb[77].mxu1  ;;  %v6481_v30 = vpop.f32.mrb[85].mxu0 }
 0xa86   :  { %v6773_v48 = vsub.f32 0.0, %v6410_v47  ;;  %v6775_v11 = vsub.f32 0.0, %v6481_v30 }
 0xa87   :  { %v6788_v57 = vmax.f32 %v6772_v35, %v16094_v23  ;;  %v6790_v55 = vmax.f32 %v6774_v45, %v16095_v3 }
 0xa88   :  { %v6789_v44 = vmax.f32 %v6773_v48, %v16096_v29  ;;  %v6791_v61 = vmax.f32 %v6775_v11, %v16097_v24 }
 0xa89   :  { %v6804_v14 = vmin.f32 %v6408_v1, %v6788_v57  ;;  %v6806_v0 = vmin.f32 %v6479_v34, %v6790_v55 }
 0xa8a   :  { %v6805_v58 = vmin.f32 %v6410_v47, %v6789_v44  ;;  %v6807_v8 = vmin.f32 %v6481_v30, %v6791_v61 }
 0xa8b   :  { %v6820_v15 = vsub.f32 %v16094_v23, %v6804_v14  ;;  %v6822_v21 = vsub.f32 %v16095_v3, %v6806_v0  ;;  %v16098_v23 = vld [vmem:[#allocation63_spill] sm:$0xff]  ;;  %v16099_v3 = vld [vmem:[#allocation17_spill] sm:$0xff] }
 0xa8c   :  { %v6821_v33 = vsub.f32 %v16096_v29, %v6805_v58  ;;  %v6823_v50 = vsub.f32 %v16097_v24, %v6807_v8  ;;  %v16100_v29 = vld [vmem:[#allocation19_spill] sm:$0xff]  ;;  %v16101_v24 = vld [vmem:[#allocation21_spill] sm:$0xff] }
 0xa8d   :  { %6836 = vst [vmem:[%s15147_s9 + $0x20] sm:$0xff] %v6820_v15  ;;  %6838 = vst [vmem:[%s15147_s9 + $0x30] sm:$0xff] %v6822_v21 }
 0xa8e   :  { %6837 = vst [vmem:[%s15147_s9 + $0x28] sm:$0xff] %v6821_v33  ;;  %6839 = vst [vmem:[%s15147_s9 + $0x38] sm:$0xff] %v6823_v50 }
 0xa94   :  { %v6550_v1 = vpop.f32.mrb[78].mxu1  ;;  %v6621_v34 = vpop.f32.mrb[86].mxu0 }
 0xa95   :  { %v6776_v35 = vsub.f32 0.0, %v6550_v1  ;;  %v6778_v45 = vsub.f32 0.0, %v6621_v34  ;;  %v6552_v47 = vpop.f32.mrb[79].mxu1  ;;  %v6623_v30 = vpop.f32.mrb[87].mxu0 }
 0xa96   :  { %v6777_v48 = vsub.f32 0.0, %v6552_v47  ;;  %v6779_v11 = vsub.f32 0.0, %v6623_v30 }
 0xa97   :  { %v6792_v57 = vmax.f32 %v6776_v35, %v16098_v23  ;;  %v6794_v55 = vmax.f32 %v6778_v45, %v16099_v3 }
 0xa98   :  { %v6793_v44 = vmax.f32 %v6777_v48, %v16100_v29  ;;  %v6795_v61 = vmax.f32 %v6779_v11, %v16101_v24 }
 0xa99   :  { %v6808_v14 = vmin.f32 %v6550_v1, %v6792_v57  ;;  %v6810_v0 = vmin.f32 %v6621_v34, %v6794_v55 }
 0xa9a   :  { %v6809_v58 = vmin.f32 %v6552_v47, %v6793_v44  ;;  %v6811_v8 = vmin.f32 %v6623_v30, %v6795_v61 }
 0xa9b   :  { %v6824_v15 = vsub.f32 %v16098_v23, %v6808_v14  ;;  %v6826_v21 = vsub.f32 %v16099_v3, %v6810_v0  ;;  %v16102_v23 = vld [vmem:[#allocation58_spill] sm:$0xff] }
 0xa9c   :  { %v6825_v33 = vsub.f32 %v16100_v29, %v6809_v58  ;;  %v6827_v50 = vsub.f32 %v16101_v24, %v6811_v8  ;;  %v16103_v3 = vld [vmem:[#allocation54_spill] sm:$0xff]  ;;  %v16104_v29 = vld [vmem:[#allocation64_spill] sm:$0xff]  ;;  %v16105_v24 = vld [vmem:[#allocation57_spill] sm:$0xff] }
 0xa9d   :  { %6840 = vst [vmem:[%s15147_s9 + $0x40] sm:$0xff] %v6824_v15  ;;  %6842 = vst [vmem:[%s15147_s9 + $0x50] sm:$0xff] %v6826_v21 }
 0xa9e   :  { %6841 = vst [vmem:[%s15147_s9 + $0x48] sm:$0xff] %v6825_v33  ;;  %6843 = vst [vmem:[%s15147_s9 + $0x58] sm:$0xff] %v6827_v50 }
 0xaa4   :  { %v6692_v1 = vpop.f32.mrb[80].mxu1  ;;  %v6763_v34 = vpop.f32.mrb[88].mxu0 }
 0xaa5   :  { %v6780_v35 = vsub.f32 0.0, %v6692_v1  ;;  %v6782_v45 = vsub.f32 0.0, %v6763_v34  ;;  %v6694_v47 = vpop.f32.mrb[81].mxu1  ;;  %v6765_v30 = vpop.f32.mrb[89].mxu0 }
 0xaa6   :  { %v6781_v48 = vsub.f32 0.0, %v6694_v47  ;;  %v6783_v11 = vsub.f32 0.0, %v6765_v30 }
 0xaa7   :  { %v6796_v57 = vmax.f32 %v6780_v35, %v16102_v23  ;;  %v6798_v55 = vmax.f32 %v6782_v45, %v16103_v3 }
 0xaa8   :  { %v6797_v44 = vmax.f32 %v6781_v48, %v16104_v29  ;;  %v6799_v61 = vmax.f32 %v6783_v11, %v16105_v24 }
 0xaa9   :  { %v6812_v14 = vmin.f32 %v6692_v1, %v6796_v57  ;;  %v6814_v0 = vmin.f32 %v6763_v34, %v6798_v55 }
 0xaaa   :  { %v6813_v58 = vmin.f32 %v6694_v47, %v6797_v44  ;;  %v6815_v8 = vmin.f32 %v6765_v30, %v6799_v61 }
 0xaab   :  { %v6828_v15 = vsub.f32 %v16102_v23, %v6812_v14  ;;  %v6830_v21 = vsub.f32 %v16103_v3, %v6814_v0 }
 0xaac   :  { %v6829_v33 = vsub.f32 %v16104_v29, %v6813_v58  ;;  %v6831_v50 = vsub.f32 %v16105_v24, %v6815_v8 }
 0xaad   :  { %6844 = vst [vmem:[%s15147_s9 + $0x60] sm:$0xff] %v6828_v15  ;;  %6846 = vst [vmem:[%s15147_s9 + $0x70] sm:$0xff] %v6830_v21 }
 0xaae   :  { %6845 = vst [vmem:[%s15147_s9 + $0x68] sm:$0xff] %v6829_v33  ;;  %6847 = vst [vmem:[%s15147_s9 + $0x78] sm:$0xff] %v6831_v50 }
 0xac4   :  { %v9336_v1 = vpop.f32.mrb[82].mxu1 }
 0xac5   :  { %v9371_v34 = vpop.f32.mrb[90].mxu0  ;;  %v9337_v35 = vpop.f32.mrb[83].mxu1 }
 0xac6   :  { %v9338_v45 = vadd.f32 %v9337_v35, %v9336_v1  ;;  %v9372_v47 = vpop.f32.mrb[91].mxu0 }
 0xac7   :  { %v9373_v30 = vadd.f32 %v9372_v47, %v9371_v34 }
 0xac9   :  { %v6985_v48 = vadd.f32 %v9373_v30, %v9338_v45 }
 0xae4   :  { %v9406_v11 = vpop.f32.mrb[84].mxu1 }
 0xae5   :  { %v9441_v23 = vpop.f32.mrb[92].mxu0  ;;  %v9407_v57 = vpop.f32.mrb[85].mxu1 }
 0xae6   :  { %v9408_v3 = vadd.f32 %v9407_v57, %v9406_v11  ;;  %v9442_v55 = vpop.f32.mrb[93].mxu0 }
 0xae7   :  { %v9443_v29 = vadd.f32 %v9442_v55, %v9441_v23  ;;  %v16115_v55 = vld [vmem:[#allocation175_spill] sm:$0xff] }
 0xae8   :  { %v7055_v44 = vadd.f32 %v9408_v3, %v6985_v48  ;;  %v16114_v3 = vld [vmem:[#allocation173_spill] sm:$0xff] }
 0xaea   :  { %v7125_v24 = vadd.f32 %v9443_v29, %v7055_v44  ;;  %v16116_v29 = vld [vmem:[#allocation177_spill] sm:$0xff]  ;;  %v16117_v44 = vld [vmem:[#allocation179_spill] sm:$0xff] }
 0xb04   :  { %v9476_v61 = vpop.f32.mrb[86].mxu1 }
 0xb05   :  { %v9511_v14 = vpop.f32.mrb[94].mxu0  ;;  %v9477_v0 = vpop.f32.mrb[87].mxu1 }
 0xb06   :  { %v9478_v58 = vadd.f32 %v9477_v0, %v9476_v61  ;;  %v9512_v8 = vpop.f32.mrb[95].mxu0 }
 0xb07   :  { %v9513_v15 = vadd.f32 %v9512_v8, %v9511_v14 }
 0xb08   :  { %v7195_v21 = vadd.f32 %v9478_v58, %v7125_v24 }
 0xb0a   :  { %v7265_v33 = vadd.f32 %v9513_v15, %v7195_v21  ;;  %v16118_v15 = vld [vmem:[#allocation181_spill] sm:$0xff]  ;;  %v16119_v21 = vld [vmem:[#allocation182_spill] sm:$0xff] }
 0xb24   :  { %v9546_v50 = vpop.f32.mrb[88].mxu1 }
 0xb25   :  { %v9581_v1 = vpop.f32.mrb[96].mxu0  ;;  %v9547_v34 = vpop.f32.mrb[89].mxu1 }
 0xb26   :  { %v9548_v35 = vadd.f32 %v9547_v34, %v9546_v50  ;;  %v9582_v45 = vpop.f32.mrb[97].mxu0  ;;  %v16121_v50 = vld [vmem:[#allocation184_spill] sm:$0xff]  ;;  %v16123_v34 = vld [vmem:[#allocation186_spill] sm:$0xff] }
 0xb27   :  { %v9583_v47 = vadd.f32 %v9582_v45, %v9581_v1  ;;  %v16122_v1 = vld [vmem:[#allocation185_spill] sm:$0xff]  ;;  %v16125_v45 = vld [vmem:[#allocation188_spill] sm:$0xff] }
 0xb28   :  { %v7335_v30 = vadd.f32 %v9548_v35, %v7265_v33  ;;  %v16120_v33 = vld [vmem:[#allocation183_spill] sm:$0xff] }
 0xb29   :  { %v16124_v35 = vld [vmem:[#allocation187_spill] sm:$0xff] }
 0xb2a   :  { %v7405_v11 = vadd.f32 %v9583_v47, %v7335_v30  ;;  %v16126_v47 = vld [vmem:[#allocation189_spill] sm:$0xff]  ;;  %v16127_v30 = vld [vmem:[#allocation190_spill] sm:$0xff] }
 0xb2c   :  { %9656 = vmatpush3.msra.mxu1 %v7405_v11  ;;  %v16128_v11 = vld [vmem:[#allocation191_spill] sm:$0xff] }
 0xb2d   :  { %9658 = vmatmul.mubr.msk.f32.vlgmr.msra.gmra.mrb[90].mxu1 %vm4528_vm1, %v14541_v59  ;;  %10732 = vmatprep.subr.bf16.mxu1 %v15915_v31 }
 0xb2e   :  { %10734 = vmatpush3.bf16.msra.mxu1 %v15916_v39  ;;  %9676 = vmatprep.mubr.msk.f32.mxu1 %vm10896_vm0, %v15706_v42 }
 0xb2f   :  { %10735 = vmatprep.subr.bf16.mxu1 %v15915_v31 }
 0xb32   :  { %10737 = vmatpush3.bf16.msra.mxu1 %v15917_v4  ;;  %v16107_v4 = vld [vmem:[#allocation176_spill] sm:$0xff] }
 0xb33   :  { %10738 = vmatprep.subr.bf16.mxu1 %v15915_v31 }
 0xb36   :  { %10740 = vmatpush3.bf16.msra.mxu1 %v15918_v16  ;;  %v16108_v16 = vld [vmem:[#allocation178_spill] sm:$0xff] }
 0xb37   :  { %10741 = vmatprep.subr.bf16.mxu1 %v15915_v31  ;;  %v16106_v31 = vld [vmem:[#allocation174_spill] sm:$0xff] }
 0xb3a   :  { %10743 = vmatpush3.bf16.msra.mxu1 %v15919_v41  ;;  %v16109_v41 = vld [vmem:[#allocation180_spill] sm:$0xff] }
 0xb3b   :  { %10761 = vmatprep.subr.bf16.mxu1 %v15920_v12 }
 0xc00   :  { %v7474_v59 = vpop.f32.mrb[90].mxu1 }
 0xc01   :  { %v7478_v48 = vmul.f32 0.015625, %v7474_v59  ;;  %v9659_v39 = vpop.f32.mrb[91].mxu1  ;;  %v16129_v59 = vld [vmem:[#allocation192_spill] sm:$0xff] }
 0xc02   :  { %v16131_v39 = vld [vmem:[#allocation194_spill] sm:$0xff] }
 0xc03   :  { %9677 = vmatmul.mubr.msk.f32.vlgmr.msra.gmra.mrb[92].mxu1 %vm4603_vm2, %v7478_v48  ;;  %v16130_v48 = vld [vmem:[#allocation193_spill] sm:$0xff] }
 0xc04   :  { %10763 = vmatpush1.bf16.msra.mxu1 %v15921_v36  ;;  %7770 = vmatprep.mubr.f32.mxu1 %v15706_v42  ;;  %v16110_v36 = vld [vmem:[#allocation165_spill] sm:$0xff] }
 0xc05   :  { %10765 = vmatprep.subr.bf16.mxu1 %v15922_v22  ;;  %v16111_v22 = vld [vmem:[#allocation167_spill] sm:$0xff] }
 0xc08   :  { %10767 = vmatpush1.bf16.msra.mxu1 %v15923_v19  ;;  %v16112_v19 = vld [vmem:[#allocation169_spill] sm:$0xff] }
 0xc09   :  { %10769 = vmatprep.subr.bf16.mxu1 %v15924_v20  ;;  %v16113_v20 = vld [vmem:[#allocation171_spill] sm:$0xff] }
 0xc0c   :  { %10771 = vmatpush1.bf16.msra.mxu1 %v16106_v31  ;;  %v16132_v31 = vld [vmem:[#allocation195_spill] sm:$0xff] }
 0xc0d   :  { %10773 = vmatprep.subr.bf16.mxu1 %v16107_v4  ;;  %v16133_v4 = vld [vmem:[#allocation196_spill] sm:$0xff] }
 0xc10   :  { %10775 = vmatpush1.bf16.msra.mxu1 %v16108_v16  ;;  %v16134_v16 = vld [vmem:[#allocation197_spill] sm:$0xff] }
 0xc11   :  { %10793 = vmatprep.subr.bf16.mxu1 %v16109_v41  ;;  %v16135_v41 = vld [vmem:[#allocation198_spill] sm:$0xff] }
 0xcd6   :  { %v7548_v12 = vpop.f32.mrb[92].mxu1 }
 0xcd7   :  { %v7552_v23 = vmax.f32 %v7548_v12, 0.0  ;;  %v9678_v57 = vpop.f32.mrb[93].mxu1  ;;  %v16136_v12 = vld [vmem:[#allocation199_spill] sm:$0xff] }
 0xcd8   :  { %v16138_v57 = vld [vmem:[#allocation201_spill] sm:$0xff] }
 0xcd9   :  { %9682 = vmatmul.mubr.msk.f32.vlgmr.msra.gmra.mrb[98].mxu0 %vm4678_vm4, %v7552_v23  ;;  %v16137_v23 = vld [vmem:[#allocation200_spill] sm:$0xff] }
 0xcda   :  { %10747 = vmatpush1.bf16.msra.mxu0 %v16110_v36  ;;  %7699 = vmatprep.mubr.f32.mxu0 %v15706_v42  ;;  %v16139_v36 = vld [vmem:[#allocation205_spill] sm:$0xff] }
 0xcdb   :  { %10749 = vmatprep.subr.bf16.mxu0 %v16111_v22  ;;  %v16140_v22 = vld [vmem:[#allocation206_spill] sm:$0xff] }
 0xcde   :  { %10751 = vmatpush1.bf16.msra.mxu0 %v16112_v19  ;;  %v16141_v19 = vld [vmem:[#allocation207_spill] sm:$0xff] }
 0xcdf   :  { %10753 = vmatprep.subr.bf16.mxu0 %v16113_v20  ;;  %v16142_v20 = vld [vmem:[#allocation208_spill] sm:$0xff] }
 0xce2   :  { %10755 = vmatpush1.bf16.msra.mxu0 %v16114_v3  ;;  %v16143_v3 = vld [vmem:[#allocation212_spill] sm:$0xff] }
 0xce3   :  { %10757 = vmatprep.subr.bf16.mxu0 %v16115_v55 }
 0xce6   :  { %10759 = vmatpush1.bf16.msra.mxu0 %v16116_v29 }
 0xce7   :  { %10777 = vmatprep.subr.bf16.mxu0 %v16117_v44 }
 0xdac   :  { %v7622_v24 = vpop.f32.mrb[98].mxu0 }
 0xdad   :  { %v8709_v61 = vmul.f32 -1.442695, %v7622_v24  ;;  %v9683_v14 = vpop.f32.mrb[99].mxu0 }
 0xdaf   :  { %10884 = vpow2.f32 %v8709_v61 }
 0xdb9   :  { %v10885_v0 = vpop.eup %10884 }
 0xdba   :  { %v7629_v58 = vadd.f32 1.0, %v10885_v0 }
 0xdbc   :  { %10886 = vrcp.f32 %v7629_v58 }
 0xdc6   :  { %v10887_v8 = vpop.eup %10886 }
 0xdc7   :  { %8710 = vmatmul.mubr.msk.f32.vlgmr.msra.gmra.mrb[100].mxu0 %vm4603_vm2, %v10887_v8  ;;  %8711 = vmatmul.mubr.msk.f32.vlgmr.msra.gmra.mrb[94].mxu1 %vm4603_vm2, %v10887_v8 }
 0xdc8   :  { %10779 = vmatpush1.bf16.msra.mxu0 %v16118_v15  ;;  %10795 = vmatpush1.bf16.msra.mxu1 %v16119_v21 }
 0xdc9   :  { %10781 = vmatprep.subr.bf16.mxu0 %v16120_v33  ;;  %10797 = vmatprep.subr.bf16.mxu1 %v16121_v50 }
 0xdca   :  { %7841 = vmatprep.mubr.f32.mxu0 %v15706_v42  ;;  %7912 = vmatprep.mubr.f32.mxu1 %v15706_v42 }
 0xdcc   :  { %10783 = vmatpush1.bf16.msra.mxu0 %v16122_v1  ;;  %10799 = vmatpush1.bf16.msra.mxu1 %v16123_v34 }
 0xdcd   :  { %10785 = vmatprep.subr.bf16.mxu0 %v16124_v35  ;;  %10801 = vmatprep.subr.bf16.mxu1 %v16125_v45 }
 0xdd0   :  { %10787 = vmatpush1.bf16.msra.mxu0 %v16126_v47  ;;  %10803 = vmatpush1.bf16.msra.mxu1 %v16127_v30 }
 0xdd1   :  { %10789 = vmatprep.subr.bf16.mxu0 %v16128_v11  ;;  %10805 = vmatprep.subr.bf16.mxu1 %v16129_v59 }
 0xdd4   :  { %10791 = vmatpush1.bf16.msra.mxu0 %v16130_v48  ;;  %10807 = vmatpush1.bf16.msra.mxu1 %v16131_v39 }
 0xdd5   :  { %10809 = vmatprep.subr.bf16.mxu0 %v16132_v31  ;;  %10825 = vmatprep.subr.bf16.mxu1 %v16133_v4 }
 0xdd7   :  { %8712 = vmatmul.mubr.msk.f32.vlgmr.msra.gmra.mrb[102].mxu0 %vm4603_vm2, %v10887_v8  ;;  %8713 = vmatmul.mubr.msk.f32.vlgmr.msra.gmra.mrb[96].mxu1 %vm4603_vm2, %v10887_v8 }
 0xdd8   :  { %10811 = vmatpush1.bf16.msra.mxu0 %v16134_v16  ;;  %10827 = vmatpush1.bf16.msra.mxu1 %v16135_v41 }
 0xdd9   :  { %10813 = vmatprep.subr.bf16.mxu0 %v16136_v12  ;;  %10829 = vmatprep.subr.bf16.mxu1 %v16137_v23 }
 0xdda   :  { %7983 = vmatprep.mubr.f32.mxu0 %v15706_v42  ;;  %8054 = vmatprep.mubr.f32.mxu1 %v15706_v42 }
 0xddc   :  { %10815 = vmatpush1.bf16.msra.mxu0 %v16138_v57  ;;  %10831 = vmatpush1.bf16.msra.mxu1 %v15950_v46  ;;  %v16147_v46 = vld [vmem:[#allocation219_spill] sm:$0xff] }
 0xddd   :  { %10817 = vmatprep.subr.bf16.mxu0 %v15951_v37  ;;  %10833 = vmatprep.subr.bf16.mxu1 %v15952_v63  ;;  %v16144_v37 = vld [vmem:[#allocation216_spill] sm:$0xff]  ;;  %v16146_v63 = vld [vmem:[#allocation218_spill] sm:$0xff] }
 0xde0   :  { %10819 = vmatpush1.bf16.msra.mxu0 %v16139_v36  ;;  %10835 = vmatpush1.bf16.msra.mxu1 %v16140_v22 }
 0xde1   :  { %10821 = vmatprep.subr.bf16.mxu0 %v16141_v19  ;;  %10837 = vmatprep.subr.bf16.mxu1 %v16142_v20 }
 0xde4   :  { %10823 = vmatpush1.bf16.msra.mxu0 %v15957_v38  ;;  %10839 = vmatpush1.bf16.msra.mxu1 %v15958_v9  ;;  %v16145_v38 = vld [vmem:[#allocation217_spill] sm:$0xff] }
 0xde5   :  { %10841 = vmatprep.subr.bf16.mxu0 %v15959_v40  ;;  %10857 = vmatprep.subr.bf16.mxu1 %v16143_v3  ;;  %v16148_v40 = vld [vmem:[#allocation220_spill] sm:$0xff] }
 0xde7   :  { %8714 = vmatmul.mubr.msk.f32.vlgmr.msra.gmra.mrb[104].mxu0 %vm4603_vm2, %v10887_v8  ;;  %8715 = vmatmul.mubr.msk.f32.vlgmr.msra.gmra.mrb[98].mxu1 %vm4603_vm2, %v10887_v8 }
 0xde8   :  { %10843 = vmatpush1.bf16.msra.mxu0 %v15961_v52  ;;  %10859 = vmatpush1.bf16.msra.mxu1 %v15962_v27  ;;  %v16149_v27 = vld [vmem:[#allocation221_spill] sm:$0xff] }
 0xde9   :  { %10845 = vmatprep.subr.bf16.mxu0 %v15963_v5  ;;  %10861 = vmatprep.subr.bf16.mxu1 %v16144_v37  ;;  %v16150_v5 = vld [vmem:[#allocation222_spill] sm:$0xff] }
 0xdea   :  { %8125 = vmatprep.mubr.f32.mxu0 %v15706_v42  ;;  %8196 = vmatprep.mubr.f32.mxu1 %v15706_v42 }
 0xdec   :  { %10847 = vmatpush1.bf16.msra.mxu0 %v14142_v43  ;;  %10863 = vmatpush1.bf16.msra.mxu1 %v16145_v38 }
 0xded   :  { %10849 = vmatprep.subr.bf16.mxu0 %v16146_v63  ;;  %10865 = vmatprep.subr.bf16.mxu1 %v14156_v2 }
 0xdf0   :  { %10851 = vmatpush1.bf16.msra.mxu0 %v16147_v46  ;;  %10867 = vmatpush1.bf16.msra.mxu1 %v16148_v40 }
 0xdf1   :  { %10853 = vmatprep.subr.bf16.mxu0 %v16149_v27  ;;  %10869 = vmatprep.subr.bf16.mxu1 %v16150_v5 }
 0xdf4   :  { %10855 = vmatpush1.bf16.msra.mxu0 %v14204_v54  ;;  %10871 = vmatpush1.bf16.msra.mxu1 %v14206_v53 }
 0xdf7   :  { %8716 = vmatmul.mubr.msk.f32.vlgmr.msra.gmra.mrb[106].mxu0 %vm4603_vm2, %v10887_v8  ;;  %8717 = vmatmul.mubr.msk.f32.vlgmr.msra.gmra.mrb[100].mxu1 %vm4603_vm2, %v10887_v8 }
 0xe9a   :  { %v7701_v42 = vpop.f32.mrb[100].mxu0  ;;  %v7772_v43 = vpop.f32.mrb[94].mxu1 }
 0xe9b   :  { %v8203_v9 = vsub.f32 0.0, %v7701_v42  ;;  %v8205_v2 = vsub.f32 0.0, %v7772_v43  ;;  %v7703_v52 = vpop.f32.mrb[101].mxu0  ;;  %v7774_v55 = vpop.f32.mrb[95].mxu1 }
 0xe9c   :  { %v8204_v29 = vsub.f32 0.0, %v7703_v52  ;;  %v8206_v44 = vsub.f32 0.0, %v7774_v55 }
 0xe9d   :  { %v8219_v24 = vmax.f32 %v8203_v9, %v14704_v62  ;;  %v8221_v61 = vmax.f32 %v8205_v2, %v14709_v17 }
 0xe9e   :  { %v8220_v54 = vmax.f32 %v8204_v29, %v14655_v13  ;;  %v8222_v53 = vmax.f32 %v8206_v44, %v14658_v28 }
 0xe9f   :  { %v8235_v14 = vmin.f32 %v7701_v42, %v8219_v24  ;;  %v8237_v0 = vmin.f32 %v7772_v43, %v8221_v61 }
 0xea0   :  { %v8236_v58 = vmin.f32 %v7703_v52, %v8220_v54  ;;  %v8238_v8 = vmin.f32 %v7774_v55, %v8222_v53  ;;  %v16151_v54 = vld [vmem:[#allocation56_spill] sm:$0xff] }
 0xea1   :  { %v8251_v15 = vsub.f32 %v14704_v62, %v8235_v14  ;;  %v8253_v21 = vsub.f32 %v14709_v17, %v8237_v0 }
 0xea2   :  { %v8252_v33 = vsub.f32 %v14655_v13, %v8236_v58  ;;  %v8254_v50 = vsub.f32 %v14658_v28, %v8238_v8 }
 0xea3   :  { %8267 = vst [vmem:[%s15148_s10] sm:$0xff] %v8251_v15  ;;  %8269 = vst [vmem:[%s15148_s10 + $0x10] sm:$0xff] %v8253_v21 }
 0xea4   :  { %8268 = vst [vmem:[%s15148_s10 + $0x8] sm:$0xff] %v8252_v33  ;;  %8270 = vst [vmem:[%s15148_s10 + $0x18] sm:$0xff] %v8254_v50 }
 0xeaa   :  { %v7843_v62 = vpop.f32.mrb[102].mxu0  ;;  %v7914_v13 = vpop.f32.mrb[96].mxu1 }
 0xeab   :  { %v8207_v17 = vsub.f32 0.0, %v7843_v62  ;;  %v8209_v28 = vsub.f32 0.0, %v7914_v13  ;;  %v7845_v1 = vpop.f32.mrb[103].mxu0  ;;  %v7916_v34 = vpop.f32.mrb[97].mxu1 }
 0xeac   :  { %v8208_v35 = vsub.f32 0.0, %v7845_v1  ;;  %v8210_v45 = vsub.f32 0.0, %v7916_v34 }
 0xead   :  { %v8223_v47 = vmax.f32 %v8207_v17, %v14763_v51  ;;  %v8225_v30 = vmax.f32 %v8209_v28, %v16018_v60 }
 0xeae   :  { %v8224_v11 = vmax.f32 %v8208_v35, %v14713_v26  ;;  %v8226_v59 = vmax.f32 %v8210_v45, %v14717_v10 }
 0xeaf   :  { %v8239_v48 = vmin.f32 %v7843_v62, %v8223_v47  ;;  %v8241_v39 = vmin.f32 %v7914_v13, %v8225_v30 }
 0xeb0   :  { %v8240_v31 = vmin.f32 %v7845_v1, %v8224_v11  ;;  %v8242_v4 = vmin.f32 %v7916_v34, %v8226_v59 }
 0xeb1   :  { %v8255_v16 = vsub.f32 %v14763_v51, %v8239_v48  ;;  %v8257_v41 = vsub.f32 %v16018_v60, %v8241_v39 }
 0xeb2   :  { %v8256_v12 = vsub.f32 %v14713_v26, %v8240_v31  ;;  %v8258_v23 = vsub.f32 %v14717_v10, %v8242_v4 }
 0xeb3   :  { %8271 = vst [vmem:[%s15148_s10 + $0x20] sm:$0xff] %v8255_v16  ;;  %8273 = vst [vmem:[%s15148_s10 + $0x30] sm:$0xff] %v8257_v41 }
 0xeb4   :  { %8272 = vst [vmem:[%s15148_s10 + $0x28] sm:$0xff] %v8256_v12  ;;  %8274 = vst [vmem:[%s15148_s10 + $0x38] sm:$0xff] %v8258_v23 }
 0xeba   :  { %v7985_v51 = vpop.f32.mrb[104].mxu0  ;;  %v8056_v26 = vpop.f32.mrb[98].mxu1 }
 0xebb   :  { %v8211_v60 = vsub.f32 0.0, %v7985_v51  ;;  %v8213_v10 = vsub.f32 0.0, %v8056_v26  ;;  %v7987_v57 = vpop.f32.mrb[105].mxu0  ;;  %v8058_v36 = vpop.f32.mrb[99].mxu1 }
 0xebc   :  { %v8212_v22 = vsub.f32 0.0, %v7987_v57  ;;  %v8214_v19 = vsub.f32 0.0, %v8058_v36 }
 0xebd   :  { %v8227_v20 = vmax.f32 %v8211_v60, %v14816_v32  ;;  %v8229_v3 = vmax.f32 %v8213_v10, %v14821_v49 }
 0xebe   :  { %v8228_v37 = vmax.f32 %v8212_v22, %v14769_v7  ;;  %v8230_v38 = vmax.f32 %v8214_v19, %v14773_v18 }
 0xebf   :  { %v8243_v63 = vmin.f32 %v7985_v51, %v8227_v20  ;;  %v8245_v46 = vmin.f32 %v8056_v26, %v8229_v3 }
 0xec0   :  { %v8244_v40 = vmin.f32 %v7987_v57, %v8228_v37  ;;  %v8246_v27 = vmin.f32 %v8058_v36, %v8230_v38 }
 0xec1   :  { %v8259_v5 = vsub.f32 %v14816_v32, %v8243_v63  ;;  %v8261_v42 = vsub.f32 %v14821_v49, %v8245_v46 }
 0xec2   :  { %v8260_v43 = vsub.f32 %v14769_v7, %v8244_v40  ;;  %v8262_v9 = vsub.f32 %v14773_v18, %v8246_v27 }
 0xec3   :  { %8275 = vst [vmem:[%s15148_s10 + $0x40] sm:$0xff] %v8259_v5  ;;  %8277 = vst [vmem:[%s15148_s10 + $0x50] sm:$0xff] %v8261_v42 }
 0xec4   :  { %8276 = vst [vmem:[%s15148_s10 + $0x48] sm:$0xff] %v8260_v43  ;;  %8278 = vst [vmem:[%s15148_s10 + $0x58] sm:$0xff] %v8262_v9 }
 0xeca   :  { %v8127_v32 = vpop.f32.mrb[106].mxu0  ;;  %v8198_v7 = vpop.f32.mrb[100].mxu1 }
 0xecb   :  { %v8215_v49 = vsub.f32 0.0, %v8127_v32  ;;  %v8217_v18 = vsub.f32 0.0, %v8198_v7  ;;  %v8129_v2 = vpop.f32.mrb[107].mxu0  ;;  %v8200_v52 = vpop.f32.mrb[101].mxu1 }
 0xecc   :  { %v8216_v55 = vsub.f32 0.0, %v8129_v2  ;;  %v8218_v29 = vsub.f32 0.0, %v8200_v52 }
 0xecd   :  { %v8231_v44 = vmax.f32 %v8215_v49, %v14868_v6  ;;  %v8233_v24 = vmax.f32 %v8217_v18, %v14873_v25 }
 0xece   :  { %v8232_v61 = vmax.f32 %v8216_v55, %v14825_v56  ;;  %v8234_v53 = vmax.f32 %v8218_v29, %v16151_v54 }
 0xecf   :  { %v8247_v14 = vmin.f32 %v8127_v32, %v8231_v44  ;;  %v8249_v0 = vmin.f32 %v8198_v7, %v8233_v24 }
 0xed0   :  { %v8248_v58 = vmin.f32 %v8129_v2, %v8232_v61  ;;  %v8250_v8 = vmin.f32 %v8200_v52, %v8234_v53 }
 0xed1   :  { %v8263_v15 = vsub.f32 %v14868_v6, %v8247_v14  ;;  %v8265_v21 = vsub.f32 %v14873_v25, %v8249_v0 }
 0xed2   :  { %v8264_v33 = vsub.f32 %v14825_v56, %v8248_v58  ;;  %v8266_v50 = vsub.f32 %v16151_v54, %v8250_v8 }
 0xed3   :  { %8279 = vst [vmem:[%s15148_s10 + $0x60] sm:$0xff] %v8263_v15  ;;  %8281 = vst [vmem:[%s15148_s10 + $0x70] sm:$0xff] %v8265_v21 }
 0xed4   :  { %8280 = vst [vmem:[%s15148_s10 + $0x68] sm:$0xff] %v8264_v33  ;;  %8282 = vst [vmem:[%s15148_s10 + $0x78] sm:$0xff] %v8266_v50 }

</bundles_post_ra>
